<compile_context>
chip_gen: v6e
topology: v6e:2x2x1
jax: 0.10.0
libtpu: 0.0.40
codegen_flags: <defaults>
</compile_context>

<pallas_src>
import jax
import jax.numpy as jnp
from jax import lax
from jax.experimental import pallas as pl
from jax.experimental.pallas import tpu as pltpu

# ---------------------------------------------------------------------------
# Model dimensions (synthetic, consistent with the original module).
# ---------------------------------------------------------------------------
EMBEDDING_DIMS = 50
POSITION_DIMS = 5
HIDDEN_DIMS = EMBEDDING_DIMS + 2 * POSITION_DIMS   # 60
HIDDEN_PAD = 128                                   # per-gate lane padding (vreg aligned)
VOCAB_SIZE = 100
MAX_POSITION = 20
N_OUT = 10

BATCH = 2
SEQ_LEN = 8


# ---------------------------------------------------------------------------
# Pallas kernel: bidirectional LSTM + (folded) attention + linear head.
# ---------------------------------------------------------------------------
def _bilstm_att_kernel(
    x_ref,      # (T*B, D)        bf16  time-major embedded input, rows = t*B + b
    wih_ref,    # (D, 8*Hp)       bf16  fused W_ih, [fwd gates | bwd gates], gate order i,f,g,o
    whh_f_ref,  # (Hp, 4*Hp)      bf16  fused forward  W_hh (zero padded)
    whh_b_ref,  # (Hp, 4*Hp)      bf16  fused backward W_hh (zero padded)
    b_f_ref,    # (1, 4*Hp)       f32   forward  b_ih + b_hh (fused, zero padded)
    b_b_ref,    # (1, 4*Hp)       f32   backward b_ih + b_hh
    fcw_ref,    # (Hp, n_out)     f32   fc.weight.T (zero-padded rows)
    fcb_ref,    # (1, n_out)      f32   fc.bias
    out_ref,    # (B, n_out)      f32   output logits
):
    TB, _ = x_ref.shape
    B, _ = out_ref.shape
    T = TB // B
    Hp = whh_f_ref.shape[0]
    G = 4 * Hp

    # ---- Hoisted input projections: all timesteps, both directions, 1 matmul ----
    xw = jnp.dot(x_ref[...], wih_ref[...],
                 preferred_element_type=jnp.float32)         # (T*B, 2G) f32
    pre_f = xw[:, :G] + b_f_ref[...]                          # (T*B, G)
    pre_b = xw[:, G:] + b_b_ref[...]                          # (T*B, G)

    # Hoist weight reads out of the recurrence (single VMEM->vreg load each).
    whh_f = whh_f_ref[...]
    whh_b = whh_b_ref[...]

    def cell(pre, h, c, whh):
        # One fused-gate MXU matmul per cell; f32 accumulate, f32 elementwise.
        gates = pre + jnp.dot(h.astype(jnp.bfloat16), whh,
                              preferred_element_type=jnp.float32)   # (B, 4*Hp)
        # Per-gate slices start on 128-lane boundaries -> no cross-lane movement.
        i = jax.nn.sigmoid(gates[:, 0 * Hp:1 * Hp])
        f = jax.nn.sigmoid(gates[:, 1 * Hp:2 * Hp])
        g = jnp.tanh(gates[:, 2 * Hp:3 * Hp])
        o = jax.nn.sigmoid(gates[:, 3 * Hp:4 * Hp])
        c_new = f * c + i * g
        h_new = o * jnp.tanh(c_new)
        return h_new, c_new

    zeros = jnp.zeros((B, Hp), jnp.float32)
    h_f, c_f = zeros, zeros
    h_b, c_b = zeros, zeros
    h_sum = zeros

    # Fully unrolled static loop (T = 8); both directions interleaved for ILP on
    # the serial hidden-state chain.
    for s in range(T):
        tf = s                     # forward direction walks t = 0 .. T-1
        tb = T - 1 - s             # backward direction walks t = T-1 .. 0
        h_f, c_f = cell(pre_f[tf * B:(tf + 1) * B, :], h_f, c_f, whh_f)
        h_b, c_b = cell(pre_b[tb * B:(tb + 1) * B, :], h_b, c_b, whh_b)
        # Softmax(dim=1) on (B, 1, T) is over a singleton axis => alpha == 1,
        # so the attention reduces to a plain sum over timesteps.
        h_sum = h_sum + h_f + h_b

    sen = jnp.tanh(h_sum)                                     # (B, Hp), padded lanes are 0
    out_ref[...] = (jnp.dot(sen, fcw_ref[...], preferred_element_type=jnp.float32)
                    + fcb_ref[...])


# ---------------------------------------------------------------------------
# Weight packing helpers (gate order i, f, g, o; per-gate zero-pad to Hp lanes).
# ---------------------------------------------------------------------------
def _pack_gates(w, hp, pad_rows=0):
    # w: (4, R, H) -> (R + pad_rows, 4*hp), gate-major columns, zero padded.
    h = w.shape[-1]
    w = jnp.pad(w, ((0, 0), (0, pad_rows), (0, hp - h)))
    return jnp.concatenate([w[0], w[1], w[2], w[3]], axis=1)


# ---------------------------------------------------------------------------
# Wrapper: embeddings / concat / layout glue in plain JAX, hot path in Pallas.
# ---------------------------------------------------------------------------
@jax.jit
def cnn_one_att_forward(words, pos1, pos2, sdp, params):
    del sdp  # sdp is an argument of forward() but is never used by the module.

    # Embedding lookups + concat (drop1 is identity in eval mode).
    e1 = params["emb1"][words]                 # (B, T, 50)
    e2 = params["emb2"][pos1]                  # (B, T, 5)
    e3 = params["emb2"][pos2]                  # (B, T, 5)
    x = jnp.concatenate([e1, e2, e3], axis=2).astype(jnp.float32)   # (B, T, D)

    B, T, D = x.shape
    H = HIDDEN_DIMS
    Hp = HIDDEN_PAD
    n_out = params["fc_b"].shape[-1]

    # Time-major, flattened (T*B, D); bf16 MXU operand.
    x_2d = jnp.transpose(x, (1, 0, 2)).reshape(T * B, D).astype(jnp.bfloat16)

    # Fused-gate packing (zero padded so padded hidden lanes provably stay zero).
    wih_f = _pack_gates(params["wih_f"], Hp)                              # (D, 4Hp)
    wih_b = _pack_gates(params["wih_b"], Hp)                              # (D, 4Hp)
    wih_all = jnp.concatenate([wih_f, wih_b], axis=1).astype(jnp.bfloat16)  # (D, 8Hp)
    whh_f = _pack_gates(params["whh_f"], Hp, pad_rows=Hp - H).astype(jnp.bfloat16)  # (Hp, 4Hp)
    whh_b = _pack_gates(params["whh_b"], Hp, pad_rows=Hp - H).astype(jnp.bfloat16)  # (Hp, 4Hp)
    b_f = _pack_gates(params["b_f"], Hp)                                  # (1, 4Hp) f32
    b_b = _pack_gates(params["b_b"], Hp)                                  # (1, 4Hp) f32
    fc_w = jnp.pad(params["fc_w"], ((0, Hp - H), (0, 0)))                 # (Hp, n_out)
    fc_b = params["fc_b"]                                                 # (1, n_out)

    kernel_inputs = (x_2d, wih_all, whh_f, whh_b, b_f, b_b, fc_w, fc_b)

    # Whole-array VMEM residency: total working set is well under 1 MiB, so no grid
    # or tiling is needed on any generation (v5e/v6e/v7x scoped-VMEM limits are moot).
    return pl.pallas_call(
        _bilstm_att_kernel,
        out_shape=jax.ShapeDtypeStruct((B, n_out), jnp.float32),
        in_specs=[pl.BlockSpec(memory_space=pltpu.MemorySpace.VMEM)] * len(kernel_inputs),
        out_specs=pl.BlockSpec(memory_space=pltpu.MemorySpace.VMEM),
    )(*kernel_inputs)


# ---------------------------------------------------------------------------
# Pure-JAX reference (for a correctness check of the kernel), full f32.
# ---------------------------------------------------------------------------
def reference_forward(words, pos1, pos2, params):
    e1 = params["emb1"][words]
    e2 = params["emb2"][pos1]
    e3 = params["emb2"][pos2]
    x = jnp.concatenate([e1, e2, e3], axis=2).astype(jnp.float32)   # (B, T, D)
    B, T, _ = x.shape
    H = HIDDEN_DIMS
    x_tbd = jnp.transpose(x, (1, 0, 2))

    def run_dir(x_seq, wih, whh, b):
        def step(carry, x_t):
            h, c = carry
            i = jax.nn.sigmoid(x_t @ wih[0] + h @ whh[0] + b[0])
            f = jax.nn.sigmoid(x_t @ wih[1] + h @ whh[1] + b[1])
            g = jnp.tanh(x_t @ wih[2] + h @ whh[2] + b[2])
            o = jax.nn.sigmoid(x_t @ wih[3] + h @ whh[3] + b[3])
            c = f * c + i * g
            h = o * jnp.tanh(c)
            return (h, c), h
        init = (jnp.zeros((B, H), jnp.float32), jnp.zeros((B, H), jnp.float32))
        _, hs = lax.scan(step, init, x_seq)
        return hs                                                    # (T, B, H)

    h_fwd = run_dir(x_tbd, params["wih_f"], params["whh_f"], params["b_f"])
    h_bwd = run_dir(x_tbd[::-1], params["wih_b"], params["whh_b"], params["b_b"])[::-1]
    h_sum = h_fwd + h_bwd                                            # (T, B, H)

    # Softmax over a singleton axis => alpha == 1 (score path is dead compute).
    sen = jnp.tanh(jnp.sum(h_sum, axis=0))                           # (B, H)
    return sen @ params["fc_w"] + params["fc_b"]


# ---------------------------------------------------------------------------
# Deterministic parameter initialization (synthetic, shapes from __init__).
# ---------------------------------------------------------------------------
def init_params(key):
    H, D = HIDDEN_DIMS, HIDDEN_DIMS
    keys = jax.random.split(key, 12)
    scale = 1.0 / jnp.sqrt(H)

    def u(k, shape):
        return jax.random.uniform(k, shape, jnp.float32, -scale, scale)

    return {
        "emb1": jax.random.normal(keys[0], (VOCAB_SIZE, EMBEDDING_DIMS), jnp.float32),
        "emb2": jax.random.normal(keys[1], (MAX_POSITION, POSITION_DIMS), jnp.float32),
        # LSTM weights in right-multiply form, gate order (i, f, g, o);
        # biases are b_ih + b_hh folded together (eval-mode semantics documented).
        "wih_f": u(keys[2], (4, D, H)),
        "whh_f": u(keys[3], (4, H, H)),
        "b_f":   u(keys[4], (4, 1, H)),
        "wih_b": u(keys[5], (4, D, H)),
        "whh_b": u(keys[6], (4, H, H)),
        "b_b":   u(keys[7], (4, 1, H)),
        "att_w": jax.random.normal(keys[8], (1, H), jnp.float32),   # nn.Parameter(randn(H)) -- unused (dead path)
        "fc_w":  u(keys[9], (H, N_OUT)),                            # fc.weight.T
        "fc_b":  u(keys[10], (1, N_OUT)),
    }


if __name__ == "__main__":
    key = jax.random.PRNGKey(0)
    k_param, k_w, k_p1, k_p2, k_sdp = jax.random.split(key, 5)

    params = init_params(k_param)

    words = jax.random.randint(k_w, (BATCH, SEQ_LEN), 0, VOCAB_SIZE, dtype=jnp.int32)
    pos1 = jax.random.randint(k_p1, (BATCH, SEQ_LEN), 0, MAX_POSITION, dtype=jnp.int32)
    pos2 = jax.random.randint(k_p2, (BATCH, SEQ_LEN), 0, MAX_POSITION, dtype=jnp.int32)
    sdp = jax.random.randint(k_sdp, (BATCH, SEQ_LEN), 0, VOCAB_SIZE, dtype=jnp.int32)  # unused

    logits = cnn_one_att_forward(words, pos1, pos2, sdp, params)
    logits = jax.block_until_ready(logits)

    ref = jax.block_until_ready(reference_forward(words, pos1, pos2, params))
    assert logits.shape == (BATCH, N_OUT)
    # bf16 MXU operands with f32 accumulation -> slightly looser tolerance than pure f32.
    assert jnp.allclose(logits, ref, rtol=5e-2, atol=5e-2), (
        f"max abs diff {jnp.max(jnp.abs(logits - ref))}")

    print("KERNEL_OK")
</pallas_src>

<mosaic_0001>
module attributes {stable_mosaic.version = 11 : i64} {
  func.func @_bilstm_att_kernel(%arg0: memref<16x60xbf16, #tpu.memory_space<vmem>>, %arg1: memref<60x1024xbf16, #tpu.memory_space<vmem>>, %arg2: memref<128x512xbf16, #tpu.memory_space<vmem>>, %arg3: memref<128x512xbf16, #tpu.memory_space<vmem>>, %arg4: memref<1x512xf32, #tpu.memory_space<vmem>>, %arg5: memref<1x512xf32, #tpu.memory_space<vmem>>, %arg6: memref<128x10xf32, #tpu.memory_space<vmem>>, %arg7: memref<1x10xf32, #tpu.memory_space<vmem>>, %arg8: memref<2x10xf32, #tpu.memory_space<vmem>>) attributes {dimension_semantics = [], scalar_prefetch = 0 : i64, scratch_operands = 0 : i64, tpu.core_type = #tpu.core_type<tc>} {
    %c0 = arith.constant 0 : index
    %c0_0 = arith.constant 0 : index
    %0 = vector.load %arg0[%c0, %c0_0] : memref<16x60xbf16, #tpu.memory_space<vmem>>, vector<16x60xbf16>
    %c0_1 = arith.constant 0 : index
    %c0_2 = arith.constant 0 : index
    %1 = vector.load %arg1[%c0_1, %c0_2] : memref<60x1024xbf16, #tpu.memory_space<vmem>>, vector<60x1024xbf16>
    %cst = arith.constant dense<0.000000e+00> : vector<16x1024xf32>
    %2 = tpu.matmul %0, %1, %cst {dimension_numbers = #tpu.dot_dimension_numbers<[1], [0], [0], [1], [0, 0, 1, 1], [], []>} : vector<16x60xbf16>, vector<60x1024xbf16>, vector<16x1024xf32> -> vector<16x1024xf32>
    %3 = vector.extract_strided_slice %2 {offsets = [0, 0], sizes = [16, 512], strides = [1, 1]} : vector<16x1024xf32> to vector<16x512xf32>
    %c0_3 = arith.constant 0 : index
    %c0_4 = arith.constant 0 : index
    %4 = vector.load %arg4[%c0_3, %c0_4] : memref<1x512xf32, #tpu.memory_space<vmem>>, vector<1x512xf32>
    %5 = vector.broadcast %4 : vector<1x512xf32> to vector<16x512xf32>
    %6 = arith.addf %3, %5 : vector<16x512xf32>
    %7 = vector.extract_strided_slice %2 {offsets = [0, 512], sizes = [16, 512], strides = [1, 1]} : vector<16x1024xf32> to vector<16x512xf32>
    %c0_5 = arith.constant 0 : index
    %c0_6 = arith.constant 0 : index
    %8 = vector.load %arg5[%c0_5, %c0_6] : memref<1x512xf32, #tpu.memory_space<vmem>>, vector<1x512xf32>
    %9 = vector.broadcast %8 : vector<1x512xf32> to vector<16x512xf32>
    %10 = arith.addf %7, %9 : vector<16x512xf32>
    %c0_7 = arith.constant 0 : index
    %c0_8 = arith.constant 0 : index
    %11 = vector.load %arg2[%c0_7, %c0_8] : memref<128x512xbf16, #tpu.memory_space<vmem>>, vector<128x512xbf16>
    %c0_9 = arith.constant 0 : index
    %c0_10 = arith.constant 0 : index
    %12 = vector.load %arg3[%c0_9, %c0_10] : memref<128x512xbf16, #tpu.memory_space<vmem>>, vector<128x512xbf16>
    %cst_11 = arith.constant 0.000000e+00 : f32
    %13 = vector.broadcast %cst_11 : f32 to vector<2x128xf32>
    %14 = vector.extract_strided_slice %6 {offsets = [0, 0], sizes = [2, 512], strides = [1, 1]} : vector<16x512xf32> to vector<2x512xf32>
    %15 = arith.truncf %13 : vector<2x128xf32> to vector<2x128xbf16>
    %cst_12 = arith.constant dense<0.000000e+00> : vector<2x512xf32>
    %16 = tpu.matmul %15, %11, %cst_12 {dimension_numbers = #tpu.dot_dimension_numbers<[1], [0], [0], [1], [0, 0, 1, 1], [], []>} : vector<2x128xbf16>, vector<128x512xbf16>, vector<2x512xf32> -> vector<2x512xf32>
    %17 = arith.addf %14, %16 : vector<2x512xf32>
    %18 = vector.extract_strided_slice %17 {offsets = [0, 0], sizes = [2, 128], strides = [1, 1]} : vector<2x512xf32> to vector<2x128xf32>
    %19 = arith.negf %18 : vector<2x128xf32>
    %20 = math.exp %19 : vector<2x128xf32>
    %cst_13 = arith.constant 1.000000e+00 : f32
    %21 = vector.broadcast %cst_13 : f32 to vector<2x128xf32>
    %22 = arith.addf %21, %20 : vector<2x128xf32>
    %23 = arith.divf %21, %22 : vector<2x128xf32>
    %24 = vector.extract_strided_slice %17 {offsets = [0, 128], sizes = [2, 128], strides = [1, 1]} : vector<2x512xf32> to vector<2x128xf32>
    %25 = arith.negf %24 : vector<2x128xf32>
    %26 = math.exp %25 : vector<2x128xf32>
    %cst_14 = arith.constant 1.000000e+00 : f32
    %27 = vector.broadcast %cst_14 : f32 to vector<2x128xf32>
    %28 = arith.addf %27, %26 : vector<2x128xf32>
    %29 = arith.divf %27, %28 : vector<2x128xf32>
    %30 = vector.extract_strided_slice %17 {offsets = [0, 256], sizes = [2, 128], strides = [1, 1]} : vector<2x512xf32> to vector<2x128xf32>
    %31 = math.tanh %30 : vector<2x128xf32>
    %32 = vector.extract_strided_slice %17 {offsets = [0, 384], sizes = [2, 128], strides = [1, 1]} : vector<2x512xf32> to vector<2x128xf32>
    %33 = arith.negf %32 : vector<2x128xf32>
    %34 = math.exp %33 : vector<2x128xf32>
    %cst_15 = arith.constant 1.000000e+00 : f32
    %35 = vector.broadcast %cst_15 : f32 to vector<2x128xf32>
    %36 = arith.addf %35, %34 : vector<2x128xf32>
    %37 = arith.divf %35, %36 : vector<2x128xf32>
    %38 = arith.mulf %29, %13 : vector<2x128xf32>
    %39 = arith.mulf %23, %31 : vector<2x128xf32>
    %40 = arith.addf %38, %39 : vector<2x128xf32>
    %41 = math.tanh %40 : vector<2x128xf32>
    %42 = arith.mulf %37, %41 : vector<2x128xf32>
    %43 = vector.extract_strided_slice %10 {offsets = [14, 0], sizes = [2, 512], strides = [1, 1]} : vector<16x512xf32> to vector<2x512xf32>
    %44 = arith.truncf %13 : vector<2x128xf32> to vector<2x128xbf16>
    %cst_16 = arith.constant dense<0.000000e+00> : vector<2x512xf32>
    %45 = tpu.matmul %44, %12, %cst_16 {dimension_numbers = #tpu.dot_dimension_numbers<[1], [0], [0], [1], [0, 0, 1, 1], [], []>} : vector<2x128xbf16>, vector<128x512xbf16>, vector<2x512xf32> -> vector<2x512xf32>
    %46 = arith.addf %43, %45 : vector<2x512xf32>
    %47 = vector.extract_strided_slice %46 {offsets = [0, 0], sizes = [2, 128], strides = [1, 1]} : vector<2x512xf32> to vector<2x128xf32>
    %48 = arith.negf %47 : vector<2x128xf32>
    %49 = math.exp %48 : vector<2x128xf32>
    %cst_17 = arith.constant 1.000000e+00 : f32
    %50 = vector.broadcast %cst_17 : f32 to vector<2x128xf32>
    %51 = arith.addf %50, %49 : vector<2x128xf32>
    %52 = arith.divf %50, %51 : vector<2x128xf32>
    %53 = vector.extract_strided_slice %46 {offsets = [0, 128], sizes = [2, 128], strides = [1, 1]} : vector<2x512xf32> to vector<2x128xf32>
    %54 = arith.negf %53 : vector<2x128xf32>
    %55 = math.exp %54 : vector<2x128xf32>
    %cst_18 = arith.constant 1.000000e+00 : f32
    %56 = vector.broadcast %cst_18 : f32 to vector<2x128xf32>
    %57 = arith.addf %56, %55 : vector<2x128xf32>
    %58 = arith.divf %56, %57 : vector<2x128xf32>
    %59 = vector.extract_strided_slice %46 {offsets = [0, 256], sizes = [2, 128], strides = [1, 1]} : vector<2x512xf32> to vector<2x128xf32>
    %60 = math.tanh %59 : vector<2x128xf32>
    %61 = vector.extract_strided_slice %46 {offsets = [0, 384], sizes = [2, 128], strides = [1, 1]} : vector<2x512xf32> to vector<2x128xf32>
    %62 = arith.negf %61 : vector<2x128xf32>
    %63 = math.exp %62 : vector<2x128xf32>
    %cst_19 = arith.constant 1.000000e+00 : f32
    %64 = vector.broadcast %cst_19 : f32 to vector<2x128xf32>
    %65 = arith.addf %64, %63 : vector<2x128xf32>
    %66 = arith.divf %64, %65 : vector<2x128xf32>
    %67 = arith.mulf %58, %13 : vector<2x128xf32>
    %68 = arith.mulf %52, %60 : vector<2x128xf32>
    %69 = arith.addf %67, %68 : vector<2x128xf32>
    %70 = math.tanh %69 : vector<2x128xf32>
    %71 = arith.mulf %66, %70 : vector<2x128xf32>
    %72 = arith.addf %13, %42 : vector<2x128xf32>
    %73 = arith.addf %72, %71 : vector<2x128xf32>
    %74 = vector.extract_strided_slice %6 {offsets = [2, 0], sizes = [2, 512], strides = [1, 1]} : vector<16x512xf32> to vector<2x512xf32>
    %75 = arith.truncf %42 : vector<2x128xf32> to vector<2x128xbf16>
    %cst_20 = arith.constant dense<0.000000e+00> : vector<2x512xf32>
    %76 = tpu.matmul %75, %11, %cst_20 {dimension_numbers = #tpu.dot_dimension_numbers<[1], [0], [0], [1], [0, 0, 1, 1], [], []>} : vector<2x128xbf16>, vector<128x512xbf16>, vector<2x512xf32> -> vector<2x512xf32>
    %77 = arith.addf %74, %76 : vector<2x512xf32>
    %78 = vector.extract_strided_slice %77 {offsets = [0, 0], sizes = [2, 128], strides = [1, 1]} : vector<2x512xf32> to vector<2x128xf32>
    %79 = arith.negf %78 : vector<2x128xf32>
    %80 = math.exp %79 : vector<2x128xf32>
    %cst_21 = arith.constant 1.000000e+00 : f32
    %81 = vector.broadcast %cst_21 : f32 to vector<2x128xf32>
    %82 = arith.addf %81, %80 : vector<2x128xf32>
    %83 = arith.divf %81, %82 : vector<2x128xf32>
    %84 = vector.extract_strided_slice %77 {offsets = [0, 128], sizes = [2, 128], strides = [1, 1]} : vector<2x512xf32> to vector<2x128xf32>
    %85 = arith.negf %84 : vector<2x128xf32>
    %86 = math.exp %85 : vector<2x128xf32>
    %cst_22 = arith.constant 1.000000e+00 : f32
    %87 = vector.broadcast %cst_22 : f32 to vector<2x128xf32>
    %88 = arith.addf %87, %86 : vector<2x128xf32>
    %89 = arith.divf %87, %88 : vector<2x128xf32>
    %90 = vector.extract_strided_slice %77 {offsets = [0, 256], sizes = [2, 128], strides = [1, 1]} : vector<2x512xf32> to vector<2x128xf32>
    %91 = math.tanh %90 : vector<2x128xf32>
    %92 = vector.extract_strided_slice %77 {offsets = [0, 384], sizes = [2, 128], strides = [1, 1]} : vector<2x512xf32> to vector<2x128xf32>
    %93 = arith.negf %92 : vector<2x128xf32>
    %94 = math.exp %93 : vector<2x128xf32>
    %cst_23 = arith.constant 1.000000e+00 : f32
    %95 = vector.broadcast %cst_23 : f32 to vector<2x128xf32>
    %96 = arith.addf %95, %94 : vector<2x128xf32>
    %97 = arith.divf %95, %96 : vector<2x128xf32>
    %98 = arith.mulf %89, %40 : vector<2x128xf32>
    %99 = arith.mulf %83, %91 : vector<2x128xf32>
    %100 = arith.addf %98, %99 : vector<2x128xf32>
    %101 = math.tanh %100 : vector<2x128xf32>
    %102 = arith.mulf %97, %101 : vector<2x128xf32>
    %103 = vector.extract_strided_slice %10 {offsets = [12, 0], sizes = [2, 512], strides = [1, 1]} : vector<16x512xf32> to vector<2x512xf32>
    %104 = arith.truncf %71 : vector<2x128xf32> to vector<2x128xbf16>
    %cst_24 = arith.constant dense<0.000000e+00> : vector<2x512xf32>
    %105 = tpu.matmul %104, %12, %cst_24 {dimension_numbers = #tpu.dot_dimension_numbers<[1], [0], [0], [1], [0, 0, 1, 1], [], []>} : vector<2x128xbf16>, vector<128x512xbf16>, vector<2x512xf32> -> vector<2x512xf32>
    %106 = arith.addf %103, %105 : vector<2x512xf32>
    %107 = vector.extract_strided_slice %106 {offsets = [0, 0], sizes = [2, 128], strides = [1, 1]} : vector<2x512xf32> to vector<2x128xf32>
    %108 = arith.negf %107 : vector<2x128xf32>
    %109 = math.exp %108 : vector<2x128xf32>
    %cst_25 = arith.constant 1.000000e+00 : f32
    %110 = vector.broadcast %cst_25 : f32 to vector<2x128xf32>
    %111 = arith.addf %110, %109 : vector<2x128xf32>
    %112 = arith.divf %110, %111 : vector<2x128xf32>
    %113 = vector.extract_strided_slice %106 {offsets = [0, 128], sizes = [2, 128], strides = [1, 1]} : vector<2x512xf32> to vector<2x128xf32>
    %114 = arith.negf %113 : vector<2x128xf32>
    %115 = math.exp %114 : vector<2x128xf32>
    %cst_26 = arith.constant 1.000000e+00 : f32
    %116 = vector.broadcast %cst_26 : f32 to vector<2x128xf32>
    %117 = arith.addf %116, %115 : vector<2x128xf32>
    %118 = arith.divf %116, %117 : vector<2x128xf32>
    %119 = vector.extract_strided_slice %106 {offsets = [0, 256], sizes = [2, 128], strides = [1, 1]} : vector<2x512xf32> to vector<2x128xf32>
    %120 = math.tanh %119 : vector<2x128xf32>
    %121 = vector.extract_strided_slice %106 {offsets = [0, 384], sizes = [2, 128], strides = [1, 1]} : vector<2x512xf32> to vector<2x128xf32>
    %122 = arith.negf %121 : vector<2x128xf32>
    %123 = math.exp %122 : vector<2x128xf32>
    %cst_27 = arith.constant 1.000000e+00 : f32
    %124 = vector.broadcast %cst_27 : f32 to vector<2x128xf32>
    %125 = arith.addf %124, %123 : vector<2x128xf32>
    %126 = arith.divf %124, %125 : vector<2x128xf32>
    %127 = arith.mulf %118, %69 : vector<2x128xf32>
    %128 = arith.mulf %112, %120 : vector<2x128xf32>
    %129 = arith.addf %127, %128 : vector<2x128xf32>
    %130 = math.tanh %129 : vector<2x128xf32>
    %131 = arith.mulf %126, %130 : vector<2x128xf32>
    %132 = arith.addf %73, %102 : vector<2x128xf32>
    %133 = arith.addf %132, %131 : vector<2x128xf32>
    %134 = vector.extract_strided_slice %6 {offsets = [4, 0], sizes = [2, 512], strides = [1, 1]} : vector<16x512xf32> to vector<2x512xf32>
    %135 = arith.truncf %102 : vector<2x128xf32> to vector<2x128xbf16>
    %cst_28 = arith.constant dense<0.000000e+00> : vector<2x512xf32>
    %136 = tpu.matmul %135, %11, %cst_28 {dimension_numbers = #tpu.dot_dimension_numbers<[1], [0], [0], [1], [0, 0, 1, 1], [], []>} : vector<2x128xbf16>, vector<128x512xbf16>, vector<2x512xf32> -> vector<2x512xf32>
    %137 = arith.addf %134, %136 : vector<2x512xf32>
    %138 = vector.extract_strided_slice %137 {offsets = [0, 0], sizes = [2, 128], strides = [1, 1]} : vector<2x512xf32> to vector<2x128xf32>
    %139 = arith.negf %138 : vector<2x128xf32>
    %140 = math.exp %139 : vector<2x128xf32>
    %cst_29 = arith.constant 1.000000e+00 : f32
    %141 = vector.broadcast %cst_29 : f32 to vector<2x128xf32>
    %142 = arith.addf %141, %140 : vector<2x128xf32>
    %143 = arith.divf %141, %142 : vector<2x128xf32>
    %144 = vector.extract_strided_slice %137 {offsets = [0, 128], sizes = [2, 128], strides = [1, 1]} : vector<2x512xf32> to vector<2x128xf32>
    %145 = arith.negf %144 : vector<2x128xf32>
    %146 = math.exp %145 : vector<2x128xf32>
    %cst_30 = arith.constant 1.000000e+00 : f32
    %147 = vector.broadcast %cst_30 : f32 to vector<2x128xf32>
    %148 = arith.addf %147, %146 : vector<2x128xf32>
    %149 = arith.divf %147, %148 : vector<2x128xf32>
    %150 = vector.extract_strided_slice %137 {offsets = [0, 256], sizes = [2, 128], strides = [1, 1]} : vector<2x512xf32> to vector<2x128xf32>
    %151 = math.tanh %150 : vector<2x128xf32>
    %152 = vector.extract_strided_slice %137 {offsets = [0, 384], sizes = [2, 128], strides = [1, 1]} : vector<2x512xf32> to vector<2x128xf32>
    %153 = arith.negf %152 : vector<2x128xf32>
    %154 = math.exp %153 : vector<2x128xf32>
    %cst_31 = arith.constant 1.000000e+00 : f32
    %155 = vector.broadcast %cst_31 : f32 to vector<2x128xf32>
    %156 = arith.addf %155, %154 : vector<2x128xf32>
    %157 = arith.divf %155, %156 : vector<2x128xf32>
    %158 = arith.mulf %149, %100 : vector<2x128xf32>
    %159 = arith.mulf %143, %151 : vector<2x128xf32>
    %160 = arith.addf %158, %159 : vector<2x128xf32>
    %161 = math.tanh %160 : vector<2x128xf32>
    %162 = arith.mulf %157, %161 : vector<2x128xf32>
    %163 = vector.extract_strided_slice %10 {offsets = [10, 0], sizes = [2, 512], strides = [1, 1]} : vector<16x512xf32> to vector<2x512xf32>
    %164 = arith.truncf %131 : vector<2x128xf32> to vector<2x128xbf16>
    %cst_32 = arith.constant dense<0.000000e+00> : vector<2x512xf32>
    %165 = tpu.matmul %164, %12, %cst_32 {dimension_numbers = #tpu.dot_dimension_numbers<[1], [0], [0], [1], [0, 0, 1, 1], [], []>} : vector<2x128xbf16>, vector<128x512xbf16>, vector<2x512xf32> -> vector<2x512xf32>
    %166 = arith.addf %163, %165 : vector<2x512xf32>
    %167 = vector.extract_strided_slice %166 {offsets = [0, 0], sizes = [2, 128], strides = [1, 1]} : vector<2x512xf32> to vector<2x128xf32>
    %168 = arith.negf %167 : vector<2x128xf32>
    %169 = math.exp %168 : vector<2x128xf32>
    %cst_33 = arith.constant 1.000000e+00 : f32
    %170 = vector.broadcast %cst_33 : f32 to vector<2x128xf32>
    %171 = arith.addf %170, %169 : vector<2x128xf32>
    %172 = arith.divf %170, %171 : vector<2x128xf32>
    %173 = vector.extract_strided_slice %166 {offsets = [0, 128], sizes = [2, 128], strides = [1, 1]} : vector<2x512xf32> to vector<2x128xf32>
    %174 = arith.negf %173 : vector<2x128xf32>
    %175 = math.exp %174 : vector<2x128xf32>
    %cst_34 = arith.constant 1.000000e+00 : f32
    %176 = vector.broadcast %cst_34 : f32 to vector<2x128xf32>
    %177 = arith.addf %176, %175 : vector<2x128xf32>
    %178 = arith.divf %176, %177 : vector<2x128xf32>
    %179 = vector.extract_strided_slice %166 {offsets = [0, 256], sizes = [2, 128], strides = [1, 1]} : vector<2x512xf32> to vector<2x128xf32>
    %180 = math.tanh %179 : vector<2x128xf32>
    %181 = vector.extract_strided_slice %166 {offsets = [0, 384], sizes = [2, 128], strides = [1, 1]} : vector<2x512xf32> to vector<2x128xf32>
    %182 = arith.negf %181 : vector<2x128xf32>
    %183 = math.exp %182 : vector<2x128xf32>
    %cst_35 = arith.constant 1.000000e+00 : f32
    %184 = vector.broadcast %cst_35 : f32 to vector<2x128xf32>
    %185 = arith.addf %184, %183 : vector<2x128xf32>
    %186 = arith.divf %184, %185 : vector<2x128xf32>
    %187 = arith.mulf %178, %129 : vector<2x128xf32>
    %188 = arith.mulf %172, %180 : vector<2x128xf32>
    %189 = arith.addf %187, %188 : vector<2x128xf32>
    %190 = math.tanh %189 : vector<2x128xf32>
    %191 = arith.mulf %186, %190 : vector<2x128xf32>
    %192 = arith.addf %133, %162 : vector<2x128xf32>
    %193 = arith.addf %192, %191 : vector<2x128xf32>
    %194 = vector.extract_strided_slice %6 {offsets = [6, 0], sizes = [2, 512], strides = [1, 1]} : vector<16x512xf32> to vector<2x512xf32>
    %195 = arith.truncf %162 : vector<2x128xf32> to vector<2x128xbf16>
    %cst_36 = arith.constant dense<0.000000e+00> : vector<2x512xf32>
    %196 = tpu.matmul %195, %11, %cst_36 {dimension_numbers = #tpu.dot_dimension_numbers<[1], [0], [0], [1], [0, 0, 1, 1], [], []>} : vector<2x128xbf16>, vector<128x512xbf16>, vector<2x512xf32> -> vector<2x512xf32>
    %197 = arith.addf %194, %196 : vector<2x512xf32>
    %198 = vector.extract_strided_slice %197 {offsets = [0, 0], sizes = [2, 128], strides = [1, 1]} : vector<2x512xf32> to vector<2x128xf32>
    %199 = arith.negf %198 : vector<2x128xf32>
    %200 = math.exp %199 : vector<2x128xf32>
    %cst_37 = arith.constant 1.000000e+00 : f32
    %201 = vector.broadcast %cst_37 : f32 to vector<2x128xf32>
    %202 = arith.addf %201, %200 : vector<2x128xf32>
    %203 = arith.divf %201, %202 : vector<2x128xf32>
    %204 = vector.extract_strided_slice %197 {offsets = [0, 128], sizes = [2, 128], strides = [1, 1]} : vector<2x512xf32> to vector<2x128xf32>
    %205 = arith.negf %204 : vector<2x128xf32>
    %206 = math.exp %205 : vector<2x128xf32>
    %cst_38 = arith.constant 1.000000e+00 : f32
    %207 = vector.broadcast %cst_38 : f32 to vector<2x128xf32>
    %208 = arith.addf %207, %206 : vector<2x128xf32>
    %209 = arith.divf %207, %208 : vector<2x128xf32>
    %210 = vector.extract_strided_slice %197 {offsets = [0, 256], sizes = [2, 128], strides = [1, 1]} : vector<2x512xf32> to vector<2x128xf32>
    %211 = math.tanh %210 : vector<2x128xf32>
    %212 = vector.extract_strided_slice %197 {offsets = [0, 384], sizes = [2, 128], strides = [1, 1]} : vector<2x512xf32> to vector<2x128xf32>
    %213 = arith.negf %212 : vector<2x128xf32>
    %214 = math.exp %213 : vector<2x128xf32>
    %cst_39 = arith.constant 1.000000e+00 : f32
    %215 = vector.broadcast %cst_39 : f32 to vector<2x128xf32>
    %216 = arith.addf %215, %214 : vector<2x128xf32>
    %217 = arith.divf %215, %216 : vector<2x128xf32>
    %218 = arith.mulf %209, %160 : vector<2x128xf32>
    %219 = arith.mulf %203, %211 : vector<2x128xf32>
    %220 = arith.addf %218, %219 : vector<2x128xf32>
    %221 = math.tanh %220 : vector<2x128xf32>
    %222 = arith.mulf %217, %221 : vector<2x128xf32>
    %223 = vector.extract_strided_slice %10 {offsets = [8, 0], sizes = [2, 512], strides = [1, 1]} : vector<16x512xf32> to vector<2x512xf32>
    %224 = arith.truncf %191 : vector<2x128xf32> to vector<2x128xbf16>
    %cst_40 = arith.constant dense<0.000000e+00> : vector<2x512xf32>
    %225 = tpu.matmul %224, %12, %cst_40 {dimension_numbers = #tpu.dot_dimension_numbers<[1], [0], [0], [1], [0, 0, 1, 1], [], []>} : vector<2x128xbf16>, vector<128x512xbf16>, vector<2x512xf32> -> vector<2x512xf32>
    %226 = arith.addf %223, %225 : vector<2x512xf32>
    %227 = vector.extract_strided_slice %226 {offsets = [0, 0], sizes = [2, 128], strides = [1, 1]} : vector<2x512xf32> to vector<2x128xf32>
    %228 = arith.negf %227 : vector<2x128xf32>
    %229 = math.exp %228 : vector<2x128xf32>
    %cst_41 = arith.constant 1.000000e+00 : f32
    %230 = vector.broadcast %cst_41 : f32 to vector<2x128xf32>
    %231 = arith.addf %230, %229 : vector<2x128xf32>
    %232 = arith.divf %230, %231 : vector<2x128xf32>
    %233 = vector.extract_strided_slice %226 {offsets = [0, 128], sizes = [2, 128], strides = [1, 1]} : vector<2x512xf32> to vector<2x128xf32>
    %234 = arith.negf %233 : vector<2x128xf32>
    %235 = math.exp %234 : vector<2x128xf32>
    %cst_42 = arith.constant 1.000000e+00 : f32
    %236 = vector.broadcast %cst_42 : f32 to vector<2x128xf32>
    %237 = arith.addf %236, %235 : vector<2x128xf32>
    %238 = arith.divf %236, %237 : vector<2x128xf32>
    %239 = vector.extract_strided_slice %226 {offsets = [0, 256], sizes = [2, 128], strides = [1, 1]} : vector<2x512xf32> to vector<2x128xf32>
    %240 = math.tanh %239 : vector<2x128xf32>
    %241 = vector.extract_strided_slice %226 {offsets = [0, 384], sizes = [2, 128], strides = [1, 1]} : vector<2x512xf32> to vector<2x128xf32>
    %242 = arith.negf %241 : vector<2x128xf32>
    %243 = math.exp %242 : vector<2x128xf32>
    %cst_43 = arith.constant 1.000000e+00 : f32
    %244 = vector.broadcast %cst_43 : f32 to vector<2x128xf32>
    %245 = arith.addf %244, %243 : vector<2x128xf32>
    %246 = arith.divf %244, %245 : vector<2x128xf32>
    %247 = arith.mulf %238, %189 : vector<2x128xf32>
    %248 = arith.mulf %232, %240 : vector<2x128xf32>
    %249 = arith.addf %247, %248 : vector<2x128xf32>
    %250 = math.tanh %249 : vector<2x128xf32>
    %251 = arith.mulf %246, %250 : vector<2x128xf32>
    %252 = arith.addf %193, %222 : vector<2x128xf32>
    %253 = arith.addf %252, %251 : vector<2x128xf32>
    %254 = vector.extract_strided_slice %6 {offsets = [8, 0], sizes = [2, 512], strides = [1, 1]} : vector<16x512xf32> to vector<2x512xf32>
    %255 = arith.truncf %222 : vector<2x128xf32> to vector<2x128xbf16>
    %cst_44 = arith.constant dense<0.000000e+00> : vector<2x512xf32>
    %256 = tpu.matmul %255, %11, %cst_44 {dimension_numbers = #tpu.dot_dimension_numbers<[1], [0], [0], [1], [0, 0, 1, 1], [], []>} : vector<2x128xbf16>, vector<128x512xbf16>, vector<2x512xf32> -> vector<2x512xf32>
    %257 = arith.addf %254, %256 : vector<2x512xf32>
    %258 = vector.extract_strided_slice %257 {offsets = [0, 0], sizes = [2, 128], strides = [1, 1]} : vector<2x512xf32> to vector<2x128xf32>
    %259 = arith.negf %258 : vector<2x128xf32>
    %260 = math.exp %259 : vector<2x128xf32>
    %cst_45 = arith.constant 1.000000e+00 : f32
    %261 = vector.broadcast %cst_45 : f32 to vector<2x128xf32>
    %262 = arith.addf %261, %260 : vector<2x128xf32>
    %263 = arith.divf %261, %262 : vector<2x128xf32>
    %264 = vector.extract_strided_slice %257 {offsets = [0, 128], sizes = [2, 128], strides = [1, 1]} : vector<2x512xf32> to vector<2x128xf32>
    %265 = arith.negf %264 : vector<2x128xf32>
    %266 = math.exp %265 : vector<2x128xf32>
    %cst_46 = arith.constant 1.000000e+00 : f32
    %267 = vector.broadcast %cst_46 : f32 to vector<2x128xf32>
    %268 = arith.addf %267, %266 : vector<2x128xf32>
    %269 = arith.divf %267, %268 : vector<2x128xf32>
    %270 = vector.extract_strided_slice %257 {offsets = [0, 256], sizes = [2, 128], strides = [1, 1]} : vector<2x512xf32> to vector<2x128xf32>
    %271 = math.tanh %270 : vector<2x128xf32>
    %272 = vector.extract_strided_slice %257 {offsets = [0, 384], sizes = [2, 128], strides = [1, 1]} : vector<2x512xf32> to vector<2x128xf32>
    %273 = arith.negf %272 : vector<2x128xf32>
    %274 = math.exp %273 : vector<2x128xf32>
    %cst_47 = arith.constant 1.000000e+00 : f32
    %275 = vector.broadcast %cst_47 : f32 to vector<2x128xf32>
    %276 = arith.addf %275, %274 : vector<2x128xf32>
    %277 = arith.divf %275, %276 : vector<2x128xf32>
    %278 = arith.mulf %269, %220 : vector<2x128xf32>
    %279 = arith.mulf %263, %271 : vector<2x128xf32>
    %280 = arith.addf %278, %279 : vector<2x128xf32>
    %281 = math.tanh %280 : vector<2x128xf32>
    %282 = arith.mulf %277, %281 : vector<2x128xf32>
    %283 = vector.extract_strided_slice %10 {offsets = [6, 0], sizes = [2, 512], strides = [1, 1]} : vector<16x512xf32> to vector<2x512xf32>
    %284 = arith.truncf %251 : vector<2x128xf32> to vector<2x128xbf16>
    %cst_48 = arith.constant dense<0.000000e+00> : vector<2x512xf32>
    %285 = tpu.matmul %284, %12, %cst_48 {dimension_numbers = #tpu.dot_dimension_numbers<[1], [0], [0], [1], [0, 0, 1, 1], [], []>} : vector<2x128xbf16>, vector<128x512xbf16>, vector<2x512xf32> -> vector<2x512xf32>
    %286 = arith.addf %283, %285 : vector<2x512xf32>
    %287 = vector.extract_strided_slice %286 {offsets = [0, 0], sizes = [2, 128], strides = [1, 1]} : vector<2x512xf32> to vector<2x128xf32>
    %288 = arith.negf %287 : vector<2x128xf32>
    %289 = math.exp %288 : vector<2x128xf32>
    %cst_49 = arith.constant 1.000000e+00 : f32
    %290 = vector.broadcast %cst_49 : f32 to vector<2x128xf32>
    %291 = arith.addf %290, %289 : vector<2x128xf32>
    %292 = arith.divf %290, %291 : vector<2x128xf32>
    %293 = vector.extract_strided_slice %286 {offsets = [0, 128], sizes = [2, 128], strides = [1, 1]} : vector<2x512xf32> to vector<2x128xf32>
    %294 = arith.negf %293 : vector<2x128xf32>
    %295 = math.exp %294 : vector<2x128xf32>
    %cst_50 = arith.constant 1.000000e+00 : f32
    %296 = vector.broadcast %cst_50 : f32 to vector<2x128xf32>
    %297 = arith.addf %296, %295 : vector<2x128xf32>
    %298 = arith.divf %296, %297 : vector<2x128xf32>
    %299 = vector.extract_strided_slice %286 {offsets = [0, 256], sizes = [2, 128], strides = [1, 1]} : vector<2x512xf32> to vector<2x128xf32>
    %300 = math.tanh %299 : vector<2x128xf32>
    %301 = vector.extract_strided_slice %286 {offsets = [0, 384], sizes = [2, 128], strides = [1, 1]} : vector<2x512xf32> to vector<2x128xf32>
    %302 = arith.negf %301 : vector<2x128xf32>
    %303 = math.exp %302 : vector<2x128xf32>
    %cst_51 = arith.constant 1.000000e+00 : f32
    %304 = vector.broadcast %cst_51 : f32 to vector<2x128xf32>
    %305 = arith.addf %304, %303 : vector<2x128xf32>
    %306 = arith.divf %304, %305 : vector<2x128xf32>
    %307 = arith.mulf %298, %249 : vector<2x128xf32>
    %308 = arith.mulf %292, %300 : vector<2x128xf32>
    %309 = arith.addf %307, %308 : vector<2x128xf32>
    %310 = math.tanh %309 : vector<2x128xf32>
    %311 = arith.mulf %306, %310 : vector<2x128xf32>
    %312 = arith.addf %253, %282 : vector<2x128xf32>
    %313 = arith.addf %312, %311 : vector<2x128xf32>
    %314 = vector.extract_strided_slice %6 {offsets = [10, 0], sizes = [2, 512], strides = [1, 1]} : vector<16x512xf32> to vector<2x512xf32>
    %315 = arith.truncf %282 : vector<2x128xf32> to vector<2x128xbf16>
    %cst_52 = arith.constant dense<0.000000e+00> : vector<2x512xf32>
    %316 = tpu.matmul %315, %11, %cst_52 {dimension_numbers = #tpu.dot_dimension_numbers<[1], [0], [0], [1], [0, 0, 1, 1], [], []>} : vector<2x128xbf16>, vector<128x512xbf16>, vector<2x512xf32> -> vector<2x512xf32>
    %317 = arith.addf %314, %316 : vector<2x512xf32>
    %318 = vector.extract_strided_slice %317 {offsets = [0, 0], sizes = [2, 128], strides = [1, 1]} : vector<2x512xf32> to vector<2x128xf32>
    %319 = arith.negf %318 : vector<2x128xf32>
    %320 = math.exp %319 : vector<2x128xf32>
    %cst_53 = arith.constant 1.000000e+00 : f32
    %321 = vector.broadcast %cst_53 : f32 to vector<2x128xf32>
    %322 = arith.addf %321, %320 : vector<2x128xf32>
    %323 = arith.divf %321, %322 : vector<2x128xf32>
    %324 = vector.extract_strided_slice %317 {offsets = [0, 128], sizes = [2, 128], strides = [1, 1]} : vector<2x512xf32> to vector<2x128xf32>
    %325 = arith.negf %324 : vector<2x128xf32>
    %326 = math.exp %325 : vector<2x128xf32>
    %cst_54 = arith.constant 1.000000e+00 : f32
    %327 = vector.broadcast %cst_54 : f32 to vector<2x128xf32>
    %328 = arith.addf %327, %326 : vector<2x128xf32>
    %329 = arith.divf %327, %328 : vector<2x128xf32>
    %330 = vector.extract_strided_slice %317 {offsets = [0, 256], sizes = [2, 128], strides = [1, 1]} : vector<2x512xf32> to vector<2x128xf32>
    %331 = math.tanh %330 : vector<2x128xf32>
    %332 = vector.extract_strided_slice %317 {offsets = [0, 384], sizes = [2, 128], strides = [1, 1]} : vector<2x512xf32> to vector<2x128xf32>
    %333 = arith.negf %332 : vector<2x128xf32>
    %334 = math.exp %333 : vector<2x128xf32>
    %cst_55 = arith.constant 1.000000e+00 : f32
    %335 = vector.broadcast %cst_55 : f32 to vector<2x128xf32>
    %336 = arith.addf %335, %334 : vector<2x128xf32>
    %337 = arith.divf %335, %336 : vector<2x128xf32>
    %338 = arith.mulf %329, %280 : vector<2x128xf32>
    %339 = arith.mulf %323, %331 : vector<2x128xf32>
    %340 = arith.addf %338, %339 : vector<2x128xf32>
    %341 = math.tanh %340 : vector<2x128xf32>
    %342 = arith.mulf %337, %341 : vector<2x128xf32>
    %343 = vector.extract_strided_slice %10 {offsets = [4, 0], sizes = [2, 512], strides = [1, 1]} : vector<16x512xf32> to vector<2x512xf32>
    %344 = arith.truncf %311 : vector<2x128xf32> to vector<2x128xbf16>
    %cst_56 = arith.constant dense<0.000000e+00> : vector<2x512xf32>
    %345 = tpu.matmul %344, %12, %cst_56 {dimension_numbers = #tpu.dot_dimension_numbers<[1], [0], [0], [1], [0, 0, 1, 1], [], []>} : vector<2x128xbf16>, vector<128x512xbf16>, vector<2x512xf32> -> vector<2x512xf32>
    %346 = arith.addf %343, %345 : vector<2x512xf32>
    %347 = vector.extract_strided_slice %346 {offsets = [0, 0], sizes = [2, 128], strides = [1, 1]} : vector<2x512xf32> to vector<2x128xf32>
    %348 = arith.negf %347 : vector<2x128xf32>
    %349 = math.exp %348 : vector<2x128xf32>
    %cst_57 = arith.constant 1.000000e+00 : f32
    %350 = vector.broadcast %cst_57 : f32 to vector<2x128xf32>
    %351 = arith.addf %350, %349 : vector<2x128xf32>
    %352 = arith.divf %350, %351 : vector<2x128xf32>
    %353 = vector.extract_strided_slice %346 {offsets = [0, 128], sizes = [2, 128], strides = [1, 1]} : vector<2x512xf32> to vector<2x128xf32>
    %354 = arith.negf %353 : vector<2x128xf32>
    %355 = math.exp %354 : vector<2x128xf32>
    %cst_58 = arith.constant 1.000000e+00 : f32
    %356 = vector.broadcast %cst_58 : f32 to vector<2x128xf32>
    %357 = arith.addf %356, %355 : vector<2x128xf32>
    %358 = arith.divf %356, %357 : vector<2x128xf32>
    %359 = vector.extract_strided_slice %346 {offsets = [0, 256], sizes = [2, 128], strides = [1, 1]} : vector<2x512xf32> to vector<2x128xf32>
    %360 = math.tanh %359 : vector<2x128xf32>
    %361 = vector.extract_strided_slice %346 {offsets = [0, 384], sizes = [2, 128], strides = [1, 1]} : vector<2x512xf32> to vector<2x128xf32>
    %362 = arith.negf %361 : vector<2x128xf32>
    %363 = math.exp %362 : vector<2x128xf32>
    %cst_59 = arith.constant 1.000000e+00 : f32
    %364 = vector.broadcast %cst_59 : f32 to vector<2x128xf32>
    %365 = arith.addf %364, %363 : vector<2x128xf32>
    %366 = arith.divf %364, %365 : vector<2x128xf32>
    %367 = arith.mulf %358, %309 : vector<2x128xf32>
    %368 = arith.mulf %352, %360 : vector<2x128xf32>
    %369 = arith.addf %367, %368 : vector<2x128xf32>
    %370 = math.tanh %369 : vector<2x128xf32>
    %371 = arith.mulf %366, %370 : vector<2x128xf32>
    %372 = arith.addf %313, %342 : vector<2x128xf32>
    %373 = arith.addf %372, %371 : vector<2x128xf32>
    %374 = vector.extract_strided_slice %6 {offsets = [12, 0], sizes = [2, 512], strides = [1, 1]} : vector<16x512xf32> to vector<2x512xf32>
    %375 = arith.truncf %342 : vector<2x128xf32> to vector<2x128xbf16>
    %cst_60 = arith.constant dense<0.000000e+00> : vector<2x512xf32>
    %376 = tpu.matmul %375, %11, %cst_60 {dimension_numbers = #tpu.dot_dimension_numbers<[1], [0], [0], [1], [0, 0, 1, 1], [], []>} : vector<2x128xbf16>, vector<128x512xbf16>, vector<2x512xf32> -> vector<2x512xf32>
    %377 = arith.addf %374, %376 : vector<2x512xf32>
    %378 = vector.extract_strided_slice %377 {offsets = [0, 0], sizes = [2, 128], strides = [1, 1]} : vector<2x512xf32> to vector<2x128xf32>
    %379 = arith.negf %378 : vector<2x128xf32>
    %380 = math.exp %379 : vector<2x128xf32>
    %cst_61 = arith.constant 1.000000e+00 : f32
    %381 = vector.broadcast %cst_61 : f32 to vector<2x128xf32>
    %382 = arith.addf %381, %380 : vector<2x128xf32>
    %383 = arith.divf %381, %382 : vector<2x128xf32>
    %384 = vector.extract_strided_slice %377 {offsets = [0, 128], sizes = [2, 128], strides = [1, 1]} : vector<2x512xf32> to vector<2x128xf32>
    %385 = arith.negf %384 : vector<2x128xf32>
    %386 = math.exp %385 : vector<2x128xf32>
    %cst_62 = arith.constant 1.000000e+00 : f32
    %387 = vector.broadcast %cst_62 : f32 to vector<2x128xf32>
    %388 = arith.addf %387, %386 : vector<2x128xf32>
    %389 = arith.divf %387, %388 : vector<2x128xf32>
    %390 = vector.extract_strided_slice %377 {offsets = [0, 256], sizes = [2, 128], strides = [1, 1]} : vector<2x512xf32> to vector<2x128xf32>
    %391 = math.tanh %390 : vector<2x128xf32>
    %392 = vector.extract_strided_slice %377 {offsets = [0, 384], sizes = [2, 128], strides = [1, 1]} : vector<2x512xf32> to vector<2x128xf32>
    %393 = arith.negf %392 : vector<2x128xf32>
    %394 = math.exp %393 : vector<2x128xf32>
    %cst_63 = arith.constant 1.000000e+00 : f32
    %395 = vector.broadcast %cst_63 : f32 to vector<2x128xf32>
    %396 = arith.addf %395, %394 : vector<2x128xf32>
    %397 = arith.divf %395, %396 : vector<2x128xf32>
    %398 = arith.mulf %389, %340 : vector<2x128xf32>
    %399 = arith.mulf %383, %391 : vector<2x128xf32>
    %400 = arith.addf %398, %399 : vector<2x128xf32>
    %401 = math.tanh %400 : vector<2x128xf32>
    %402 = arith.mulf %397, %401 : vector<2x128xf32>
    %403 = vector.extract_strided_slice %10 {offsets = [2, 0], sizes = [2, 512], strides = [1, 1]} : vector<16x512xf32> to vector<2x512xf32>
    %404 = arith.truncf %371 : vector<2x128xf32> to vector<2x128xbf16>
    %cst_64 = arith.constant dense<0.000000e+00> : vector<2x512xf32>
    %405 = tpu.matmul %404, %12, %cst_64 {dimension_numbers = #tpu.dot_dimension_numbers<[1], [0], [0], [1], [0, 0, 1, 1], [], []>} : vector<2x128xbf16>, vector<128x512xbf16>, vector<2x512xf32> -> vector<2x512xf32>
    %406 = arith.addf %403, %405 : vector<2x512xf32>
    %407 = vector.extract_strided_slice %406 {offsets = [0, 0], sizes = [2, 128], strides = [1, 1]} : vector<2x512xf32> to vector<2x128xf32>
    %408 = arith.negf %407 : vector<2x128xf32>
    %409 = math.exp %408 : vector<2x128xf32>
    %cst_65 = arith.constant 1.000000e+00 : f32
    %410 = vector.broadcast %cst_65 : f32 to vector<2x128xf32>
    %411 = arith.addf %410, %409 : vector<2x128xf32>
    %412 = arith.divf %410, %411 : vector<2x128xf32>
    %413 = vector.extract_strided_slice %406 {offsets = [0, 128], sizes = [2, 128], strides = [1, 1]} : vector<2x512xf32> to vector<2x128xf32>
    %414 = arith.negf %413 : vector<2x128xf32>
    %415 = math.exp %414 : vector<2x128xf32>
    %cst_66 = arith.constant 1.000000e+00 : f32
    %416 = vector.broadcast %cst_66 : f32 to vector<2x128xf32>
    %417 = arith.addf %416, %415 : vector<2x128xf32>
    %418 = arith.divf %416, %417 : vector<2x128xf32>
    %419 = vector.extract_strided_slice %406 {offsets = [0, 256], sizes = [2, 128], strides = [1, 1]} : vector<2x512xf32> to vector<2x128xf32>
    %420 = math.tanh %419 : vector<2x128xf32>
    %421 = vector.extract_strided_slice %406 {offsets = [0, 384], sizes = [2, 128], strides = [1, 1]} : vector<2x512xf32> to vector<2x128xf32>
    %422 = arith.negf %421 : vector<2x128xf32>
    %423 = math.exp %422 : vector<2x128xf32>
    %cst_67 = arith.constant 1.000000e+00 : f32
    %424 = vector.broadcast %cst_67 : f32 to vector<2x128xf32>
    %425 = arith.addf %424, %423 : vector<2x128xf32>
    %426 = arith.divf %424, %425 : vector<2x128xf32>
    %427 = arith.mulf %418, %369 : vector<2x128xf32>
    %428 = arith.mulf %412, %420 : vector<2x128xf32>
    %429 = arith.addf %427, %428 : vector<2x128xf32>
    %430 = math.tanh %429 : vector<2x128xf32>
    %431 = arith.mulf %426, %430 : vector<2x128xf32>
    %432 = arith.addf %373, %402 : vector<2x128xf32>
    %433 = arith.addf %432, %431 : vector<2x128xf32>
    %434 = vector.extract_strided_slice %6 {offsets = [14, 0], sizes = [2, 512], strides = [1, 1]} : vector<16x512xf32> to vector<2x512xf32>
    %435 = arith.truncf %402 : vector<2x128xf32> to vector<2x128xbf16>
    %cst_68 = arith.constant dense<0.000000e+00> : vector<2x512xf32>
    %436 = tpu.matmul %435, %11, %cst_68 {dimension_numbers = #tpu.dot_dimension_numbers<[1], [0], [0], [1], [0, 0, 1, 1], [], []>} : vector<2x128xbf16>, vector<128x512xbf16>, vector<2x512xf32> -> vector<2x512xf32>
    %437 = arith.addf %434, %436 : vector<2x512xf32>
    %438 = vector.extract_strided_slice %437 {offsets = [0, 0], sizes = [2, 128], strides = [1, 1]} : vector<2x512xf32> to vector<2x128xf32>
    %439 = arith.negf %438 : vector<2x128xf32>
    %440 = math.exp %439 : vector<2x128xf32>
    %cst_69 = arith.constant 1.000000e+00 : f32
    %441 = vector.broadcast %cst_69 : f32 to vector<2x128xf32>
    %442 = arith.addf %441, %440 : vector<2x128xf32>
    %443 = arith.divf %441, %442 : vector<2x128xf32>
    %444 = vector.extract_strided_slice %437 {offsets = [0, 128], sizes = [2, 128], strides = [1, 1]} : vector<2x512xf32> to vector<2x128xf32>
    %445 = arith.negf %444 : vector<2x128xf32>
    %446 = math.exp %445 : vector<2x128xf32>
    %cst_70 = arith.constant 1.000000e+00 : f32
    %447 = vector.broadcast %cst_70 : f32 to vector<2x128xf32>
    %448 = arith.addf %447, %446 : vector<2x128xf32>
    %449 = arith.divf %447, %448 : vector<2x128xf32>
    %450 = vector.extract_strided_slice %437 {offsets = [0, 256], sizes = [2, 128], strides = [1, 1]} : vector<2x512xf32> to vector<2x128xf32>
    %451 = math.tanh %450 : vector<2x128xf32>
    %452 = vector.extract_strided_slice %437 {offsets = [0, 384], sizes = [2, 128], strides = [1, 1]} : vector<2x512xf32> to vector<2x128xf32>
    %453 = arith.negf %452 : vector<2x128xf32>
    %454 = math.exp %453 : vector<2x128xf32>
    %cst_71 = arith.constant 1.000000e+00 : f32
    %455 = vector.broadcast %cst_71 : f32 to vector<2x128xf32>
    %456 = arith.addf %455, %454 : vector<2x128xf32>
    %457 = arith.divf %455, %456 : vector<2x128xf32>
    %458 = arith.mulf %449, %400 : vector<2x128xf32>
    %459 = arith.mulf %443, %451 : vector<2x128xf32>
    %460 = arith.addf %458, %459 : vector<2x128xf32>
    %461 = math.tanh %460 : vector<2x128xf32>
    %462 = arith.mulf %457, %461 : vector<2x128xf32>
    %463 = vector.extract_strided_slice %10 {offsets = [0, 0], sizes = [2, 512], strides = [1, 1]} : vector<16x512xf32> to vector<2x512xf32>
    %464 = arith.truncf %431 : vector<2x128xf32> to vector<2x128xbf16>
    %cst_72 = arith.constant dense<0.000000e+00> : vector<2x512xf32>
    %465 = tpu.matmul %464, %12, %cst_72 {dimension_numbers = #tpu.dot_dimension_numbers<[1], [0], [0], [1], [0, 0, 1, 1], [], []>} : vector<2x128xbf16>, vector<128x512xbf16>, vector<2x512xf32> -> vector<2x512xf32>
    %466 = arith.addf %463, %465 : vector<2x512xf32>
    %467 = vector.extract_strided_slice %466 {offsets = [0, 0], sizes = [2, 128], strides = [1, 1]} : vector<2x512xf32> to vector<2x128xf32>
    %468 = arith.negf %467 : vector<2x128xf32>
    %469 = math.exp %468 : vector<2x128xf32>
    %cst_73 = arith.constant 1.000000e+00 : f32
    %470 = vector.broadcast %cst_73 : f32 to vector<2x128xf32>
    %471 = arith.addf %470, %469 : vector<2x128xf32>
    %472 = arith.divf %470, %471 : vector<2x128xf32>
    %473 = vector.extract_strided_slice %466 {offsets = [0, 128], sizes = [2, 128], strides = [1, 1]} : vector<2x512xf32> to vector<2x128xf32>
    %474 = arith.negf %473 : vector<2x128xf32>
    %475 = math.exp %474 : vector<2x128xf32>
    %cst_74 = arith.constant 1.000000e+00 : f32
    %476 = vector.broadcast %cst_74 : f32 to vector<2x128xf32>
    %477 = arith.addf %476, %475 : vector<2x128xf32>
    %478 = arith.divf %476, %477 : vector<2x128xf32>
    %479 = vector.extract_strided_slice %466 {offsets = [0, 256], sizes = [2, 128], strides = [1, 1]} : vector<2x512xf32> to vector<2x128xf32>
    %480 = math.tanh %479 : vector<2x128xf32>
    %481 = vector.extract_strided_slice %466 {offsets = [0, 384], sizes = [2, 128], strides = [1, 1]} : vector<2x512xf32> to vector<2x128xf32>
    %482 = arith.negf %481 : vector<2x128xf32>
    %483 = math.exp %482 : vector<2x128xf32>
    %cst_75 = arith.constant 1.000000e+00 : f32
    %484 = vector.broadcast %cst_75 : f32 to vector<2x128xf32>
    %485 = arith.addf %484, %483 : vector<2x128xf32>
    %486 = arith.divf %484, %485 : vector<2x128xf32>
    %487 = arith.mulf %478, %429 : vector<2x128xf32>
    %488 = arith.mulf %472, %480 : vector<2x128xf32>
    %489 = arith.addf %487, %488 : vector<2x128xf32>
    %490 = math.tanh %489 : vector<2x128xf32>
    %491 = arith.mulf %486, %490 : vector<2x128xf32>
    %492 = arith.addf %433, %462 : vector<2x128xf32>
    %493 = arith.addf %492, %491 : vector<2x128xf32>
    %494 = math.tanh %493 : vector<2x128xf32>
    %c0_76 = arith.constant 0 : index
    %c0_77 = arith.constant 0 : index
    %495 = vector.load %arg6[%c0_76, %c0_77] : memref<128x10xf32, #tpu.memory_space<vmem>>, vector<128x10xf32>
    %cst_78 = arith.constant dense<0.000000e+00> : vector<2x10xf32>
    %496 = tpu.matmul %494, %495, %cst_78 {dimension_numbers = #tpu.dot_dimension_numbers<[1], [0], [0], [1], [0, 0, 1, 1], [], []>} : vector<2x128xf32>, vector<128x10xf32>, vector<2x10xf32> -> vector<2x10xf32>
    %c0_79 = arith.constant 0 : index
    %c0_80 = arith.constant 0 : index
    %497 = vector.load %arg7[%c0_79, %c0_80] : memref<1x10xf32, #tpu.memory_space<vmem>>, vector<1x10xf32>
    %498 = vector.broadcast %497 : vector<1x10xf32> to vector<2x10xf32>
    %499 = arith.addf %496, %498 : vector<2x10xf32>
    %c0_81 = arith.constant 0 : index
    %c0_82 = arith.constant 0 : index
    %500 = vector.load %arg8[%c0_81, %c0_82] : memref<2x10xf32, #tpu.memory_space<vmem>>, vector<2x10xf32>
    tpu.vector_store %arg8[%c0_81, %c0_82], %499 {strides = array<i32>} : memref<2x10xf32, #tpu.memory_space<vmem>>, vector<2x10xf32>,
    return
  }
}

</mosaic_0001>

<bundles_post_ra>
// kernel: cnn_one_att_forward.1
= control target key start
LH: loop header
LB: loop body
LE: loop exit
PB: predicated region body
PF: predicated region fallthrough
CT: control target
= control target key end

     0   :  { %vm226_vm0 = vcmask 1045504   ;;  %v5432_v8 = vmov 0   ;;  %vm222_vm1 = vcmask 490496   ;;  %s5423_s0 = inlined_call_operand.vmem [shape: bf16[16,60], index: 0, kind: input, shape index: {}]   ;;  %s5424_s1 = inlined_call_operand.vmem [shape: bf16[60,1024], index: 1, kind: input, shape index: {}]   ;;  %s5425_s2 = inlined_call_operand.vmem [shape: bf16[128,512], index: 2, kind: input, shape index: {}]   ;;  %s5426_s3 = inlined_call_operand.vmem [shape: bf16[128,512], index: 3, kind: input, shape index: {}]   ;;  %s5427_s4 = inlined_call_operand.vmem [shape: f32[1,512], index: 4, kind: input, shape index: {}]   ;;  %s5428_s5 = inlined_call_operand.vmem [shape: f32[1,512], index: 5, kind: input, shape index: {}]   ;;  %s5429_s6 = inlined_call_operand.vmem [shape: f32[128,10], index: 6, kind: input, shape index: {}]   ;;  %s5430_s7 = inlined_call_operand.vmem [shape: f32[1,10], index: 7, kind: input, shape index: {}]   ;;  %s5431_s8 = inlined_call_operand.hbm [shape: f32[2,10], index: 8, kind: output, shape index: {}]  }
   0x1   :  { %v57_v0 = vld [vmem:[%s5424_s1 + $0xc0] sm:$0xff]  ;;  %v59_v2 = vld [vmem:[%s5424_s1 + $0xd0] sm:$0xff]  ;;  %283 = vmatprep.mubr.bf16.mxu1 %v5432_v8  ;;  %369 = vmatprep.mubr.bf16.mxu0 %v5432_v8  ;;  %v58_v33 = vld [vmem:[%s5424_s1 + $0xc8] sm:$0xff] }
   0x2   :  { %v61_v1 = vld [vmem:[%s5424_s1 + $0xe0] sm:$0x33]  ;;  %v63_v4 = vld [vmem:[%s5424_s1 + $0xf0] sm:$0x33]  ;;  %v62_v34 = vld [vmem:[%s5424_s1 + $0xe8] sm:$0x33] }
   0x3   :  { %v3048_v3 = vcombine.high %v57_v0, %v61_v1  ;;  %v3047_v5 = vcombine.low %v57_v0, %v61_v1  ;;  %v49_v6 = vld [vmem:[%s5424_s1 + $0x80] sm:$0xff]  ;;  %v3052_v9 = vcombine.high %v59_v2, %v63_v4  ;;  %v3051_v10 = vcombine.low %v59_v2, %v63_v4  ;;  %v51_v12 = vld [vmem:[%s5424_s1 + $0x90] sm:$0xff]  ;;  %v50_v40 = vld [vmem:[%s5424_s1 + $0x88] sm:$0xff] }
   0x4   :  { %v53_v7 = vld [vmem:[%s5424_s1 + $0xa0] sm:$0xff]  ;;  %v55_v13 = vld [vmem:[%s5424_s1 + $0xb0] sm:$0xff]  ;;  %v3050_v37 = vcombine.high %v58_v33, %v62_v34  ;;  %v3049_v38 = vcombine.low %v58_v33, %v62_v34  ;;  %v54_v41 = vld [vmem:[%s5424_s1 + $0xa8] sm:$0xff] }
   0x5   :  { %v3040_v11 = vcombine.high %v49_v6, %v53_v7  ;;  %v41_v14 = vld [vmem:[%s5424_s1 + $0x40] sm:$0xff]  ;;  %3055 = vmatprep.subr.msk.bf16.mxu1 %vm226_vm0, %v3048_v3  ;;  %v228_v15 = vsel %vm226_vm0, %v3047_v5, 0  ;;  %v3044_v16 = vcombine.high %v51_v12, %v55_v13  ;;  %v43_v18 = vld [vmem:[%s5424_s1 + $0x50] sm:$0xff]  ;;  %3059 = vmatprep.subr.msk.bf16.mxu0 %vm226_vm0, %v3052_v9  ;;  %v240_v20 = vsel %vm226_vm0, %v3051_v10, 0  ;;  %v42_v47 = vld [vmem:[%s5424_s1 + $0x48] sm:$0xff] }
   0x6   :  { %v45_v17 = vld [vmem:[%s5424_s1 + $0x60] sm:$0xff]  ;;  %v47_v19 = vld [vmem:[%s5424_s1 + $0x70] sm:$0xff]  ;;  %260 = vmatpush1.bf16.msra.mxu1 %v228_v15  ;;  %v3039_v21 = vcombine.low %v49_v6, %v53_v7  ;;  %346 = vmatpush1.bf16.msra.mxu0 %v240_v20  ;;  %v3043_v22 = vcombine.low %v51_v12, %v55_v13  ;;  %v234_v43 = vsel %vm226_vm0, %v3049_v38, 0  ;;  %v3042_v45 = vcombine.high %v50_v40, %v54_v41  ;;  %v46_v48 = vld [vmem:[%s5424_s1 + $0x68] sm:$0xff] }
   0x7   :  { %261 = vmatprep.subr.bf16.mxu1 %v3040_v11  ;;  %v3032_v23 = vcombine.high %v41_v14, %v45_v17  ;;  %347 = vmatprep.subr.bf16.mxu0 %v3044_v16  ;;  %v3036_v24 = vcombine.high %v43_v18, %v47_v19  ;;  %v33_v25 = vld [vmem:[%s5424_s1] sm:$0xff]  ;;  %v35_v27 = vld [vmem:[%s5424_s1 + $0x10] sm:$0xff]  ;;  %v3031_v29 = vcombine.low %v41_v14, %v45_v17  ;;  %v34_v53 = vld [vmem:[%s5424_s1 + $0x8] sm:$0xff] }
   0x8   :  { %v37_v26 = vld [vmem:[%s5424_s1 + $0x20] sm:$0xff]  ;;  %v39_v28 = vld [vmem:[%s5424_s1 + $0x30] sm:$0xff]  ;;  %v3035_v30 = vcombine.low %v43_v18, %v47_v19  ;;  %v3041_v49 = vcombine.low %v50_v40, %v54_v41  ;;  %v3034_v52 = vcombine.high %v42_v47, %v46_v48  ;;  %v38_v54 = vld [vmem:[%s5424_s1 + $0x28] sm:$0xff]  ;;  %v3033_v55 = vcombine.low %v42_v47, %v46_v48 }
   0x9   :  { %v3024_v31 = vcombine.high %v33_v25, %v37_v26  ;;  %v3028_v32 = vcombine.high %v35_v27, %v39_v28  ;;  %v3023_v35 = vcombine.low %v33_v25, %v37_v26  ;;  %v3027_v36 = vcombine.low %v35_v27, %v39_v28  ;;  %v3832_v39 = vld [vmem:[%s5425_s2 + $0xe4] ss:$16 sps:$4 sm:$0xff]   ;;  %v3850_v44 = vld [vmem:[%s5425_s2 + $0xe0] ss:$16 sps:$4 sm:$0xff]   ;;  %v60_v59 = vld [vmem:[%s5424_s1 + $0xd8] sm:$0xff] }
   0xa   :  { %262 = vmatpush1.bf16.msra.mxu1 %v3039_v21  ;;  %348 = vmatpush1.bf16.msra.mxu0 %v3043_v22  ;;  %v3843_v42 = vld [vmem:[%s5423_s0] sm:$0xff]   ;;  %v3026_v58 = vcombine.high %v34_v53, %v38_v54  ;;  %v64_v60 = vld [vmem:[%s5424_s1 + $0xf8] sm:$0x33]  ;;  %v3025_v61 = vcombine.low %v34_v53, %v38_v54 }
   0xb   :  { %263 = vmatprep.subr.bf16.mxu1 %v3032_v23  ;;  %349 = vmatprep.subr.bf16.mxu0 %v3036_v24  ;;  %v3856_v46 = vld [vmem:[%s5425_s2 + $0xc4] ss:$16 sps:$4 sm:$0xff]   ;;  %v3871_v50 = vld [vmem:[%s5425_s2 + $0xc0] ss:$16 sps:$4 sm:$0xff]   ;;  %v3054_v63 = vcombine.high %v60_v59, %v64_v60  ;;  %v3053_v1 = vcombine.low %v60_v59, %v64_v60  ;;  %v52_v2 = vld [vmem:[%s5424_s1 + $0x98] sm:$0xff] }
   0xc   :  { %5553 = vst [vmem:[#allocation5_spill] sm:$0xff] %v3856_v46  ;;  %5554 = vst [vmem:[#allocation6_spill] sm:$0xff] %v3871_v50  ;;  %v3876_v51 = vld [vmem:[%s5425_s2 + $0xa4] ss:$16 sps:$4 sm:$0xff]   ;;  %v3891_v56 = vld [vmem:[%s5425_s2 + $0xa0] ss:$16 sps:$4 sm:$0xff]  }
   0xd   :  { %5555 = vst [vmem:[#allocation7_spill] sm:$0xff] %v3876_v51  ;;  %5556 = vst [vmem:[#allocation8_spill] sm:$0xff] %v3891_v56  ;;  %v3896_v57 = vld [vmem:[%s5425_s2 + $0x84] ss:$16 sps:$4 sm:$0xff]   ;;  %v3909_v62 = vld [vmem:[%s5425_s2 + $0x80] ss:$16 sps:$4 sm:$0xff]  }
   0xe   :  { %264 = vmatpush1.bf16.msra.mxu1 %v3031_v29  ;;  %350 = vmatpush1.bf16.msra.mxu0 %v3035_v30  ;;  %5557 = vst [vmem:[#allocation9_spill] sm:$0xff] %v3896_v57  ;;  %5558 = vst [vmem:[#allocation10_spill] sm:$0xff] %v3909_v62  ;;  %v3915_v0 = vld [vmem:[%s5425_s2 + $0x64] ss:$16 sps:$4 sm:$0xff]   ;;  %v56_v3 = vld [vmem:[%s5424_s1 + $0xb8] sm:$0xff]  ;;  %v246_v6 = vsel %vm226_vm0, %v3053_v1, 0 }
   0xf   :  { %265 = vmatprep.subr.bf16.mxu1 %v3024_v31  ;;  %351 = vmatprep.subr.bf16.mxu0 %v3028_v32  ;;  %5559 = vst [vmem:[#allocation11_spill] sm:$0xff] %v3915_v0  ;;  %v3927_v4 = vld [vmem:[%s5425_s2 + $0x60] ss:$16 sps:$4 sm:$0xff]   ;;  %v3932_v5 = vld [vmem:[%s5425_s2 + $0x44] ss:$16 sps:$4 sm:$0xff]   ;;  %v3046_v7 = vcombine.high %v52_v2, %v56_v3  ;;  %v44_v9 = vld [vmem:[%s5424_s1 + $0x58] sm:$0xff]  ;;  %v3045_v11 = vcombine.low %v52_v2, %v56_v3 }
  0x10   :  { %5560 = vst [vmem:[#allocation12_spill] sm:$0xff] %v3927_v4  ;;  %5561 = vst [vmem:[#allocation13_spill] sm:$0xff] %v3932_v5  ;;  %v48_v10 = vld [vmem:[%s5424_s1 + $0x78] sm:$0xff]  ;;  %v3949_v12 = vld [vmem:[%s5425_s2 + $0x40] ss:$16 sps:$4 sm:$0xff]  }
  0x11   :  { %5562 = vst [vmem:[#allocation14_spill] sm:$0xff] %v3949_v12  ;;  %v3038_v13 = vcombine.high %v44_v9, %v48_v10  ;;  %v3956_v14 = vld [vmem:[%s5425_s2 + $0x24] ss:$16 sps:$4 sm:$0xff]   ;;  %v36_v15 = vld [vmem:[%s5424_s1 + $0x18] sm:$0xff]  ;;  %v3037_v17 = vcombine.low %v44_v9, %v48_v10  ;;  %v3969_v18 = vld [vmem:[%s5425_s2 + $0x20] ss:$16 sps:$4 sm:$0xff]  }
  0x12   :  { %266 = vmatpush1.bf16.msra.mxu1 %v3023_v35  ;;  %352 = vmatpush1.bf16.msra.mxu0 %v3027_v36  ;;  %5563 = vst [vmem:[#allocation15_spill] sm:$0xff] %v3956_v14  ;;  %v40_v16 = vld [vmem:[%s5424_s1 + $0x38] sm:$0xff]  ;;  %5564 = vst [vmem:[#allocation16_spill] sm:$0xff] %v3969_v18  ;;  %v3975_v20 = vld [vmem:[%s5425_s2 + $0x4] ss:$16 sps:$4 sm:$0xff]  }
  0x13   :  { %3057 = vmatprep.subr.msk.bf16.mxu1 %vm226_vm0, %v3050_v37  ;;  %707 = vmatprep.subr.bf16.mxu0 %v3832_v39  ;;  %v3030_v19 = vcombine.high %v36_v15, %v40_v16  ;;  %5565 = vst [vmem:[#allocation17_spill] sm:$0xff] %v3975_v20  ;;  %v3029_v21 = vcombine.low %v36_v15, %v40_v16  ;;  %v3980_v22 = vld [vmem:[%s5425_s2] ss:$16 sps:$4 sm:$0xff]   ;;  %v3986_v23 = vld [vmem:[%s5425_s2 + $0xec] ss:$16 sps:$4 sm:$0xff]  }
  0x14   :  { %5566 = vst [vmem:[#allocation18_spill] sm:$0xff] %v3980_v22  ;;  %v3992_v24 = vld [vmem:[%s5426_s3 + $0xe4] ss:$16 sps:$4 sm:$0xff]   ;;  %v3997_v25 = vld [vmem:[%s5425_s2 + $0xe8] ss:$16 sps:$4 sm:$0xff]  }
  0x15   :  { %3056 = vmatmul.mubr.msk.bf16.vlgmr.msra.gmra.mxu1 %vm222_vm1, %v3843_v42  ;;  %3060 = vmatmul.mubr.msk.bf16.vlgmr.msra.gmra.mxu0 %vm222_vm1, %v3843_v42  ;;  %5567 = vst [vmem:[#allocation19_spill] sm:$0xff] %v3992_v24  ;;  %v4002_v26 = vld [vmem:[%s5426_s3 + $0xe0] ss:$16 sps:$4 sm:$0xff]   ;;  %v4009_v27 = vld [vmem:[%s5425_s2 + $0xcc] ss:$16 sps:$4 sm:$0xff]  }
  0x16   :  { %303 = vmatpush1.bf16.msra.mxu1 %v234_v43  ;;  %708 = vmatpush1.bf16.msra.mxu0 %v3850_v44  ;;  %5568 = vst [vmem:[#allocation20_spill] sm:$0xff] %v4009_v27  ;;  %v4015_v28 = vld [vmem:[%s5426_s3 + $0xc4] ss:$16 sps:$4 sm:$0xff]   ;;  %v4024_v29 = vld [vmem:[%s5425_s2 + $0xc8] ss:$16 sps:$4 sm:$0xff]  }
  0x17   :  { %304 = vmatprep.subr.bf16.mxu1 %v3042_v45  ;;  %709 = vmatprep.subr.bf16.mxu0 %v3856_v46  ;;  %5569 = vst [vmem:[#allocation21_spill] sm:$0xff] %v4024_v29  ;;  %v4029_v30 = vld [vmem:[%s5426_s3 + $0xc0] ss:$16 sps:$4 sm:$0xff]   ;;  %v4036_v31 = vld [vmem:[%s5425_s2 + $0xac] ss:$16 sps:$4 sm:$0xff]  }
  0x18   :  { %326 = vmatprep.mubr.bf16.mxu1 %v5432_v8  ;;  %739 = vmatprep.mubr.bf16.mxu0 %v5432_v8  ;;  %5570 = vst [vmem:[#allocation22_spill] sm:$0xff] %v4036_v31  ;;  %v4042_v32 = vld [vmem:[%s5426_s3 + $0xa4] ss:$16 sps:$4 sm:$0xff]  }
  0x1a   :  { %305 = vmatpush1.bf16.msra.mxu1 %v3041_v49  ;;  %710 = vmatpush1.bf16.msra.mxu0 %v3871_v50 }
  0x1b   :  { %306 = vmatprep.subr.bf16.mxu1 %v3034_v52  ;;  %711 = vmatprep.subr.bf16.mxu0 %v3876_v51 }
  0x1e   :  { %307 = vmatpush1.bf16.msra.mxu1 %v3033_v55  ;;  %712 = vmatpush1.bf16.msra.mxu0 %v3891_v56 }
  0x1f   :  { %308 = vmatprep.subr.bf16.mxu1 %v3026_v58  ;;  %713 = vmatprep.subr.bf16.mxu0 %v3896_v57 }
  0x22   :  { %309 = vmatpush1.bf16.msra.mxu1 %v3025_v61  ;;  %714 = vmatpush1.bf16.msra.mxu0 %v3909_v62 }
  0x23   :  { %3061 = vmatprep.subr.msk.bf16.mxu1 %vm226_vm0, %v3054_v63  ;;  %715 = vmatprep.subr.bf16.mxu0 %v3915_v0 }
  0x25   :  { %3058 = vmatmul.mubr.msk.bf16.vlgmr.msra.gmra.mxu1 %vm222_vm1, %v3843_v42 }
  0x26   :  { %389 = vmatpush1.bf16.msra.mxu1 %v246_v6  ;;  %412 = vmatprep.mubr.bf16.mxu1 %v5432_v8 }
  0x27   :  { %716 = vmatpush1.bf16.msra.mxu0 %v3927_v4  ;;  %390 = vmatprep.subr.bf16.mxu1 %v3046_v7 }
  0x28   :  { %717 = vmatprep.subr.bf16.mxu0 %v3932_v5 }
  0x2a   :  { %391 = vmatpush1.bf16.msra.mxu1 %v3045_v11 }
  0x2b   :  { %718 = vmatpush1.bf16.msra.mxu0 %v3949_v12  ;;  %392 = vmatprep.subr.bf16.mxu1 %v3038_v13 }
  0x2c   :  { %719 = vmatprep.subr.bf16.mxu0 %v3956_v14 }
  0x2e   :  { %393 = vmatpush1.bf16.msra.mxu1 %v3037_v17 }
  0x2f   :  { %720 = vmatpush1.bf16.msra.mxu0 %v3969_v18  ;;  %394 = vmatprep.subr.bf16.mxu1 %v3030_v19 }
  0x30   :  { %721 = vmatprep.subr.bf16.mxu0 %v3975_v20 }
  0x32   :  { %395 = vmatpush1.bf16.msra.mxu1 %v3029_v21 }
  0x33   :  { %722 = vmatpush1.bf16.msra.mxu0 %v3980_v22  ;;  %748 = vmatprep.subr.bf16.mxu1 %v3986_v23 }
  0x34   :  { %977 = vmatprep.subr.bf16.mxu0 %v3992_v24 }
  0x35   :  { %3062 = vmatmul.mubr.msk.bf16.vlgmr.msra.gmra.mxu1 %vm222_vm1, %v3843_v42 }
  0x36   :  { %740 = vmatmul.mubr.bf16.vlgmr.msra.gmra.mxu0 %v5432_v8  ;;  %749 = vmatpush1.bf16.msra.mxu1 %v3997_v25 }
  0x37   :  { %978 = vmatpush1.bf16.msra.mxu0 %v4002_v26  ;;  %750 = vmatprep.subr.bf16.mxu1 %v4009_v27 }
  0x38   :  { %979 = vmatprep.subr.bf16.mxu0 %v4015_v28  ;;  %780 = vmatprep.mubr.bf16.mxu1 %v5432_v8 }
  0x39   :  { %13 = vsyncpa [#allocation3], 0  ;;  %1009 = vmatprep.mubr.bf16.mxu0 %v5432_v8  ;;  %v4050_v33 = vld [vmem:[%s5425_s2 + $0xa8] ss:$16 sps:$4 sm:$0xff]   ;;  %v4057_v34 = vld [vmem:[%s5426_s3 + $0xa0] ss:$16 sps:$4 sm:$0xff]  }
  0x3a   :  { %751 = vmatpush1.bf16.msra.mxu1 %v4024_v29  ;;  %5571 = vst [vmem:[#allocation23_spill] sm:$0xff] %v4050_v33  ;;  %v4062_v35 = vld [vmem:[%s5425_s2 + $0x8c] ss:$16 sps:$4 sm:$0xff]   ;;  %v4068_v36 = vld [vmem:[%s5426_s3 + $0x84] ss:$16 sps:$4 sm:$0xff]   ;;  %vm3722_vm2 = vmmov 0  }
  0x3b   :  { %980 = vmatpush1.bf16.msra.mxu0 %v4029_v30  ;;  %752 = vmatprep.subr.bf16.mxu1 %v4036_v31  ;;  %5572 = vst [vmem:[#allocation24_spill] sm:$0xff] %v4062_v35  ;;  %v4074_v37 = vld [vmem:[%s5425_s2 + $0x88] ss:$16 sps:$4 sm:$0xff]   ;;  %v4081_v38 = vld [vmem:[%s5426_s3 + $0x80] ss:$16 sps:$4 sm:$0xff]   ;;  %s3723_s28 = smov [#allocation2]  }
  0x3c   :  { %981 = vmatprep.subr.bf16.mxu0 %v4042_v32  ;;  %5573 = vst [vmem:[#allocation25_spill] sm:$0xff] %v4074_v37  ;;  %v4086_v40 = vld [vmem:[%s5425_s2 + $0x6c] ss:$16 sps:$4 sm:$0xff]   ;;  %v4092_v41 = vld [vmem:[%s5426_s3 + $0x64] ss:$16 sps:$4 sm:$0xff]   ;;  %s3014_s29 = sshll.u32 %s3723_s28, 4  ;;  %s3015_s29 = int_to_ptr.vmem [resolvable:$true] %s3014_s29 }
  0x3d   :  { %5574 = vst [vmem:[#allocation26_spill] sm:$0xff] %v4086_v40  ;;  %v4098_v42 = vld [vmem:[%s5425_s2 + $0x68] ss:$16 sps:$4 sm:$0xff]   ;;  %v4105_v43 = vld [vmem:[%s5426_s3 + $0x60] ss:$16 sps:$4 sm:$0xff]   ;;  %vm3006_vm3 = vcmask 74752   ;;  %p3703_p1 = scmp.lt.s32.totalorder %s3015_s29, %s3015_s29 }
  0x3e   :  { %753 = vmatpush1.bf16.msra.mxu1 %v4050_v33  ;;  %5575 = vst [vmem:[#allocation27_spill] sm:$0xff] %v4098_v42  ;;  %v4110_v45 = vld [vmem:[%s5425_s2 + $0x4c] ss:$16 sps:$4 sm:$0xff]   ;;  %v4116_v47 = vld [vmem:[%s5426_s3 + $0x44] ss:$16 sps:$4 sm:$0xff]   ;;  %s3698_s30 = scalar_lea.vmem %s3015_s29, 32 }
  0x3f   :  { %982 = vmatpush1.bf16.msra.mxu0 %v4057_v34  ;;  %754 = vmatprep.subr.bf16.mxu1 %v4062_v35  ;;  %5576 = vst [vmem:[#allocation28_spill] sm:$0xff] %v4110_v45  ;;  %v4122_v48 = vld [vmem:[%s5425_s2 + $0x48] ss:$16 sps:$4 sm:$0xff]   ;;  %v4129_v49 = vld [vmem:[%s5426_s3 + $0x40] ss:$16 sps:$4 sm:$0xff]   ;;  %p3699_p0 = scmp.ne.s32.totalorder %s3015_s29, %s3698_s30  ;;  %p3704_p2 = scmp.lt.s32.totalorder %s3698_s30, %s3698_s30 }
  0x40   :  { %983 = vmatprep.subr.bf16.mxu0 %v4068_v36  ;;  %5577 = vst [vmem:[#allocation29_spill] sm:$0xff] %v4122_v48  ;;  %v4134_v52 = vld [vmem:[%s5425_s2 + $0x2c] ss:$16 sps:$4 sm:$0xff]   ;;  %v4140_v53 = vld [vmem:[%s5426_s3 + $0x24] ss:$16 sps:$4 sm:$0xff]  }
  0x41   :  { %5578 = vst [vmem:[#allocation30_spill] sm:$0xff] %v4134_v52  ;;  %v4146_v54 = vld [vmem:[%s5425_s2 + $0x28] ss:$16 sps:$4 sm:$0xff]   ;;  %v4153_v55 = vld [vmem:[%s5426_s3 + $0x20] ss:$16 sps:$4 sm:$0xff]   ;;  %p3705_p3 = por %p3704_p2, %p3703_p1 }
  0x42   :  { %755 = vmatpush1.bf16.msra.mxu1 %v4074_v37  ;;  %5579 = vst [vmem:[#allocation31_spill] sm:$0xff] %v4146_v54  ;;  %v4158_v58 = vld [vmem:[%s5425_s2 + $0xc] ss:$16 sps:$4 sm:$0xff]   ;;  %v4164_v59 = vld [vmem:[%s5426_s3 + $0x4] ss:$16 sps:$4 sm:$0xff]  }
  0x43   :  { %984 = vmatpush1.bf16.msra.mxu0 %v4081_v38  ;;  %756 = vmatprep.subr.bf16.mxu1 %v4086_v40  ;;  %5580 = vst [vmem:[#allocation32_spill] sm:$0xff] %v4158_v58  ;;  %v4170_v60 = vld [vmem:[%s5425_s2 + $0x8] ss:$16 sps:$4 sm:$0xff]   ;;  %v4177_v61 = vld [vmem:[%s5426_s3] ss:$16 sps:$4 sm:$0xff]   ;;  %p3706_p4 = pnand %p3705_p3, %p3699_p0 }
  0x44   :  { %985 = vmatprep.subr.bf16.mxu0 %v4092_v41  ;;  %5581 = vst [vmem:[#allocation33_spill] sm:$0xff] %v4170_v60  ;;  %v4182_v63 = vld [vmem:[%s5426_s3 + $0xec] ss:$16 sps:$4 sm:$0xff]   ;;  %v4189_v1 = vld [vmem:[%s5426_s3 + $0xe8] ss:$16 sps:$4 sm:$0xff]  }
  0x45   :  { %5582 = vst [vmem:[#allocation34_spill] sm:$0xff] %v4182_v63  ;;  %v4196_v2 = vld [vmem:[%s5426_s3 + $0xcc] ss:$16 sps:$4 sm:$0xff]   ;;  %v4205_v3 = vld [vmem:[%s5426_s3 + $0xc8] ss:$16 sps:$4 sm:$0xff]  }
  0x46   :  { %757 = vmatpush1.bf16.msra.mxu1 %v4098_v42  ;;  %v4211_v6 = vld [vmem:[%s5426_s3 + $0xac] ss:$16 sps:$4 sm:$0xff]   ;;  %v4221_v7 = vld [vmem:[%s5426_s3 + $0xa8] ss:$16 sps:$4 sm:$0xff]  }
  0x47   :  { %986 = vmatpush1.bf16.msra.mxu0 %v4105_v43  ;;  %758 = vmatprep.subr.bf16.mxu1 %v4110_v45  ;;  %v4227_v9 = vld [vmem:[%s5426_s3 + $0x8c] ss:$16 sps:$4 sm:$0xff]   ;;  %v4235_v10 = vld [vmem:[%s5426_s3 + $0x88] ss:$16 sps:$4 sm:$0xff]  }
  0x48   :  { %987 = vmatprep.subr.bf16.mxu0 %v4116_v47  ;;  %v4241_v11 = vld [vmem:[%s5426_s3 + $0x6c] ss:$16 sps:$4 sm:$0xff]   ;;  %v4249_v13 = vld [vmem:[%s5426_s3 + $0x68] ss:$16 sps:$4 sm:$0xff]  }
  0x49   :  { %v4255_v15 = vld [vmem:[%s5426_s3 + $0x4c] ss:$16 sps:$4 sm:$0xff]   ;;  %v4263_v16 = vld [vmem:[%s5426_s3 + $0x48] ss:$16 sps:$4 sm:$0xff]  }
  0x4a   :  { %759 = vmatpush1.bf16.msra.mxu1 %v4122_v48  ;;  %v4269_v17 = vld [vmem:[%s5426_s3 + $0x2c] ss:$16 sps:$4 sm:$0xff]   ;;  %v4277_v19 = vld [vmem:[%s5426_s3 + $0x28] ss:$16 sps:$4 sm:$0xff]  }
  0x4b   :  { %988 = vmatpush1.bf16.msra.mxu0 %v4129_v49  ;;  %760 = vmatprep.subr.bf16.mxu1 %v4134_v52  ;;  %v4283_v21 = vld [vmem:[%s5426_s3 + $0xc] ss:$16 sps:$4 sm:$0xff]  }
  0x4c   :  { %989 = vmatprep.subr.bf16.mxu0 %v4140_v53 }
  0x4e   :  { %761 = vmatpush1.bf16.msra.mxu1 %v4146_v54 }
  0x4f   :  { %990 = vmatpush1.bf16.msra.mxu0 %v4153_v55  ;;  %762 = vmatprep.subr.bf16.mxu1 %v4158_v58 }
  0x50   :  { %991 = vmatprep.subr.bf16.mxu0 %v4164_v59 }
  0x52   :  { %763 = vmatpush1.bf16.msra.mxu1 %v4170_v60 }
  0x53   :  { %992 = vmatpush1.bf16.msra.mxu0 %v4177_v61  ;;  %1018 = vmatprep.subr.bf16.mxu1 %v4182_v63 }
  0x54   :  { %1105 = vmatprep.subr.bf16.mxu0 %v3832_v39 }
  0x55   :  { %781 = vmatmul.mubr.bf16.vlgmr.msra.gmra.mxu1 %v5432_v8 }
  0x56   :  { %1010 = vmatmul.mubr.bf16.vlgmr.msra.gmra.mxu0 %v5432_v8  ;;  %1019 = vmatpush1.bf16.msra.mxu1 %v4189_v1 }
  0x57   :  { %1020 = vmatprep.subr.bf16.mxu1 %v4196_v2  ;;  %1050 = vmatprep.mubr.bf16.mxu1 %v5432_v8 }
  0x58   :  { %1106 = vmatpush1.bf16.msra.mxu0 %v3850_v44  ;;  %1137 = vmatprep.mubr.bf16.mxu0 %v5432_v8  ;;  %v4291_v8 = vld [vmem:[%s5426_s3 + $0x8] ss:$16 sps:$4 sm:$0xff]  }
  0x59   :  { %1107 = vmatprep.subr.bf16.mxu0 %v3856_v46 }
  0x5a   :  { %1021 = vmatpush1.bf16.msra.mxu1 %v4205_v3 }
  0x5b   :  { %1022 = vmatprep.subr.bf16.mxu1 %v4211_v6 }
  0x5c   :  { %1108 = vmatpush1.bf16.msra.mxu0 %v3871_v50 }
  0x5d   :  { %1109 = vmatprep.subr.bf16.mxu0 %v3876_v51 }
  0x5e   :  { %1023 = vmatpush1.bf16.msra.mxu1 %v4221_v7 }
  0x5f   :  { %1024 = vmatprep.subr.bf16.mxu1 %v4227_v9 }
  0x60   :  { %1110 = vmatpush1.bf16.msra.mxu0 %v3891_v56 }
  0x61   :  { %1111 = vmatprep.subr.bf16.mxu0 %v3896_v57 }
  0x62   :  { %1025 = vmatpush1.bf16.msra.mxu1 %v4235_v10 }
  0x63   :  { %1026 = vmatprep.subr.bf16.mxu1 %v4241_v11 }
  0x64   :  { %1112 = vmatpush1.bf16.msra.mxu0 %v3909_v62 }
  0x65   :  { %1113 = vmatprep.subr.bf16.mxu0 %v3915_v0 }
  0x66   :  { %1027 = vmatpush1.bf16.msra.mxu1 %v4249_v13 }
  0x67   :  { %1028 = vmatprep.subr.bf16.mxu1 %v4255_v15 }
  0x68   :  { %1114 = vmatpush1.bf16.msra.mxu0 %v3927_v4 }
  0x69   :  { %1115 = vmatprep.subr.bf16.mxu0 %v3932_v5 }
  0x6a   :  { %1029 = vmatpush1.bf16.msra.mxu1 %v4263_v16 }
  0x6b   :  { %1030 = vmatprep.subr.bf16.mxu1 %v4269_v17 }
  0x6c   :  { %1116 = vmatpush1.bf16.msra.mxu0 %v3949_v12 }
  0x6d   :  { %1117 = vmatprep.subr.bf16.mxu0 %v3956_v14  ;;  %v5583_v14 = vmov 0  }
  0x6e   :  { %1031 = vmatpush1.bf16.msra.mxu1 %v4277_v19 }
  0x6f   :  { %1032 = vmatprep.subr.bf16.mxu1 %v4283_v21 }
  0x70   :  { %1118 = vmatpush1.bf16.msra.mxu0 %v3969_v18 }
  0x71   :  { %1119 = vmatprep.subr.bf16.mxu0 %v3975_v20  ;;  %v453_v20 = vld [vmem:[%s5428_s5] sm:$0xf] }
  0x72   :  { %1033 = vmatpush1.bf16.msra.mxu1 %v4291_v8 }
  0x73   :  { %1146 = vmatprep.subr.bf16.mxu1 %v3986_v23 }
  0x74   :  { %1120 = vmatpush1.bf16.msra.mxu0 %v3980_v22 }
  0x75   :  { %1051 = vmatmul.mubr.bf16.vlgmr.msra.gmra.mxu1 %v5583_v14  ;;  %1234 = vmatprep.subr.bf16.mxu0 %v3992_v24  ;;  %v425_v24 = vlaneseq }
  0x76   :  { %1147 = vmatpush1.bf16.msra.mxu1 %v3997_v25  ;;  %1178 = vmatprep.mubr.bf16.mxu1 %v5583_v14 }
  0x77   :  { %1148 = vmatprep.subr.bf16.mxu1 %v4009_v27  ;;  %v426_v22 = vshrl.u32 %v425_v24, 7 }
  0x79   :  { %v427_v18 = vsub.s32 0, %v426_v22  ;;  %v431_v12 = vsub.s32 1, %v426_v22 }
  0x7a   :  { %1149 = vmatpush1.bf16.msra.mxu1 %v4024_v29 }
  0x7b   :  { %1150 = vmatprep.subr.bf16.mxu1 %v4036_v31 }
  0x7e   :  { %1151 = vmatpush1.bf16.msra.mxu1 %v4050_v33  ;;  %v439_v33 = vsub.s32 3, %v426_v22 }
  0x7f   :  { %1152 = vmatprep.subr.bf16.mxu1 %v4062_v35  ;;  %v435_v35 = vsub.s32 2, %v426_v22 }
  0x82   :  { %1153 = vmatpush1.bf16.msra.mxu1 %v4074_v37 }
  0x83   :  { %1154 = vmatprep.subr.bf16.mxu1 %v4086_v40 }
  0x86   :  { %1155 = vmatpush1.bf16.msra.mxu1 %v4098_v42 }
  0x87   :  { %1156 = vmatprep.subr.bf16.mxu1 %v4110_v45  ;;  %v4321_v45 = vrot.slane %v453_v20, %v427_v18 }
  0x8a   :  { %1157 = vmatpush1.bf16.msra.mxu1 %v4122_v48 }
  0x8b   :  { %1158 = vmatprep.subr.bf16.mxu1 %v4134_v52 }
  0x8e   :  { %1159 = vmatpush1.bf16.msra.mxu1 %v4146_v54  ;;  %v423_v54 = vld [vmem:[%s5427_s4] sm:$0xf] }
  0x8f   :  { %1160 = vmatprep.subr.bf16.mxu1 %v4158_v58  ;;  %v462_v58 = vrot.slane %v453_v20, %v431_v12  ;;  %v428_v24 = vrot.slane %v423_v54, %v427_v18  ;;  %v432_v40 = vrot.slane %v423_v54, %v431_v12  ;;  %v436_v31 = vrot.slane %v423_v54, %v435_v35 }
  0x90   :  { %v440_v29 = vrot.slane %v423_v54, %v439_v33 }
  0x92   :  { %1161 = vmatpush1.bf16.msra.mxu1 %v4170_v60 }
  0x93   :  { %1275 = vmatprep.subr.bf16.mxu1 %v4182_v63 }
  0xd5   :  { %v285_v48 = vpop.f32.mrf.mxu1  ;;  %v371_v52 = vpop.f32.mrf.mxu0 }
  0xd6   :  { %v4327_v63 = vadd.f32 %v4321_v45, %v371_v52 }
  0xd7   :  { %v287_v60 = vpop.f32.mrf.mxu1  ;;  %v373_v5 = vpop.f32.mrf.mxu0 }
  0xd8   :  { %5584 = vst [vmem:[#allocation35_spill] sm:$0xff] %v4327_v63  ;;  %v4329_v4 = vadd.f32 %v462_v58, %v373_v5  ;;  %v4346_v50 = vadd.f32 %v432_v40, %v287_v60 }
  0xd9   :  { %v289_v42 = vpop.f32.mrf.mxu1  ;;  %v375_v5 = vpop.f32.mrf.mxu0 }
  0xda   :  { %5585 = vst [vmem:[#allocation36_spill] sm:$0xff] %v4329_v4  ;;  %v4331_v0 = vadd.f32 %v428_v24, %v289_v42  ;;  %v4339_v4 = vrot.slane %v453_v20, %v435_v35  ;;  %v4341_v42 = vrot.slane %v453_v20, %v439_v33 }
  0xdb   :  { %v291_v37 = vpop.f32.mrf.mxu1  ;;  %v377_v12 = vpop.f32.mrf.mxu0 }
  0xdc   :  { %5586 = vst [vmem:[#allocation37_spill] sm:$0xff] %v4331_v0  ;;  %v4333_v62 = vadd.f32 %v432_v40, %v291_v37 }
  0xde   :  { %5587 = vst [vmem:[#allocation38_spill] sm:$0xff] %v4333_v62 }
  0xe5   :  { %v328_v57 = vpop.f32.mrf.mxu1 }
  0xe7   :  { %v330_v56 = vpop.f32.mrf.mxu1 }
  0xe9   :  { %v332_v51 = vpop.f32.mrf.mxu1 }
  0xea   :  { %v4335_v52 = vadd.f32 %v436_v31, %v332_v51 }
  0xeb   :  { %v334_v18 = vpop.f32.mrf.mxu1 }
  0xec   :  { %5588 = vst [vmem:[#allocation39_spill] sm:$0xff] %v4335_v52  ;;  %v4337_v63 = vadd.f32 %v440_v29, %v334_v18  ;;  %v4351_v18 = vadd.f32 %v428_v24, %v285_v48  ;;  %v4357_v24 = vadd.f32 %v440_v29, %v330_v56  ;;  %v4364_v56 = vadd.f32 %v4321_v45, %v375_v5 }
  0xee   :  { %5589 = vst [vmem:[#allocation40_spill] sm:$0xff] %v4337_v63  ;;  %5593 = vst [vmem:[#allocation44_spill] sm:$0xff] %v4357_v24 }
  0xf5   :  { %v414_v37 = vpop.f32.mrf.mxu1 }
  0xf6   :  { %v4344_v62 = vadd.f32 %v4339_v4, %v414_v37  ;;  %v741_v22 = vpop.f32.mrf.mxu0 }
  0xf7   :  { %v416_v0 = vpop.f32.mrf.mxu1  ;;  %v789_v20 = vadd.f32 %v741_v22, %v4351_v18 }
  0xf8   :  { %5590 = vst [vmem:[#allocation41_spill] sm:$0xff] %v4344_v62  ;;  %v4349_v51 = vadd.f32 %v4341_v42, %v416_v0  ;;  %v743_v54 = vpop.f32.mrf.mxu0 }
  0xf9   :  { %v790_v35 = vadd.f32 %v743_v54, %v4346_v50  ;;  %v3095_v27 = vmul.f32 -1.442695, %v789_v20  ;;  %v418_v62 = vpop.f32.mrf.mxu1 }
  0xfa   :  { %5591 = vst [vmem:[#allocation42_spill] sm:$0xff] %v4349_v51  ;;  %v745_v52 = vpop.f32.mrf.mxu0  ;;  %v4355_v51 = vadd.f32 %v436_v31, %v328_v57 }
  0xfb   :  { %v3096_v63 = vmul.f32 -1.442695, %v790_v35  ;;  %v420_v0 = vpop.f32.mrf.mxu1 }
  0xfc   :  { %v746_v33 = vpop.f32.mrf.mxu0  ;;  %5592 = vst [vmem:[#allocation43_spill] sm:$0xff] %v4355_v51 }
  0xfd   :  { %3329 = vpow2.f32 %v3096_v63 }
  0xfe   :  { %3331 = vpow2.f32 %v3095_v27 }
 0x10a   :  { %v3330_v37 = vpop.eup %3329 }
 0x10b   :  { %v3332_v40 = vpop.eup %3331  ;;  %v802_v60 = vadd.f32 1.0, %v3330_v37  ;;  %v4361_v37 = vadd.f32 %v462_v58, %v377_v12 }
 0x10c   :  { %v796_v46 = vadd.f32 1.0, %v3332_v40 }
 0x10d   :  { %3333 = vrcp.f32 %v802_v60 }
 0x10e   :  { %3335 = vrcp.f32 %v796_v46 }
 0x115   :  { %v782_v48 = vpop.f32.mrf.mxu1 }
 0x116   :  { %v791_v52 = vadd.f32 %v782_v48, %v4355_v51  ;;  %v1011_v22 = vpop.f32.mrf.mxu0 }
 0x117   :  { %v784_v54 = vpop.f32.mrf.mxu1  ;;  %v1063_v35 = vrot.slane %v1011_v22, 2 }
 0x118   :  { %3337 = vtanh.f32 %v791_v52  ;;  %v792_v27 = vadd.f32 %v784_v54, %v4357_v24  ;;  %v1013_v63 = vpop.f32.mrf.mxu0 }
 0x119   :  { %v1064_v20 = vrot.slane %v1013_v63, 2  ;;  %v786_v33 = vpop.f32.mrf.mxu1  ;;  %v1071_v60 = vadd.f32 %v1063_v35, %v4364_v56 }
 0x11a   :  { %v3097_v57 = vmul.f32 -1.442695, %v792_v27  ;;  %v1015_v31 = vpop.f32.mrf.mxu0  ;;  %v3334_v54 = vpop.eup %3333 }
 0x11b   :  { %v787_v29 = vpop.f32.mrf.mxu1  ;;  %v1072_v40 = vadd.f32 %v1064_v20, %v4361_v37  ;;  %v3130_v52 = vmul.f32 -1.442695, %v1071_v60  ;;  %v3336_v22 = vpop.eup %3335  ;;  %v812_v58 = vmul.f32 0.0, %v3334_v54 }
 0x11c   :  { %3339 = vpow2.f32 %v3097_v57  ;;  %v1016_v46 = vpop.f32.mrf.mxu0  ;;  %v4372_v29 = vadd.f32 %v4339_v4, %v418_v62 }
 0x11d   :  { %v3131_v48 = vmul.f32 -1.442695, %v1072_v40 }
 0x11f   :  { %3341 = vpow2.f32 %v3131_v48  ;;  %v4375_v48 = vadd.f32 %v4341_v42, %v420_v0 }
 0x120   :  { %3343 = vpow2.f32 %v3130_v52 }
 0x125   :  { %v3338_v63 = vpop.eup %3337 }
 0x126   :  { %v813_v12 = vmul.f32 %v3338_v63, %v3336_v22 }
 0x128   :  { %v4368_v27 = vadd.f32 %v813_v12, %v812_v58 }
 0x129   :  { %v3340_v45 = vpop.eup %3339 }
 0x12a   :  { %v809_v5 = vadd.f32 1.0, %v3340_v45  ;;  %3345 = vtanh.f32 %v4368_v27 }
 0x12c   :  { %3347 = vrcp.f32 %v809_v5  ;;  %v3342_v20 = vpop.eup %3341 }
 0x12d   :  { %v3344_v33 = vpop.eup %3343  ;;  %v1084_v57 = vadd.f32 1.0, %v3342_v20 }
 0x12e   :  { %v1078_v35 = vadd.f32 1.0, %v3344_v33 }
 0x12f   :  { %3349 = vrcp.f32 %v1084_v57 }
 0x130   :  { %3351 = vrcp.f32 %v1078_v35 }
 0x135   :  { %v1052_v31 = vpop.f32.mrf.mxu1 }
 0x136   :  { %v1065_v40 = vrot.slane %v1052_v31, 2 }
 0x137   :  { %v1054_v46 = vpop.f32.mrf.mxu1  ;;  %v3346_v60 = vpop.eup %3345 }
 0x138   :  { %v1073_v52 = vadd.f32 %v1065_v40, %v4372_v29  ;;  %v1066_v54 = vrot.slane %v1054_v46, 2 }
 0x139   :  { %v3348_v22 = vpop.eup %3347  ;;  %v1056_v63 = vpop.f32.mrf.mxu1 }
 0x13a   :  { %3353 = vtanh.f32 %v1073_v52  ;;  %v1074_v58 = vadd.f32 %v1066_v54, %v4375_v48  ;;  %v816_v12 = vmul.f32 %v3348_v22, %v3346_v60 }
 0x13b   :  { %v1057_v45 = vpop.f32.mrf.mxu1 }
 0x13c   :  { %v3132_v62 = vmul.f32 -1.442695, %v1074_v58  ;;  %v1104_v4 = vpack.c.bf16 %v816_v12, %v816_v12  ;;  %v3350_v42 = vpop.eup %3349  ;;  %v5594_v58 = vld [vmem:[#allocation5_spill] sm:$0xff]  ;;  %v5595_v45 = vld [vmem:[#allocation20_spill] sm:$0xff] }
 0x13d   :  { %v3352_v0 = vpop.eup %3351  ;;  %v1094_v20 = vmul.f32 0.0, %v3350_v42  ;;  %v5600_v42 = vld [vmem:[#allocation8_spill] sm:$0xff] }
 0x13e   :  { %3355 = vpow2.f32 %v3132_v62  ;;  %1138 = vmatmul.mubr.bf16.vlgmr.msra.gmra.mxu0 %v1104_v4  ;;  %1179 = vmatmul.mubr.bf16.vlgmr.msra.gmra.mxu1 %v1104_v4  ;;  %v5597_v62 = vld [vmem:[#allocation21_spill] sm:$0xff]  ;;  %v5599_v4 = vld [vmem:[#allocation22_spill] sm:$0xff] }
 0x13f   :  { %1235 = vmatpush1.bf16.msra.mxu0 %v4002_v26  ;;  %1276 = vmatpush1.bf16.msra.mxu1 %v4189_v1 }
 0x140   :  { %1236 = vmatprep.subr.bf16.mxu0 %v4015_v28  ;;  %1277 = vmatprep.subr.bf16.mxu1 %v4196_v2 }
 0x141   :  { %1266 = vmatprep.mubr.bf16.mxu0 %v5583_v14  ;;  %1307 = vmatprep.mubr.bf16.mxu1 %v5583_v14 }
 0x143   :  { %1237 = vmatpush1.bf16.msra.mxu0 %v4029_v30  ;;  %1278 = vmatpush1.bf16.msra.mxu1 %v4205_v3 }
 0x144   :  { %1238 = vmatprep.subr.bf16.mxu0 %v4042_v32  ;;  %1279 = vmatprep.subr.bf16.mxu1 %v4211_v6 }
 0x147   :  { %v3354_v5 = vpop.eup %3353  ;;  %1239 = vmatpush1.bf16.msra.mxu0 %v4057_v34  ;;  %1280 = vmatpush1.bf16.msra.mxu1 %v4221_v7 }
 0x148   :  { %v1095_v33 = vmul.f32 %v3354_v5, %v3352_v0  ;;  %1240 = vmatprep.subr.bf16.mxu0 %v4068_v36  ;;  %1281 = vmatprep.subr.bf16.mxu1 %v4227_v9  ;;  %v5602_v0 = vld [vmem:[#allocation9_spill] sm:$0xff]  ;;  %v5603_v5 = vld [vmem:[#allocation24_spill] sm:$0xff] }
 0x14a   :  { %v4393_v57 = vadd.f32 %v1095_v33, %v1094_v20  ;;  %v5604_v20 = vld [vmem:[#allocation10_spill] sm:$0xff]  ;;  %v5605_v33 = vld [vmem:[#allocation25_spill] sm:$0xff] }
 0x14b   :  { %v3356_v35 = vpop.eup %3355  ;;  %1241 = vmatpush1.bf16.msra.mxu0 %v4081_v38  ;;  %1282 = vmatpush1.bf16.msra.mxu1 %v4235_v10 }
 0x14c   :  { %v1091_v31 = vadd.f32 1.0, %v3356_v35  ;;  %1242 = vmatprep.subr.bf16.mxu0 %v4092_v41  ;;  %1283 = vmatprep.subr.bf16.mxu1 %v4241_v11  ;;  %3357 = vtanh.f32 %v4393_v57  ;;  %v5606_v35 = vld [vmem:[#allocation11_spill] sm:$0xff] }
 0x14e   :  { %3359 = vrcp.f32 %v1091_v31  ;;  %v5607_v31 = vld [vmem:[#allocation26_spill] sm:$0xff] }
 0x14f   :  { %1243 = vmatpush1.bf16.msra.mxu0 %v4105_v43  ;;  %1284 = vmatpush1.bf16.msra.mxu1 %v4249_v13 }
 0x150   :  { %1244 = vmatprep.subr.bf16.mxu0 %v4116_v47  ;;  %1285 = vmatprep.subr.bf16.mxu1 %v4255_v15 }
 0x153   :  { %1245 = vmatpush1.bf16.msra.mxu0 %v4129_v49  ;;  %1286 = vmatpush1.bf16.msra.mxu1 %v4263_v16 }
 0x154   :  { %1246 = vmatprep.subr.bf16.mxu0 %v4140_v53  ;;  %1287 = vmatprep.subr.bf16.mxu1 %v4269_v17 }
 0x157   :  { %1247 = vmatpush1.bf16.msra.mxu0 %v4153_v55  ;;  %1288 = vmatpush1.bf16.msra.mxu1 %v4277_v19 }
 0x158   :  { %1248 = vmatprep.subr.bf16.mxu0 %v4164_v59  ;;  %1289 = vmatprep.subr.bf16.mxu1 %v4283_v21 }
 0x159   :  { %v3358_v40 = vpop.eup %3357 }
 0x15b   :  { %v3360_v46 = vpop.eup %3359  ;;  %1249 = vmatpush1.bf16.msra.mxu0 %v4177_v61  ;;  %1290 = vmatpush1.bf16.msra.mxu1 %v4291_v8 }
 0x15c   :  { %v1098_v60 = vmul.f32 %v3360_v46, %v3358_v40  ;;  %1371 = vmatprep.subr.bf16.mxu0 %v3832_v39  ;;  %1412 = vmatprep.subr.bf16.mxu1 %v3986_v23  ;;  %v5596_v39 = vld [vmem:[#allocation6_spill] sm:$0xff]  ;;  %v5608_v40 = vld [vmem:[#allocation12_spill] sm:$0xff]  ;;  %v5609_v46 = vld [vmem:[#allocation27_spill] sm:$0xff] }
 0x15e   :  { %v1101_v52 = vrot.slane %v1098_v60, 6  ;;  %v1230_v54 = vpack.c.bf16 %v1098_v60, %v1098_v60  ;;  %v5610_v60 = vld [vmem:[#allocation13_spill] sm:$0xff] }
 0x160   :  { %v4416_v22 = vadd.f32 %v1101_v52, %v816_v12  ;;  %v1232_v63 = vrot.slane %v1230_v54, 3  ;;  %v5598_v12 = vld [vmem:[#allocation7_spill] sm:$0xff]  ;;  %v5611_v52 = vld [vmem:[#allocation28_spill] sm:$0xff]  ;;  %v5612_v54 = vld [vmem:[#allocation14_spill] sm:$0xff] }
 0x162   :  { %1267 = vmatmul.mubr.bf16.vlgmr.msra.gmra.mxu0 %v1232_v63  ;;  %1308 = vmatmul.mubr.bf16.vlgmr.msra.gmra.mxu1 %v1232_v63  ;;  %v5613_v63 = vld [vmem:[#allocation29_spill] sm:$0xff] }
 0x163   :  { %1372 = vmatpush1.bf16.msra.mxu0 %v3850_v44  ;;  %1413 = vmatpush1.bf16.msra.mxu1 %v3997_v25  ;;  %v5601_v44 = vld [vmem:[#allocation23_spill] sm:$0xff] }
 0x164   :  { %1373 = vmatprep.subr.bf16.mxu0 %v5594_v58  ;;  %1414 = vmatprep.subr.bf16.mxu1 %v5595_v45  ;;  %v5614_v58 = vld [vmem:[#allocation15_spill] sm:$0xff] }
 0x165   :  { %1403 = vmatprep.mubr.bf16.mxu0 %v5583_v14  ;;  %1444 = vmatprep.mubr.bf16.mxu1 %v5583_v14 }
 0x167   :  { %1374 = vmatpush1.bf16.msra.mxu0 %v5596_v39  ;;  %1415 = vmatpush1.bf16.msra.mxu1 %v5597_v62  ;;  %v5615_v39 = vld [vmem:[#allocation30_spill] sm:$0xff] }
 0x168   :  { %1375 = vmatprep.subr.bf16.mxu0 %v5598_v12  ;;  %1416 = vmatprep.subr.bf16.mxu1 %v5599_v4  ;;  %v5616_v12 = vld [vmem:[#allocation16_spill] sm:$0xff] }
 0x16b   :  { %1376 = vmatpush1.bf16.msra.mxu0 %v5600_v42  ;;  %1417 = vmatpush1.bf16.msra.mxu1 %v5601_v44  ;;  %v5617_v42 = vld [vmem:[#allocation31_spill] sm:$0xff] }
 0x16c   :  { %1377 = vmatprep.subr.bf16.mxu0 %v5602_v0  ;;  %1418 = vmatprep.subr.bf16.mxu1 %v5603_v5  ;;  %v5618_v0 = vld [vmem:[#allocation17_spill] sm:$0xff] }
 0x16f   :  { %1378 = vmatpush1.bf16.msra.mxu0 %v5604_v20  ;;  %1419 = vmatpush1.bf16.msra.mxu1 %v5605_v33  ;;  %v5619_v20 = vld [vmem:[#allocation32_spill] sm:$0xff] }
 0x170   :  { %1379 = vmatprep.subr.bf16.mxu0 %v5606_v35  ;;  %1420 = vmatprep.subr.bf16.mxu1 %v5607_v31  ;;  %v5620_v35 = vld [vmem:[#allocation18_spill] sm:$0xff] }
 0x173   :  { %1380 = vmatpush1.bf16.msra.mxu0 %v5608_v40  ;;  %1421 = vmatpush1.bf16.msra.mxu1 %v5609_v46  ;;  %v5621_v40 = vld [vmem:[#allocation33_spill] sm:$0xff] }
 0x174   :  { %1381 = vmatprep.subr.bf16.mxu0 %v5610_v60  ;;  %1422 = vmatprep.subr.bf16.mxu1 %v5611_v52  ;;  %v5622_v60 = vld [vmem:[#allocation19_spill] sm:$0xff] }
 0x177   :  { %1382 = vmatpush1.bf16.msra.mxu0 %v5612_v54  ;;  %1423 = vmatpush1.bf16.msra.mxu1 %v5613_v63  ;;  %v5623_v54 = vld [vmem:[#allocation34_spill] sm:$0xff] }
 0x178   :  { %1383 = vmatprep.subr.bf16.mxu0 %v5614_v58  ;;  %1424 = vmatprep.subr.bf16.mxu1 %v5615_v39 }
 0x17b   :  { %1384 = vmatpush1.bf16.msra.mxu0 %v5616_v12  ;;  %1425 = vmatpush1.bf16.msra.mxu1 %v5617_v42 }
 0x17c   :  { %1385 = vmatprep.subr.bf16.mxu0 %v5618_v0  ;;  %1426 = vmatprep.subr.bf16.mxu1 %v5619_v20 }
 0x17f   :  { %1386 = vmatpush1.bf16.msra.mxu0 %v5620_v35  ;;  %1427 = vmatpush1.bf16.msra.mxu1 %v5621_v40 }
 0x180   :  { %1500 = vmatprep.subr.bf16.mxu0 %v5622_v60  ;;  %1541 = vmatprep.subr.bf16.mxu1 %v5623_v54 }
 0x1fe   :  { %v1139_v63 = vpop.f32.mrf.mxu0  ;;  %v1180_v58 = vpop.f32.mrf.mxu1 }
 0x1ff   :  { %v1191_v52 = vrot.slane %v1139_v63, 6  ;;  %v1193_v44 = vrot.slane %v1180_v58, 6 }
 0x200   :  { %v1141_v39 = vpop.f32.mrf.mxu0  ;;  %v1182_v46 = vpop.f32.mrf.mxu1 }
 0x201   :  { %v1199_v12 = vadd.f32 %v1191_v52, %v4351_v18  ;;  %v1192_v42 = vrot.slane %v1141_v39, 6  ;;  %v1194_v60 = vrot.slane %v1182_v46, 6  ;;  %v1201_v62 = vadd.f32 %v1193_v44, %v4355_v51 }
 0x202   :  { %v1143_v31 = vpop.f32.mrf.mxu0  ;;  %v1184_v0 = vpop.f32.mrf.mxu1  ;;  %v1223_v46 = vrot.slane %v4368_v27, 6 }
 0x203   :  { %v3133_v33 = vmul.f32 -1.442695, %v1199_v12  ;;  %v1200_v20 = vadd.f32 %v1192_v42, %v4346_v50  ;;  %v1202_v54 = vadd.f32 %v1194_v60, %v4357_v24 }
 0x204   :  { %v1144_v35 = vpop.f32.mrf.mxu0  ;;  %v1185_v5 = vpop.f32.mrf.mxu1 }
 0x205   :  { %3361 = vpow2.f32 %v3133_v33  ;;  %v3134_v40 = vmul.f32 -1.442695, %v1200_v20  ;;  %v3135_v63 = vmul.f32 -1.442695, %v1202_v54 }
 0x207   :  { %3363 = vpow2.f32 %v3134_v40 }
 0x208   :  { %3365 = vpow2.f32 %v3135_v63 }
 0x212   :  { %v3362_v4 = vpop.eup %3361 }
 0x213   :  { %v1206_v52 = vadd.f32 1.0, %v3362_v4 }
 0x214   :  { %v3364_v39 = vpop.eup %3363 }
 0x215   :  { %3367 = vrcp.f32 %v1206_v52  ;;  %v1212_v31 = vadd.f32 1.0, %v3364_v39  ;;  %v3366_v42 = vpop.eup %3365 }
 0x216   :  { %3369 = vtanh.f32 %v1201_v62  ;;  %v1219_v54 = vadd.f32 1.0, %v3366_v42 }
 0x217   :  { %3371 = vrcp.f32 %v1212_v31 }
 0x218   :  { %3373 = vrcp.f32 %v1219_v54 }
 0x222   :  { %v3368_v5 = vpop.eup %3367  ;;  %v1268_v33 = vpop.f32.mrf.mxu0 }
 0x223   :  { %v1309_v20 = vpop.f32.mrf.mxu1  ;;  %v3370_v40 = vpop.eup %3369  ;;  %v1320_v12 = vrot.slane %v1268_v33, 4 }
 0x224   :  { %v3372_v58 = vpop.eup %3371  ;;  %v1270_v0 = vpop.f32.mrf.mxu0  ;;  %v1226_v44 = vmul.f32 %v3370_v40, %v3368_v5  ;;  %v1322_v40 = vrot.slane %v1309_v20, 4 }
 0x225   :  { %v1311_v35 = vpop.f32.mrf.mxu1  ;;  %v1225_v4 = vmul.f32 %v3372_v58, %v1223_v46  ;;  %v1328_v60 = vadd.f32 %v1320_v12, %v4364_v56  ;;  %v1321_v63 = vrot.slane %v1270_v0, 4  ;;  %v3374_v12 = vpop.eup %3373 }
 0x226   :  { %v1272_v52 = vpop.f32.mrf.mxu0  ;;  %v1323_v42 = vrot.slane %v1311_v35, 4  ;;  %v1330_v0 = vadd.f32 %v1322_v40, %v4372_v29  ;;  %v5647_v40 = vld [vmem:[#allocation32_spill] sm:$0xff] }
 0x227   :  { %v1313_v62 = vpop.f32.mrf.mxu1  ;;  %v4458_v39 = vadd.f32 %v1226_v44, %v1225_v4  ;;  %v3136_v31 = vmul.f32 -1.442695, %v1328_v60  ;;  %v1329_v51 = vadd.f32 %v1321_v63, %v4361_v37 }
 0x228   :  { %v1273_v24 = vpop.f32.mrf.mxu0  ;;  %v1331_v5 = vadd.f32 %v1323_v42, %v4375_v48  ;;  %v5641_v62 = vld [vmem:[#allocation29_spill] sm:$0xff]  ;;  %v5645_v42 = vld [vmem:[#allocation31_spill] sm:$0xff] }
 0x229   :  { %v1314_v27 = vpop.f32.mrf.mxu1  ;;  %3375 = vpow2.f32 %v3136_v31  ;;  %v3137_v33 = vmul.f32 -1.442695, %v1329_v51  ;;  %v4592_v31 = vld [vmem:[%s5425_s2 + $0x24] ss:$16 sps:$4 sm:$0xff]  }
 0x22a   :  { %3377 = vtanh.f32 %v4458_v39  ;;  %v3138_v46 = vmul.f32 -1.442695, %v1331_v5  ;;  %5642 = vst [vmem:[#allocation13_spill] sm:$0xff] %v4592_v31  ;;  %v5643_v27 = vld [vmem:[#allocation30_spill] sm:$0xff]  ;;  %v4606_v5 = vld [vmem:[%s5425_s2 + $0x4] ss:$16 sps:$4 sm:$0xff]  }
 0x22b   :  { %3379 = vpow2.f32 %v3137_v33  ;;  %v4599_v33 = vld [vmem:[%s5425_s2 + $0x20] ss:$16 sps:$4 sm:$0xff]   ;;  %5646 = vst [vmem:[#allocation15_spill] sm:$0xff] %v4606_v5 }
 0x22c   :  { %3381 = vpow2.f32 %v3138_v46  ;;  %5644 = vst [vmem:[#allocation14_spill] sm:$0xff] %v4599_v33  ;;  %v4613_v46 = vld [vmem:[%s5425_s2] ss:$16 sps:$4 sm:$0xff]  }
 0x22d   :  { %5648 = vst [vmem:[#allocation16_spill] sm:$0xff] %v4613_v46 }
 0x236   :  { %v3376_v58 = vpop.eup %3375 }
 0x237   :  { %v3378_v44 = vpop.eup %3377  ;;  %v1335_v4 = vadd.f32 1.0, %v3376_v58  ;;  %v4620_v58 = vld [vmem:[%s5426_s3 + $0xe4] ss:$16 sps:$4 sm:$0xff]  }
 0x238   :  { %v3380_v60 = vpop.eup %3379  ;;  %v1229_v24 = vmul.f32 %v3378_v44, %v3374_v12  ;;  %v5649_v12 = vld [vmem:[#allocation33_spill] sm:$0xff]  ;;  %5650 = vst [vmem:[#allocation17_spill] sm:$0xff] %v4620_v58 }
 0x239   :  { %3383 = vrcp.f32 %v1335_v4  ;;  %v1341_v54 = vadd.f32 1.0, %v3380_v60 }
 0x23a   :  { %3385 = vtanh.f32 %v1330_v0  ;;  %v1360_v51 = vrot.slane %v1229_v24, 2  ;;  %v1367_v63 = vpack.c.bf16 %v1229_v24, %v1229_v24  ;;  %v5651_v0 = vld [vmem:[#allocation34_spill] sm:$0xff] }
 0x23b   :  { %3387 = vrcp.f32 %v1341_v54 }
 0x23c   :  { %v1362_v35 = vadd.f32 %v1360_v51, %v4416_v22  ;;  %v1369_v52 = vrot.slane %v1367_v63, 1  ;;  %v3382_v22 = vpop.eup %3381 }
 0x23e   :  { %1404 = vmatmul.mubr.bf16.vlgmr.msra.gmra.mxu0 %v1369_v52  ;;  %1445 = vmatmul.mubr.bf16.vlgmr.msra.gmra.mxu1 %v1369_v52 }
 0x23f   :  { %1501 = vmatpush1.bf16.msra.mxu0 %v4002_v26  ;;  %1542 = vmatpush1.bf16.msra.mxu1 %v4189_v1  ;;  %v1352_v1 = vrot.slane %v4393_v57, 2  ;;  %v5639_v57 = vld [vmem:[#allocation28_spill] sm:$0xff] }
 0x240   :  { %1502 = vmatprep.subr.bf16.mxu0 %v4015_v28  ;;  %1543 = vmatprep.subr.bf16.mxu1 %v4196_v2  ;;  %v1348_v2 = vadd.f32 1.0, %v3382_v22 }
 0x241   :  { %1532 = vmatprep.mubr.bf16.mxu0 %v5583_v14  ;;  %1573 = vmatprep.mubr.bf16.mxu1 %v5583_v14 }
 0x242   :  { %3389 = vrcp.f32 %v1348_v2 }
 0x243   :  { %1503 = vmatpush1.bf16.msra.mxu0 %v4029_v30  ;;  %1544 = vmatpush1.bf16.msra.mxu1 %v4205_v3 }
 0x244   :  { %1504 = vmatprep.subr.bf16.mxu0 %v4042_v32  ;;  %1545 = vmatprep.subr.bf16.mxu1 %v4211_v6  ;;  %v4543_v6 = vld [vmem:[%s5425_s2 + $0xa0] ss:$16 sps:$4 sm:$0xff]  }
 0x245   :  { %5628 = vst [vmem:[#allocation6_spill] sm:$0xff] %v4543_v6 }
 0x246   :  { %v3384_v26 = vpop.eup %3383 }
 0x247   :  { %v3386_v20 = vpop.eup %3385  ;;  %1505 = vmatpush1.bf16.msra.mxu0 %v4057_v34  ;;  %1546 = vmatpush1.bf16.msra.mxu1 %v4221_v7  ;;  %v5629_v7 = vld [vmem:[#allocation23_spill] sm:$0xff] }
 0x248   :  { %v3388_v28 = vpop.eup %3387  ;;  %1506 = vmatprep.subr.bf16.mxu0 %v4068_v36  ;;  %1547 = vmatprep.subr.bf16.mxu1 %v4227_v9  ;;  %v1355_v30 = vmul.f32 %v3386_v20, %v3384_v26  ;;  %v4550_v9 = vld [vmem:[%s5425_s2 + $0x84] ss:$16 sps:$4 sm:$0xff]  }
 0x249   :  { %v1354_v3 = vmul.f32 %v3388_v28, %v1352_v1  ;;  %5630 = vst [vmem:[#allocation7_spill] sm:$0xff] %v4550_v9 }
 0x24b   :  { %v4480_v32 = vadd.f32 %v1355_v30, %v1354_v3  ;;  %1507 = vmatpush1.bf16.msra.mxu0 %v4081_v38  ;;  %1548 = vmatpush1.bf16.msra.mxu1 %v4235_v10  ;;  %v5631_v10 = vld [vmem:[#allocation24_spill] sm:$0xff] }
 0x24c   :  { %1508 = vmatprep.subr.bf16.mxu0 %v4092_v41  ;;  %1549 = vmatprep.subr.bf16.mxu1 %v4241_v11  ;;  %v4504_v41 = vld [vmem:[%s5425_s2 + $0xe4] ss:$16 sps:$4 sm:$0xff]   ;;  %v4557_v11 = vld [vmem:[%s5425_s2 + $0x80] ss:$16 sps:$4 sm:$0xff]  }
 0x24d   :  { %3391 = vtanh.f32 %v4480_v32  ;;  %5632 = vst [vmem:[#allocation8_spill] sm:$0xff] %v4557_v11  ;;  %v5652_v30 = vld [vmem:[#allocation44_spill] sm:$0xff] }
 0x24f   :  { %1509 = vmatpush1.bf16.msra.mxu0 %v4105_v43  ;;  %1550 = vmatpush1.bf16.msra.mxu1 %v4249_v13  ;;  %v3390_v34 = vpop.eup %3389  ;;  %v5633_v13 = vld [vmem:[#allocation25_spill] sm:$0xff] }
 0x250   :  { %1510 = vmatprep.subr.bf16.mxu0 %v4116_v47  ;;  %1551 = vmatprep.subr.bf16.mxu1 %v4255_v15  ;;  %v4564_v15 = vld [vmem:[%s5425_s2 + $0x64] ss:$16 sps:$4 sm:$0xff]  }
 0x251   :  { %5634 = vst [vmem:[#allocation9_spill] sm:$0xff] %v4564_v15 }
 0x253   :  { %1511 = vmatpush1.bf16.msra.mxu0 %v4129_v49  ;;  %1552 = vmatpush1.bf16.msra.mxu1 %v4263_v16  ;;  %v5635_v16 = vld [vmem:[#allocation26_spill] sm:$0xff] }
 0x254   :  { %1512 = vmatprep.subr.bf16.mxu0 %v4140_v53  ;;  %1553 = vmatprep.subr.bf16.mxu1 %v4269_v17  ;;  %v4571_v17 = vld [vmem:[%s5425_s2 + $0x60] ss:$16 sps:$4 sm:$0xff]  }
 0x255   :  { %5636 = vst [vmem:[#allocation10_spill] sm:$0xff] %v4571_v17 }
 0x257   :  { %1513 = vmatpush1.bf16.msra.mxu0 %v4153_v55  ;;  %1554 = vmatpush1.bf16.msra.mxu1 %v4277_v19  ;;  %v4529_v55 = vld [vmem:[%s5425_s2 + $0xc0] ss:$16 sps:$4 sm:$0xff]  }
 0x258   :  { %1514 = vmatprep.subr.bf16.mxu0 %v4164_v59  ;;  %1555 = vmatprep.subr.bf16.mxu1 %v4283_v21  ;;  %5624 = vst [vmem:[#allocation5_spill] sm:$0xff] %v4529_v55  ;;  %v4536_v59 = vld [vmem:[%s5425_s2 + $0xa4] ss:$16 sps:$4 sm:$0xff]  }
 0x259   :  { %5626 = vst [vmem:[#allocation20_spill] sm:$0xff] %v4536_v59  ;;  %v5637_v19 = vld [vmem:[#allocation27_spill] sm:$0xff] }
 0x25a   :  { %v3392_v36 = vpop.eup %3391  ;;  %v4578_v21 = vld [vmem:[%s5425_s2 + $0x44] ss:$16 sps:$4 sm:$0xff]  }
 0x25b   :  { %1515 = vmatpush1.bf16.msra.mxu0 %v4177_v61  ;;  %1556 = vmatpush1.bf16.msra.mxu1 %v4291_v8  ;;  %v1358_v38 = vmul.f32 %v3392_v36, %v3390_v34  ;;  %v4513_v8 = vld [vmem:[%s5425_s2 + $0xe0] ss:$16 sps:$4 sm:$0xff]   ;;  %5638 = vst [vmem:[#allocation11_spill] sm:$0xff] %v4578_v21 }
 0x25c   :  { %1637 = vmatprep.subr.bf16.mxu0 %v4504_v41  ;;  %1678 = vmatprep.subr.bf16.mxu1 %v3986_v23  ;;  %v4520_v23 = vld [vmem:[%s5425_s2 + $0xc4] ss:$16 sps:$4 sm:$0xff]   ;;  %v5627_v61 = vld [vmem:[#allocation22_spill] sm:$0xff] }
 0x25d   :  { %v1364_v43 = vrot.slane %v1358_v38, 4  ;;  %v1496_v47 = vpack.c.bf16 %v1358_v38, %v1358_v38 }
 0x25f   :  { %v4508_v49 = vadd.f32 %v1364_v43, %v1362_v35  ;;  %v1498_v53 = vrot.slane %v1496_v47, 2  ;;  %v5653_v43 = vld [vmem:[#allocation43_spill] sm:$0xff] }
 0x261   :  { %1533 = vmatmul.mubr.bf16.vlgmr.msra.gmra.mxu0 %v1498_v53  ;;  %1574 = vmatmul.mubr.bf16.vlgmr.msra.gmra.mxu1 %v1498_v53 }
 0x262   :  { %1638 = vmatpush1.bf16.msra.mxu0 %v4513_v8  ;;  %1679 = vmatpush1.bf16.msra.mxu1 %v3997_v25  ;;  %v5625_v25 = vld [vmem:[#allocation21_spill] sm:$0xff] }
 0x263   :  { %1639 = vmatprep.subr.bf16.mxu0 %v4520_v23  ;;  %1680 = vmatprep.subr.bf16.mxu1 %v5595_v45  ;;  %v4585_v45 = vld [vmem:[%s5425_s2 + $0x40] ss:$16 sps:$4 sm:$0xff]  }
 0x264   :  { %1669 = vmatprep.mubr.bf16.mxu0 %v5583_v14  ;;  %1710 = vmatprep.mubr.bf16.mxu1 %v5583_v14  ;;  %5640 = vst [vmem:[#allocation12_spill] sm:$0xff] %v4585_v45 }
 0x266   :  { %1640 = vmatpush1.bf16.msra.mxu0 %v4529_v55  ;;  %1681 = vmatpush1.bf16.msra.mxu1 %v5625_v25 }
 0x267   :  { %1641 = vmatprep.subr.bf16.mxu0 %v4536_v59  ;;  %1682 = vmatprep.subr.bf16.mxu1 %v5627_v61 }
 0x26a   :  { %1642 = vmatpush1.bf16.msra.mxu0 %v4543_v6  ;;  %1683 = vmatpush1.bf16.msra.mxu1 %v5629_v7 }
 0x26b   :  { %1643 = vmatprep.subr.bf16.mxu0 %v4550_v9  ;;  %1684 = vmatprep.subr.bf16.mxu1 %v5631_v10 }
 0x26e   :  { %1644 = vmatpush1.bf16.msra.mxu0 %v4557_v11  ;;  %1685 = vmatpush1.bf16.msra.mxu1 %v5633_v13 }
 0x26f   :  { %1645 = vmatprep.subr.bf16.mxu0 %v4564_v15  ;;  %1686 = vmatprep.subr.bf16.mxu1 %v5635_v16 }
 0x272   :  { %1646 = vmatpush1.bf16.msra.mxu0 %v4571_v17  ;;  %1687 = vmatpush1.bf16.msra.mxu1 %v5637_v19 }
 0x273   :  { %1647 = vmatprep.subr.bf16.mxu0 %v4578_v21  ;;  %1688 = vmatprep.subr.bf16.mxu1 %v5639_v57 }
 0x276   :  { %1648 = vmatpush1.bf16.msra.mxu0 %v4585_v45  ;;  %1689 = vmatpush1.bf16.msra.mxu1 %v5641_v62  ;;  %v1489_v62 = vrot.slane %v4458_v39, 6 }
 0x277   :  { %1649 = vmatprep.subr.bf16.mxu0 %v4592_v31  ;;  %1690 = vmatprep.subr.bf16.mxu1 %v5643_v27 }
 0x27a   :  { %1650 = vmatpush1.bf16.msra.mxu0 %v4599_v33  ;;  %1691 = vmatpush1.bf16.msra.mxu1 %v5645_v42 }
 0x27b   :  { %1651 = vmatprep.subr.bf16.mxu0 %v4606_v5  ;;  %1692 = vmatprep.subr.bf16.mxu1 %v5647_v40 }
 0x27e   :  { %1652 = vmatpush1.bf16.msra.mxu0 %v4613_v46  ;;  %1693 = vmatpush1.bf16.msra.mxu1 %v5649_v12 }
 0x27f   :  { %1766 = vmatprep.subr.bf16.mxu0 %v4620_v58  ;;  %1807 = vmatprep.subr.bf16.mxu1 %v5651_v0 }
 0x2fe   :  { %v1405_v44 = vpop.f32.mrf.mxu0  ;;  %v1446_v4 = vpop.f32.mrf.mxu1 }
 0x2ff   :  { %v1457_v60 = vrot.slane %v1405_v44, 4  ;;  %v1459_v34 = vrot.slane %v1446_v4, 4 }
 0x300   :  { %v1407_v24 = vpop.f32.mrf.mxu0  ;;  %v1448_v54 = vpop.f32.mrf.mxu1 }
 0x301   :  { %v1465_v51 = vadd.f32 %v1457_v60, %v4351_v18  ;;  %v1458_v63 = vrot.slane %v1407_v24, 4  ;;  %v1460_v2 = vrot.slane %v1448_v54, 4  ;;  %v1467_v47 = vadd.f32 %v1459_v34, %v5653_v43 }
 0x302   :  { %v1409_v35 = vpop.f32.mrf.mxu0  ;;  %v1450_v52 = vpop.f32.mrf.mxu1 }
 0x303   :  { %v3139_v22 = vmul.f32 -1.442695, %v1465_v51  ;;  %v1466_v26 = vadd.f32 %v1458_v63, %v4346_v50  ;;  %v1468_v3 = vadd.f32 %v1460_v2, %v5652_v30 }
 0x304   :  { %v1410_v20 = vpop.f32.mrf.mxu0  ;;  %v1451_v1 = vpop.f32.mrf.mxu1 }
 0x305   :  { %3393 = vpow2.f32 %v3139_v22  ;;  %v3140_v28 = vmul.f32 -1.442695, %v1466_v26  ;;  %v3141_v36 = vmul.f32 -1.442695, %v1468_v3 }
 0x307   :  { %3395 = vpow2.f32 %v3140_v28 }
 0x308   :  { %3397 = vpow2.f32 %v3141_v36 }
 0x312   :  { %v3394_v38 = vpop.eup %3393 }
 0x313   :  { %v1472_v53 = vadd.f32 1.0, %v3394_v38 }
 0x314   :  { %v3396_v25 = vpop.eup %3395 }
 0x315   :  { %3399 = vrcp.f32 %v1472_v53  ;;  %v1478_v61 = vadd.f32 1.0, %v3396_v25  ;;  %v3398_v7 = vpop.eup %3397 }
 0x316   :  { %3401 = vtanh.f32 %v1467_v47  ;;  %v1485_v27 = vadd.f32 1.0, %v3398_v7 }
 0x317   :  { %3403 = vrcp.f32 %v1478_v61 }
 0x318   :  { %3405 = vrcp.f32 %v1485_v27  ;;  %v4674_v27 = vld [vmem:[%s5426_s3 + $0xc8] ss:$16 sps:$4 sm:$0xff]  }
 0x321   :  { %v1534_v10 = vpop.f32.mrf.mxu0  ;;  %v1575_v13 = vpop.f32.mrf.mxu1 }
 0x322   :  { %v3400_v16 = vpop.eup %3399  ;;  %v1586_v19 = vrot.slane %v1534_v10, 6  ;;  %v1588_v1 = vrot.slane %v1575_v13, 6 }
 0x323   :  { %v3402_v57 = vpop.eup %3401  ;;  %v1536_v42 = vpop.f32.mrf.mxu0 }
 0x324   :  { %v1577_v40 = vpop.f32.mrf.mxu1  ;;  %v3404_v12 = vpop.eup %3403  ;;  %v1594_v0 = vadd.f32 %v1586_v19, %v4364_v56  ;;  %v1587_v44 = vrot.slane %v1536_v42, 6  ;;  %v1492_v4 = vmul.f32 %v3402_v57, %v3400_v16  ;;  %v1596_v34 = vadd.f32 %v1588_v1, %v4372_v29  ;;  %v4642_v16 = vld [vmem:[%s5426_s3 + $0xe0] ss:$16 sps:$4 sm:$0xff]   ;;  %v4648_v19 = vld [vmem:[%s5426_s3 + $0xe8] ss:$16 sps:$4 sm:$0xff]  }
 0x325   :  { %v1491_v60 = vmul.f32 %v3404_v12, %v1489_v62  ;;  %v1538_v24 = vpop.f32.mrf.mxu0  ;;  %v1589_v26 = vrot.slane %v1577_v40, 6  ;;  %v3406_v2 = vpop.eup %3405  ;;  %v4660_v57 = vld [vmem:[%s5426_s3 + $0xcc] ss:$16 sps:$4 sm:$0xff]   ;;  %v4668_v62 = vld [vmem:[%s5426_s3 + $0xc0] ss:$16 sps:$4 sm:$0xff]  }
 0x326   :  { %v1579_v54 = vpop.f32.mrf.mxu1  ;;  %v3142_v51 = vmul.f32 -1.442695, %v1594_v0  ;;  %v1595_v63 = vadd.f32 %v1587_v44, %v4361_v37  ;;  %v4680_v42 = vld [vmem:[%s5426_s3 + $0xa4] ss:$16 sps:$4 sm:$0xff]   ;;  %v4686_v40 = vld [vmem:[%s5426_s3 + $0xac] ss:$16 sps:$4 sm:$0xff]  }
 0x327   :  { %v4631_v35 = vadd.f32 %v1492_v4, %v1491_v60  ;;  %v1539_v52 = vpop.f32.mrf.mxu0  ;;  %v1597_v20 = vadd.f32 %v1589_v26, %v4375_v48  ;;  %v1618_v4 = vrot.slane %v4480_v32, 2  ;;  %v4693_v60 = vld [vmem:[%s5426_s3 + $0xa0] ss:$16 sps:$4 sm:$0xff]   ;;  %v4699_v24 = vld [vmem:[%s5426_s3 + $0xa8] ss:$16 sps:$4 sm:$0xff]  }
 0x328   :  { %v1580_v22 = vpop.f32.mrf.mxu1  ;;  %3407 = vpow2.f32 %v3142_v51  ;;  %v3143_v39 = vmul.f32 -1.442695, %v1595_v63  ;;  %v4705_v32 = vld [vmem:[%s5426_s3 + $0x84] ss:$16 sps:$4 sm:$0xff]   ;;  %v4711_v63 = vld [vmem:[%s5426_s3 + $0x8c] ss:$16 sps:$4 sm:$0xff]  }
 0x329   :  { %3409 = vtanh.f32 %v4631_v35  ;;  %v3144_v28 = vmul.f32 -1.442695, %v1597_v20  ;;  %v4719_v26 = vld [vmem:[%s5426_s3 + $0x80] ss:$16 sps:$4 sm:$0xff]   ;;  %v4725_v20 = vld [vmem:[%s5426_s3 + $0x88] ss:$16 sps:$4 sm:$0xff]  }
 0x32a   :  { %3411 = vpow2.f32 %v3143_v39  ;;  %v4731_v1 = vld [vmem:[%s5426_s3 + $0x64] ss:$16 sps:$4 sm:$0xff]  }
 0x32b   :  { %3413 = vpow2.f32 %v3144_v28  ;;  %v4737_v28 = vld [vmem:[%s5426_s3 + $0x6c] ss:$16 sps:$4 sm:$0xff]  }
 0x335   :  { %v3408_v3 = vpop.eup %3407 }
 0x336   :  { %v3410_v36 = vpop.eup %3409  ;;  %v1601_v38 = vadd.f32 1.0, %v3408_v3  ;;  %v4750_v3 = vld [vmem:[%s5426_s3 + $0x68] ss:$16 sps:$4 sm:$0xff]  }
 0x337   :  { %v3412_v47 = vpop.eup %3411  ;;  %v1495_v53 = vmul.f32 %v3410_v36, %v3406_v2  ;;  %v4744_v2 = vld [vmem:[%s5426_s3 + $0x60] ss:$16 sps:$4 sm:$0xff]   ;;  %v4762_v36 = vld [vmem:[%s5426_s3 + $0x4c] ss:$16 sps:$4 sm:$0xff]  }
 0x338   :  { %3415 = vrcp.f32 %v1601_v38  ;;  %v1607_v25 = vadd.f32 1.0, %v3412_v47  ;;  %v3414_v12 = vpop.eup %3413  ;;  %v4768_v38 = vld [vmem:[%s5426_s3 + $0x40] ss:$16 sps:$4 sm:$0xff]   ;;  %v4774_v47 = vld [vmem:[%s5426_s3 + $0x48] ss:$16 sps:$4 sm:$0xff]  }
 0x339   :  { %3417 = vtanh.f32 %v1596_v34  ;;  %v1626_v61 = vrot.slane %v1495_v53, 4  ;;  %v1633_v7 = vpack.c.bf16 %v1495_v53, %v1495_v53  ;;  %v1614_v51 = vadd.f32 1.0, %v3414_v12  ;;  %v4756_v34 = vld [vmem:[%s5426_s3 + $0x44] ss:$16 sps:$4 sm:$0xff]   ;;  %v4810_v12 = vld [vmem:[%s5426_s3 + $0xc] ss:$16 sps:$4 sm:$0xff]  }
 0x33a   :  { %3419 = vrcp.f32 %v1607_v25  ;;  %v4780_v53 = vld [vmem:[%s5426_s3 + $0x24] ss:$16 sps:$4 sm:$0xff]   ;;  %v4786_v25 = vld [vmem:[%s5426_s3 + $0x2c] ss:$16 sps:$4 sm:$0xff]   ;;  %5655 = vst [vmem:[#allocation19_spill] sm:$0xff] %v4810_v12 }
 0x33b   :  { %v4637_v10 = vadd.f32 %v1626_v61, %v4508_v49  ;;  %v1635_v13 = vrot.slane %v1633_v7, 2  ;;  %v4654_v49 = vld [vmem:[%s5426_s3 + $0xc4] ss:$16 sps:$4 sm:$0xff]   ;;  %3421 = vrcp.f32 %v1614_v51  ;;  %v4792_v61 = vld [vmem:[%s5426_s3 + $0x20] ss:$16 sps:$4 sm:$0xff]  }
 0x33c   :  { %v4798_v7 = vld [vmem:[%s5426_s3 + $0x28] ss:$16 sps:$4 sm:$0xff]  }
 0x33d   :  { %1670 = vmatmul.mubr.bf16.vlgmr.msra.gmra.mxu0 %v1635_v13  ;;  %1711 = vmatmul.mubr.bf16.vlgmr.msra.gmra.mxu1 %v1635_v13  ;;  %v4804_v13 = vld [vmem:[%s5426_s3 + $0x4] ss:$16 sps:$4 sm:$0xff]  }
 0x33e   :  { %1767 = vmatpush1.bf16.msra.mxu0 %v4642_v16  ;;  %1808 = vmatpush1.bf16.msra.mxu1 %v4648_v19  ;;  %5654 = vst [vmem:[#allocation18_spill] sm:$0xff] %v4804_v13 }
 0x33f   :  { %1768 = vmatprep.subr.bf16.mxu0 %v4654_v49  ;;  %1809 = vmatprep.subr.bf16.mxu1 %v4660_v57 }
 0x340   :  { %1798 = vmatprep.mubr.bf16.mxu0 %v5583_v14  ;;  %1839 = vmatprep.mubr.bf16.mxu1 %v5583_v14 }
 0x342   :  { %1769 = vmatpush1.bf16.msra.mxu0 %v4668_v62  ;;  %1810 = vmatpush1.bf16.msra.mxu1 %v4674_v27 }
 0x343   :  { %1770 = vmatprep.subr.bf16.mxu0 %v4680_v42  ;;  %1811 = vmatprep.subr.bf16.mxu1 %v4686_v40 }
 0x345   :  { %v3416_v0 = vpop.eup %3415 }
 0x346   :  { %v3418_v44 = vpop.eup %3417  ;;  %1771 = vmatpush1.bf16.msra.mxu0 %v4693_v60  ;;  %1812 = vmatpush1.bf16.msra.mxu1 %v4699_v24 }
 0x347   :  { %v3420_v54 = vpop.eup %3419  ;;  %1772 = vmatprep.subr.bf16.mxu0 %v4705_v32  ;;  %1813 = vmatprep.subr.bf16.mxu1 %v4711_v63  ;;  %v1621_v52 = vmul.f32 %v3418_v44, %v3416_v0 }
 0x348   :  { %v1620_v22 = vmul.f32 %v3420_v54, %v1618_v4  ;;  %v3422_v0 = vpop.eup %3421  ;;  %v4816_v4 = vld [vmem:[%s5426_s3] ss:$16 sps:$4 sm:$0xff]   ;;  %v4822_v54 = vld [vmem:[%s5426_s3 + $0x8] ss:$16 sps:$4 sm:$0xff]  }
 0x349   :  { %5656 = vst [vmem:[#allocation21_spill] sm:$0xff] %v4816_v4 }
 0x34a   :  { %v4714_v39 = vadd.f32 %v1621_v52, %v1620_v22  ;;  %1773 = vmatpush1.bf16.msra.mxu0 %v4719_v26  ;;  %1814 = vmatpush1.bf16.msra.mxu1 %v4725_v20  ;;  %v4829_v52 = vld [vmem:[%s5425_s2 + $0xec] ss:$16 sps:$4 sm:$0xff]  }
 0x34b   :  { %1774 = vmatprep.subr.bf16.mxu0 %v4731_v1  ;;  %1815 = vmatprep.subr.bf16.mxu1 %v4737_v28 }
 0x34c   :  { %3423 = vtanh.f32 %v4714_v39 }
 0x34e   :  { %1775 = vmatpush1.bf16.msra.mxu0 %v4744_v2  ;;  %1816 = vmatpush1.bf16.msra.mxu1 %v4750_v3 }
 0x34f   :  { %1776 = vmatprep.subr.bf16.mxu0 %v4756_v34  ;;  %1817 = vmatprep.subr.bf16.mxu1 %v4762_v36 }
 0x352   :  { %1777 = vmatpush1.bf16.msra.mxu0 %v4768_v38  ;;  %1818 = vmatpush1.bf16.msra.mxu1 %v4774_v47 }
 0x353   :  { %1778 = vmatprep.subr.bf16.mxu0 %v4780_v53  ;;  %1819 = vmatprep.subr.bf16.mxu1 %v4786_v25 }
 0x356   :  { %1779 = vmatpush1.bf16.msra.mxu0 %v4792_v61  ;;  %1820 = vmatpush1.bf16.msra.mxu1 %v4798_v7 }
 0x357   :  { %1780 = vmatprep.subr.bf16.mxu0 %v4804_v13  ;;  %1821 = vmatprep.subr.bf16.mxu1 %v4810_v12 }
 0x359   :  { %v3424_v44 = vpop.eup %3423 }
 0x35a   :  { %1781 = vmatpush1.bf16.msra.mxu0 %v4816_v4  ;;  %1822 = vmatpush1.bf16.msra.mxu1 %v4822_v54  ;;  %v1624_v51 = vmul.f32 %v3424_v44, %v3422_v0  ;;  %v4839_v0 = vld [vmem:[%s5425_s2 + $0xe8] ss:$16 sps:$4 sm:$0xff]   ;;  %v4846_v44 = vld [vmem:[%s5425_s2 + $0xcc] ss:$16 sps:$4 sm:$0xff]  }
 0x35b   :  { %1888 = vmatprep.subr.bf16.mxu0 %v4504_v41  ;;  %1929 = vmatprep.subr.bf16.mxu1 %v4829_v52 }
 0x35c   :  { %v1630_v22 = vrot.slane %v1624_v51, 2  ;;  %v1762_v12 = vpack.c.bf16 %v1624_v51, %v1624_v51  ;;  %v4876_v51 = vld [vmem:[%s5425_s2 + $0x8c] ss:$16 sps:$4 sm:$0xff]  }
 0x35d   :  { %5660 = vst [vmem:[#allocation25_spill] sm:$0xff] %v4876_v51 }
 0x35e   :  { %v4833_v4 = vadd.f32 %v1630_v22, %v4637_v10  ;;  %v1764_v13 = vrot.slane %v1762_v12, 1  ;;  %v4855_v10 = vld [vmem:[%s5425_s2 + $0xc8] ss:$16 sps:$4 sm:$0xff]  }
 0x35f   :  { %5657 = vst [vmem:[#allocation22_spill] sm:$0xff] %v4855_v10  ;;  %v4869_v12 = vld [vmem:[%s5425_s2 + $0xa8] ss:$16 sps:$4 sm:$0xff]  }
 0x360   :  { %1799 = vmatmul.mubr.bf16.vlgmr.msra.gmra.mxu0 %v1764_v13  ;;  %1840 = vmatmul.mubr.bf16.vlgmr.msra.gmra.mxu1 %v1764_v13  ;;  %v4862_v13 = vld [vmem:[%s5425_s2 + $0xac] ss:$16 sps:$4 sm:$0xff]   ;;  %5659 = vst [vmem:[#allocation24_spill] sm:$0xff] %v4869_v12  ;;  %v4883_v22 = vld [vmem:[%s5425_s2 + $0x88] ss:$16 sps:$4 sm:$0xff]  }
 0x361   :  { %1889 = vmatpush1.bf16.msra.mxu0 %v4513_v8  ;;  %1930 = vmatpush1.bf16.msra.mxu1 %v4839_v0  ;;  %5658 = vst [vmem:[#allocation23_spill] sm:$0xff] %v4862_v13  ;;  %5661 = vst [vmem:[#allocation26_spill] sm:$0xff] %v4883_v22 }
 0x362   :  { %1890 = vmatprep.subr.bf16.mxu0 %v4520_v23  ;;  %1931 = vmatprep.subr.bf16.mxu1 %v4846_v44 }
 0x363   :  { %1920 = vmatprep.mubr.bf16.mxu0 %v5583_v14  ;;  %1961 = vmatprep.mubr.bf16.mxu1 %v5583_v14 }
 0x365   :  { %1891 = vmatpush1.bf16.msra.mxu0 %v4529_v55  ;;  %1932 = vmatpush1.bf16.msra.mxu1 %v4855_v10 }
 0x366   :  { %1892 = vmatprep.subr.bf16.mxu0 %v4536_v59  ;;  %1933 = vmatprep.subr.bf16.mxu1 %v4862_v13 }
 0x369   :  { %1893 = vmatpush1.bf16.msra.mxu0 %v4543_v6  ;;  %1934 = vmatpush1.bf16.msra.mxu1 %v4869_v12 }
 0x36a   :  { %1894 = vmatprep.subr.bf16.mxu0 %v4550_v9  ;;  %1935 = vmatprep.subr.bf16.mxu1 %v4876_v51  ;;  %v4890_v9 = vld [vmem:[%s5425_s2 + $0x6c] ss:$16 sps:$4 sm:$0xff]  }
 0x36b   :  { %5662 = vst [vmem:[#allocation27_spill] sm:$0xff] %v4890_v9 }
 0x36d   :  { %1895 = vmatpush1.bf16.msra.mxu0 %v4557_v11  ;;  %1936 = vmatpush1.bf16.msra.mxu1 %v4883_v22  ;;  %v4897_v11 = vld [vmem:[%s5425_s2 + $0x68] ss:$16 sps:$4 sm:$0xff]  }
 0x36e   :  { %1896 = vmatprep.subr.bf16.mxu0 %v4564_v15  ;;  %1937 = vmatprep.subr.bf16.mxu1 %v4890_v9  ;;  %5663 = vst [vmem:[#allocation28_spill] sm:$0xff] %v4897_v11  ;;  %v4904_v15 = vld [vmem:[%s5425_s2 + $0x4c] ss:$16 sps:$4 sm:$0xff]  }
 0x36f   :  { %5664 = vst [vmem:[#allocation29_spill] sm:$0xff] %v4904_v15 }
 0x371   :  { %1897 = vmatpush1.bf16.msra.mxu0 %v4571_v17  ;;  %1938 = vmatpush1.bf16.msra.mxu1 %v4897_v11  ;;  %v4911_v17 = vld [vmem:[%s5425_s2 + $0x48] ss:$16 sps:$4 sm:$0xff]  }
 0x372   :  { %1898 = vmatprep.subr.bf16.mxu0 %v4578_v21  ;;  %1939 = vmatprep.subr.bf16.mxu1 %v4904_v15  ;;  %5665 = vst [vmem:[#allocation30_spill] sm:$0xff] %v4911_v17  ;;  %v4918_v21 = vld [vmem:[%s5425_s2 + $0x2c] ss:$16 sps:$4 sm:$0xff]  }
 0x373   :  { %5666 = vst [vmem:[#allocation31_spill] sm:$0xff] %v4918_v21 }
 0x375   :  { %1899 = vmatpush1.bf16.msra.mxu0 %v4585_v45  ;;  %1940 = vmatpush1.bf16.msra.mxu1 %v4911_v17  ;;  %v4925_v45 = vld [vmem:[%s5425_s2 + $0x28] ss:$16 sps:$4 sm:$0xff]  }
 0x376   :  { %1900 = vmatprep.subr.bf16.mxu0 %v4592_v31  ;;  %1941 = vmatprep.subr.bf16.mxu1 %v4918_v21  ;;  %5667 = vst [vmem:[#allocation32_spill] sm:$0xff] %v4925_v45  ;;  %v4932_v31 = vld [vmem:[%s5425_s2 + $0xc] ss:$16 sps:$4 sm:$0xff]  }
 0x377   :  { %5668 = vst [vmem:[#allocation33_spill] sm:$0xff] %v4932_v31 }
 0x379   :  { %1901 = vmatpush1.bf16.msra.mxu0 %v4599_v33  ;;  %1942 = vmatpush1.bf16.msra.mxu1 %v4925_v45  ;;  %v4939_v33 = vld [vmem:[%s5425_s2 + $0x8] ss:$16 sps:$4 sm:$0xff]  }
 0x37a   :  { %1902 = vmatprep.subr.bf16.mxu0 %v4606_v5  ;;  %1943 = vmatprep.subr.bf16.mxu1 %v4932_v31  ;;  %5669 = vst [vmem:[#allocation34_spill] sm:$0xff] %v4939_v33  ;;  %v4946_v5 = vld [vmem:[%s5426_s3 + $0xec] ss:$16 sps:$4 sm:$0xff]  }
 0x37b   :  { %5670 = vst [vmem:[#allocation44_spill] sm:$0xff] %v4946_v5 }
 0x37d   :  { %1903 = vmatpush1.bf16.msra.mxu0 %v4613_v46  ;;  %1944 = vmatpush1.bf16.msra.mxu1 %v4939_v33 }
 0x37e   :  { %2002 = vmatprep.subr.bf16.mxu0 %v4620_v58  ;;  %2043 = vmatprep.subr.bf16.mxu1 %v4946_v5 }
 0x3fd   :  { %v1671_v45 = vpop.f32.mrf.mxu0  ;;  %v1712_v31 = vpop.f32.mrf.mxu1 }
 0x3fe   :  { %v1723_v21 = vrot.slane %v1671_v45, 2  ;;  %v1725_v59 = vrot.slane %v1712_v31, 2  ;;  %v1755_v31 = vrot.slane %v4631_v35, 6 }
 0x3ff   :  { %v1673_v46 = vpop.f32.mrf.mxu0  ;;  %v1714_v17 = vpop.f32.mrf.mxu1 }
 0x400   :  { %v1731_v15 = vadd.f32 %v1723_v21, %v4351_v18  ;;  %v1724_v11 = vrot.slane %v1673_v46, 2  ;;  %v1726_v13 = vrot.slane %v1714_v17, 2  ;;  %v1733_v55 = vadd.f32 %v1725_v59, %v5653_v43 }
 0x401   :  { %v1675_v9 = vpop.f32.mrf.mxu0  ;;  %v1716_v22 = vpop.f32.mrf.mxu1 }
 0x402   :  { %v3145_v33 = vmul.f32 -1.442695, %v1731_v15  ;;  %v1732_v58 = vadd.f32 %v1724_v11, %v4346_v50  ;;  %v1734_v5 = vadd.f32 %v1726_v13, %v5652_v30 }
 0x403   :  { %v1676_v51 = vpop.f32.mrf.mxu0  ;;  %v1717_v12 = vpop.f32.mrf.mxu1 }
 0x404   :  { %3425 = vpow2.f32 %v3145_v33  ;;  %v3146_v6 = vmul.f32 -1.442695, %v1732_v58  ;;  %v3147_v45 = vmul.f32 -1.442695, %v1734_v5 }
 0x406   :  { %3427 = vpow2.f32 %v3146_v6 }
 0x407   :  { %3429 = vpow2.f32 %v3147_v45 }
 0x411   :  { %v3426_v10 = vpop.eup %3425 }
 0x412   :  { %v1738_v18 = vadd.f32 1.0, %v3426_v10 }
 0x413   :  { %v3428_v21 = vpop.eup %3427 }
 0x414   :  { %3431 = vrcp.f32 %v1738_v18  ;;  %v1744_v9 = vadd.f32 1.0, %v3428_v21  ;;  %v3430_v50 = vpop.eup %3429 }
 0x415   :  { %3433 = vtanh.f32 %v1733_v55  ;;  %v1751_v13 = vadd.f32 1.0, %v3430_v50 }
 0x416   :  { %3435 = vrcp.f32 %v1744_v9 }
 0x420   :  { %v1800_v11 = vpop.f32.mrf.mxu0  ;;  %v1841_v15 = vpop.f32.mrf.mxu1 }
 0x421   :  { %v3432_v33 = vpop.eup %3431  ;;  %v1848_v6 = vadd.f32 %v1800_v11, %v4364_v56 }
 0x422   :  { %v3434_v17 = vpop.eup %3433  ;;  %v1802_v5 = vpop.f32.mrf.mxu0 }
 0x423   :  { %v1843_v46 = vpop.f32.mrf.mxu1  ;;  %v3436_v58 = vpop.eup %3435  ;;  %v3148_v59 = vmul.f32 -1.442695, %v1848_v6  ;;  %v1849_v30 = vadd.f32 %v1802_v5, %v4361_v37  ;;  %v1758_v43 = vmul.f32 %v3434_v17, %v3432_v33  ;;  %v1850_v37 = vadd.f32 %v1841_v15, %v4372_v29 }
 0x424   :  { %v1757_v10 = vmul.f32 %v3436_v58, %v1755_v31  ;;  %v1804_v55 = vpop.f32.mrf.mxu0  ;;  %v1851_v35 = vadd.f32 %v1843_v46, %v4375_v48  ;;  %v1872_v15 = vrot.slane %v4714_v39, 2 }
 0x425   :  { %v1845_v12 = vpop.f32.mrf.mxu1  ;;  %3437 = vpow2.f32 %v3148_v59  ;;  %v3149_v51 = vmul.f32 -1.442695, %v1849_v30 }
 0x426   :  { %v4956_v22 = vadd.f32 %v1758_v43, %v1757_v10  ;;  %v1805_v45 = vpop.f32.mrf.mxu0  ;;  %v3150_v18 = vmul.f32 -1.442695, %v1851_v35  ;;  %v5671_v12 = vld [vmem:[#allocation18_spill] sm:$0xff] }
 0x427   :  { %v1846_v56 = vpop.f32.mrf.mxu1  ;;  %3439 = vpow2.f32 %v3149_v51  ;;  %v5672_v51 = vld [vmem:[#allocation19_spill] sm:$0xff] }
 0x428   :  { %3441 = vrcp.f32 %v1751_v13 }
 0x429   :  { %3443 = vtanh.f32 %v4956_v22 }
 0x42a   :  { %3445 = vpow2.f32 %v3150_v18  ;;  %v5673_v18 = vld [vmem:[#allocation21_spill] sm:$0xff] }
 0x432   :  { %v3438_v21 = vpop.eup %3437 }
 0x433   :  { %v1855_v9 = vadd.f32 1.0, %v3438_v21  ;;  %v5674_v21 = vld [vmem:[#allocation5_spill] sm:$0xff] }
 0x434   :  { %v3440_v50 = vpop.eup %3439 }
 0x435   :  { %v3442_v11 = vpop.eup %3441  ;;  %3447 = vrcp.f32 %v1855_v9  ;;  %v1861_v33 = vadd.f32 1.0, %v3440_v50  ;;  %v5676_v9 = vld [vmem:[#allocation20_spill] sm:$0xff]  ;;  %v5677_v50 = vld [vmem:[#allocation23_spill] sm:$0xff] }
 0x436   :  { %v3444_v6 = vpop.eup %3443  ;;  %3449 = vtanh.f32 %v1850_v37  ;;  %v5675_v37 = vld [vmem:[#allocation22_spill] sm:$0xff] }
 0x437   :  { %3451 = vrcp.f32 %v1861_v33  ;;  %v1761_v17 = vmul.f32 %v3444_v6, %v3442_v11  ;;  %v3446_v29 = vpop.eup %3445  ;;  %v5678_v11 = vld [vmem:[#allocation6_spill] sm:$0xff]  ;;  %v5679_v33 = vld [vmem:[#allocation24_spill] sm:$0xff]  ;;  %v5680_v6 = vld [vmem:[#allocation7_spill] sm:$0xff] }
 0x438   :  { %v1868_v30 = vadd.f32 1.0, %v3446_v29  ;;  %v5686_v29 = vld [vmem:[#allocation10_spill] sm:$0xff] }
 0x439   :  { %v1880_v31 = vrot.slane %v1761_v17, 6  ;;  %v1884_v5 = vpack.c.bf16 %v1761_v17, %v1761_v17  ;;  %v5681_v17 = vld [vmem:[#allocation25_spill] sm:$0xff] }
 0x43a   :  { %3453 = vrcp.f32 %v1868_v30  ;;  %v5691_v30 = vld [vmem:[#allocation30_spill] sm:$0xff] }
 0x43b   :  { %v1886_v58 = vrot.slane %v1884_v5, 3  ;;  %v1882_v59 = vadd.f32 %v1880_v31, %v4833_v4  ;;  %v5682_v31 = vld [vmem:[#allocation8_spill] sm:$0xff]  ;;  %v5683_v5 = vld [vmem:[#allocation26_spill] sm:$0xff] }
 0x43d   :  { %1921 = vmatmul.mubr.bf16.vlgmr.msra.gmra.mxu0 %v1886_v58  ;;  %1962 = vmatmul.mubr.bf16.vlgmr.msra.gmra.mxu1 %v1886_v58  ;;  %v5684_v58 = vld [vmem:[#allocation9_spill] sm:$0xff] }
 0x43e   :  { %2003 = vmatpush1.bf16.msra.mxu0 %v4642_v16  ;;  %2044 = vmatpush1.bf16.msra.mxu1 %v4648_v19 }
 0x43f   :  { %2004 = vmatprep.subr.bf16.mxu0 %v4654_v49  ;;  %2045 = vmatprep.subr.bf16.mxu1 %v4660_v57 }
 0x440   :  { %2034 = vmatprep.mubr.bf16.mxu0 %v5583_v14  ;;  %2075 = vmatprep.mubr.bf16.mxu1 %v5583_v14 }
 0x442   :  { %v3448_v48 = vpop.eup %3447  ;;  %2005 = vmatpush1.bf16.msra.mxu0 %v4668_v62  ;;  %2046 = vmatpush1.bf16.msra.mxu1 %v4674_v27 }
 0x443   :  { %v3450_v4 = vpop.eup %3449  ;;  %2006 = vmatprep.subr.bf16.mxu0 %v4680_v42  ;;  %2047 = vmatprep.subr.bf16.mxu1 %v4686_v40 }
 0x444   :  { %v3452_v46 = vpop.eup %3451  ;;  %v1875_v43 = vmul.f32 %v3450_v4, %v3448_v48  ;;  %v5687_v48 = vld [vmem:[#allocation28_spill] sm:$0xff]  ;;  %v5688_v4 = vld [vmem:[#allocation11_spill] sm:$0xff] }
 0x445   :  { %v1874_v10 = vmul.f32 %v3452_v46, %v1872_v15  ;;  %v5689_v15 = vld [vmem:[#allocation29_spill] sm:$0xff]  ;;  %v5690_v46 = vld [vmem:[#allocation12_spill] sm:$0xff] }
 0x446   :  { %2007 = vmatpush1.bf16.msra.mxu0 %v4693_v60  ;;  %2048 = vmatpush1.bf16.msra.mxu1 %v4699_v24 }
 0x447   :  { %v4975_v13 = vadd.f32 %v1875_v43, %v1874_v10  ;;  %2008 = vmatprep.subr.bf16.mxu0 %v4705_v32  ;;  %2049 = vmatprep.subr.bf16.mxu1 %v4711_v63  ;;  %v3454_v39 = vpop.eup %3453  ;;  %v5692_v43 = vld [vmem:[#allocation13_spill] sm:$0xff]  ;;  %v5693_v10 = vld [vmem:[#allocation31_spill] sm:$0xff] }
 0x449   :  { %3455 = vtanh.f32 %v4975_v13 }
 0x44a   :  { %2009 = vmatpush1.bf16.msra.mxu0 %v4719_v26  ;;  %2050 = vmatpush1.bf16.msra.mxu1 %v4725_v20 }
 0x44b   :  { %2010 = vmatprep.subr.bf16.mxu0 %v4731_v1  ;;  %2051 = vmatprep.subr.bf16.mxu1 %v4737_v28 }
 0x44e   :  { %2011 = vmatpush1.bf16.msra.mxu0 %v4744_v2  ;;  %2052 = vmatpush1.bf16.msra.mxu1 %v4750_v3 }
 0x44f   :  { %2012 = vmatprep.subr.bf16.mxu0 %v4756_v34  ;;  %2053 = vmatprep.subr.bf16.mxu1 %v4762_v36 }
 0x452   :  { %2013 = vmatpush1.bf16.msra.mxu0 %v4768_v38  ;;  %2054 = vmatpush1.bf16.msra.mxu1 %v4774_v47 }
 0x453   :  { %2014 = vmatprep.subr.bf16.mxu0 %v4780_v53  ;;  %2055 = vmatprep.subr.bf16.mxu1 %v4786_v25 }
 0x456   :  { %v3456_v55 = vpop.eup %3455  ;;  %2015 = vmatpush1.bf16.msra.mxu0 %v4792_v61  ;;  %2056 = vmatpush1.bf16.msra.mxu1 %v4798_v7 }
 0x457   :  { %2016 = vmatprep.subr.bf16.mxu0 %v5671_v12  ;;  %2057 = vmatprep.subr.bf16.mxu1 %v5672_v51  ;;  %v1878_v45 = vmul.f32 %v3456_v55, %v3454_v39  ;;  %v5694_v39 = vld [vmem:[#allocation14_spill] sm:$0xff]  ;;  %v5695_v55 = vld [vmem:[#allocation32_spill] sm:$0xff] }
 0x459   :  { %v4996_v56 = vadd.f32 %v1882_v59, %v1878_v45  ;;  %v2001_v35 = vpack.c.bf16 %v1878_v45, %v1878_v45  ;;  %v5685_v59 = vld [vmem:[#allocation27_spill] sm:$0xff] }
 0x45a   :  { %2017 = vmatpush1.bf16.msra.mxu0 %v5673_v18  ;;  %2058 = vmatpush1.bf16.msra.mxu1 %v4822_v54  ;;  %v5696_v45 = vld [vmem:[#allocation15_spill] sm:$0xff] }
 0x45b   :  { %2133 = vmatprep.subr.bf16.mxu0 %v4504_v41  ;;  %2174 = vmatprep.subr.bf16.mxu1 %v4829_v52 }
 0x45d   :  { %2035 = vmatmul.mubr.bf16.vlgmr.msra.gmra.mxu0 %v2001_v35  ;;  %2076 = vmatmul.mubr.bf16.vlgmr.msra.gmra.mxu1 %v2001_v35  ;;  %v5697_v35 = vld [vmem:[#allocation33_spill] sm:$0xff] }
 0x45e   :  { %2134 = vmatpush1.bf16.msra.mxu0 %v4513_v8  ;;  %2175 = vmatpush1.bf16.msra.mxu1 %v4839_v0 }
 0x45f   :  { %2135 = vmatprep.subr.bf16.mxu0 %v4520_v23  ;;  %2176 = vmatprep.subr.bf16.mxu1 %v4846_v44 }
 0x460   :  { %2165 = vmatprep.mubr.bf16.mxu0 %v5583_v14  ;;  %2206 = vmatprep.mubr.bf16.mxu1 %v5583_v14 }
 0x462   :  { %2136 = vmatpush1.bf16.msra.mxu0 %v5674_v21  ;;  %2177 = vmatpush1.bf16.msra.mxu1 %v5675_v37 }
 0x463   :  { %2137 = vmatprep.subr.bf16.mxu0 %v5676_v9  ;;  %2178 = vmatprep.subr.bf16.mxu1 %v5677_v50 }
 0x466   :  { %2138 = vmatpush1.bf16.msra.mxu0 %v5678_v11  ;;  %2179 = vmatpush1.bf16.msra.mxu1 %v5679_v33 }
 0x467   :  { %2139 = vmatprep.subr.bf16.mxu0 %v5680_v6  ;;  %2180 = vmatprep.subr.bf16.mxu1 %v5681_v17  ;;  %v5705_v6 = vld [vmem:[#allocation39_spill] sm:$0xff] }
 0x46a   :  { %2140 = vmatpush1.bf16.msra.mxu0 %v5682_v31  ;;  %2181 = vmatpush1.bf16.msra.mxu1 %v5683_v5 }
 0x46b   :  { %2141 = vmatprep.subr.bf16.mxu0 %v5684_v58  ;;  %2182 = vmatprep.subr.bf16.mxu1 %v5685_v59 }
 0x46e   :  { %2142 = vmatpush1.bf16.msra.mxu0 %v5686_v29  ;;  %2183 = vmatpush1.bf16.msra.mxu1 %v5687_v48  ;;  %v5698_v48 = vld [vmem:[#allocation16_spill] sm:$0xff]  ;;  %v5702_v29 = vld [vmem:[#allocation37_spill] sm:$0xff] }
 0x46f   :  { %2143 = vmatprep.subr.bf16.mxu0 %v5688_v4  ;;  %2184 = vmatprep.subr.bf16.mxu1 %v5689_v15  ;;  %v5699_v4 = vld [vmem:[#allocation34_spill] sm:$0xff]  ;;  %v5700_v15 = vld [vmem:[#allocation17_spill] sm:$0xff] }
 0x472   :  { %2144 = vmatpush1.bf16.msra.mxu0 %v5690_v46  ;;  %2185 = vmatpush1.bf16.msra.mxu1 %v5691_v30  ;;  %v5701_v46 = vld [vmem:[#allocation44_spill] sm:$0xff] }
 0x473   :  { %2145 = vmatprep.subr.bf16.mxu0 %v5692_v43  ;;  %2186 = vmatprep.subr.bf16.mxu1 %v5693_v10 }
 0x476   :  { %2146 = vmatpush1.bf16.msra.mxu0 %v5694_v39  ;;  %2187 = vmatpush1.bf16.msra.mxu1 %v5695_v55  ;;  %v5703_v55 = vld [vmem:[#allocation38_spill] sm:$0xff] }
 0x477   :  { %2147 = vmatprep.subr.bf16.mxu0 %v5696_v45  ;;  %2188 = vmatprep.subr.bf16.mxu1 %v5697_v35 }
 0x47a   :  { %2148 = vmatpush1.bf16.msra.mxu0 %v5698_v48  ;;  %2189 = vmatpush1.bf16.msra.mxu1 %v5699_v4  ;;  %v5704_v4 = vld [vmem:[#allocation40_spill] sm:$0xff] }
 0x47b   :  { %2262 = vmatprep.subr.bf16.mxu0 %v5700_v15  ;;  %2303 = vmatprep.subr.bf16.mxu1 %v5701_v46 }
 0x4fd   :  { %v1922_v30 = vpop.f32.mrf.mxu0  ;;  %v1963_v43 = vpop.f32.mrf.mxu1 }
 0x4fe   :  { %v1970_v10 = vadd.f32 %v1922_v30, %v5702_v29  ;;  %v1972_v46 = vadd.f32 %v1963_v43, %v5705_v6  ;;  %v5706_v43 = vld [vmem:[#allocation35_spill] sm:$0xff] }
 0x4ff   :  { %v1924_v59 = vpop.f32.mrf.mxu0  ;;  %v1965_v39 = vpop.f32.mrf.mxu1 }
 0x500   :  { %v3151_v58 = vmul.f32 -1.442695, %v1970_v10  ;;  %v1971_v5 = vadd.f32 %v1924_v59, %v5703_v55  ;;  %v1973_v15 = vadd.f32 %v1965_v39, %v5704_v4  ;;  %v1994_v39 = vrot.slane %v4956_v22, 6 }
 0x501   :  { %v1926_v45 = vpop.f32.mrf.mxu0  ;;  %v1967_v31 = vpop.f32.mrf.mxu1 }
 0x502   :  { %3457 = vpow2.f32 %v3151_v58  ;;  %v3152_v35 = vmul.f32 -1.442695, %v1971_v5  ;;  %v3153_v11 = vmul.f32 -1.442695, %v1973_v15 }
 0x503   :  { %v1927_v48 = vpop.f32.mrf.mxu0  ;;  %v1968_v17 = vpop.f32.mrf.mxu1 }
 0x504   :  { %3459 = vpow2.f32 %v3152_v35 }
 0x505   :  { %3461 = vtanh.f32 %v1972_v46 }
 0x50f   :  { %v3458_v33 = vpop.eup %3457 }
 0x510   :  { %v1977_v50 = vadd.f32 1.0, %v3458_v33 }
 0x511   :  { %v3460_v30 = vpop.eup %3459 }
 0x512   :  { %3463 = vrcp.f32 %v1977_v50  ;;  %v1983_v10 = vadd.f32 1.0, %v3460_v30  ;;  %v3462_v58 = vpop.eup %3461 }
 0x513   :  { %3465 = vpow2.f32 %v3153_v11 }
 0x514   :  { %3467 = vrcp.f32 %v1983_v10  ;;  %v5707_v10 = vld [vmem:[#allocation36_spill] sm:$0xff] }
 0x51d   :  { %v2036_v59 = vpop.f32.mrf.mxu0  ;;  %v2077_v31 = vpop.f32.mrf.mxu1 }
 0x51e   :  { %v2088_v5 = vrot.slane %v2036_v59, 2 }
 0x51f   :  { %v3464_v48 = vpop.eup %3463  ;;  %v2038_v17 = vpop.f32.mrf.mxu0 }
 0x520   :  { %v2079_v45 = vpop.f32.mrf.mxu1  ;;  %v3466_v35 = vpop.eup %3465  ;;  %v2096_v6 = vadd.f32 %v2088_v5, %v5706_v43  ;;  %v2089_v15 = vrot.slane %v2038_v17, 2  ;;  %v1997_v50 = vmul.f32 %v3464_v48, %v3462_v58  ;;  %v5708_v5 = vld [vmem:[#allocation42_spill] sm:$0xff]  ;;  %v2090_v17 = vrot.slane %v2077_v31, 2 }
 0x521   :  { %v3468_v33 = vpop.eup %3467  ;;  %v2040_v4 = vpop.f32.mrf.mxu0  ;;  %v1990_v29 = vadd.f32 1.0, %v3466_v35  ;;  %v2091_v22 = vrot.slane %v2079_v45, 2 }
 0x522   :  { %v2081_v46 = vpop.f32.mrf.mxu1  ;;  %v1996_v30 = vmul.f32 %v3468_v33, %v1994_v39  ;;  %v3154_v11 = vmul.f32 -1.442695, %v2096_v6  ;;  %v2097_v55 = vadd.f32 %v2089_v15, %v5707_v10  ;;  %v5709_v6 = vld [vmem:[#allocation41_spill] sm:$0xff] }
 0x523   :  { %v2041_v9 = vpop.f32.mrf.mxu0  ;;  %v2099_v4 = vadd.f32 %v2091_v22, %v5708_v5  ;;  %v2098_v39 = vadd.f32 %v2090_v17, %v5709_v6 }
 0x524   :  { %v2082_v59 = vpop.f32.mrf.mxu1  ;;  %v5043_v37 = vadd.f32 %v1997_v50, %v1996_v30  ;;  %3469 = vpow2.f32 %v3154_v11  ;;  %v3155_v21 = vmul.f32 -1.442695, %v2097_v55  ;;  %v2120_v50 = vrot.slane %v4975_v13, 2 }
 0x525   :  { %v3156_v58 = vmul.f32 -1.442695, %v2099_v4 }
 0x526   :  { %3471 = vpow2.f32 %v3155_v21 }
 0x527   :  { %3473 = vrcp.f32 %v1990_v29 }
 0x528   :  { %3475 = vtanh.f32 %v5043_v37 }
 0x529   :  { %3477 = vpow2.f32 %v3156_v58 }
 0x531   :  { %v3470_v48 = vpop.eup %3469 }
 0x532   :  { %v2103_v15 = vadd.f32 1.0, %v3470_v48 }
 0x533   :  { %v3472_v35 = vpop.eup %3471 }
 0x534   :  { %v3474_v9 = vpop.eup %3473  ;;  %3479 = vrcp.f32 %v2103_v15  ;;  %v2109_v33 = vadd.f32 1.0, %v3472_v35 }
 0x535   :  { %v3476_v46 = vpop.eup %3475  ;;  %3481 = vtanh.f32 %v2098_v39 }
 0x536   :  { %3483 = vrcp.f32 %v2109_v33  ;;  %v2000_v21 = vmul.f32 %v3476_v46, %v3474_v9  ;;  %v5711_v9 = vld [vmem:[#allocation22_spill] sm:$0xff]  ;;  %v5712_v33 = vld [vmem:[#allocation20_spill] sm:$0xff]  ;;  %v5713_v46 = vld [vmem:[#allocation23_spill] sm:$0xff] }
 0x538   :  { %v2127_v29 = vadd.f32 %v2000_v21, %v4996_v56  ;;  %v2132_v55 = vpack.c.bf16 %v2000_v21, %v2000_v21  ;;  %v3478_v56 = vpop.eup %3477  ;;  %v5714_v21 = vld [vmem:[#allocation6_spill] sm:$0xff] }
 0x539   :  { %v2116_v11 = vadd.f32 1.0, %v3478_v56  ;;  %v5719_v56 = vld [vmem:[#allocation26_spill] sm:$0xff] }
 0x53a   :  { %2166 = vmatmul.mubr.bf16.vlgmr.msra.gmra.mxu0 %v2132_v55  ;;  %2207 = vmatmul.mubr.bf16.vlgmr.msra.gmra.mxu1 %v2132_v55  ;;  %v5718_v55 = vld [vmem:[#allocation8_spill] sm:$0xff] }
 0x53b   :  { %2263 = vmatpush1.bf16.msra.mxu0 %v4642_v16  ;;  %2304 = vmatpush1.bf16.msra.mxu1 %v4648_v19  ;;  %3485 = vrcp.f32 %v2116_v11  ;;  %v5724_v11 = vld [vmem:[#allocation11_spill] sm:$0xff] }
 0x53c   :  { %2264 = vmatprep.subr.bf16.mxu0 %v4654_v49  ;;  %2305 = vmatprep.subr.bf16.mxu1 %v4660_v57 }
 0x53d   :  { %2294 = vmatprep.mubr.bf16.mxu0 %v5583_v14  ;;  %2335 = vmatprep.mubr.bf16.mxu1 %v5583_v14 }
 0x53f   :  { %2265 = vmatpush1.bf16.msra.mxu0 %v4668_v62  ;;  %2306 = vmatpush1.bf16.msra.mxu1 %v4674_v27 }
 0x540   :  { %2266 = vmatprep.subr.bf16.mxu0 %v4680_v42  ;;  %2307 = vmatprep.subr.bf16.mxu1 %v4686_v40 }
 0x541   :  { %v3480_v31 = vpop.eup %3479 }
 0x542   :  { %v3482_v45 = vpop.eup %3481 }
 0x543   :  { %v3484_v30 = vpop.eup %3483  ;;  %2267 = vmatpush1.bf16.msra.mxu0 %v4693_v60  ;;  %2308 = vmatpush1.bf16.msra.mxu1 %v4699_v24  ;;  %v2123_v59 = vmul.f32 %v3482_v45, %v3480_v31  ;;  %v5720_v31 = vld [vmem:[#allocation9_spill] sm:$0xff]  ;;  %v5721_v45 = vld [vmem:[#allocation27_spill] sm:$0xff] }
 0x544   :  { %v2122_v22 = vmul.f32 %v3484_v30, %v2120_v50  ;;  %2268 = vmatprep.subr.bf16.mxu0 %v4705_v32  ;;  %2309 = vmatprep.subr.bf16.mxu1 %v4711_v63  ;;  %v5722_v50 = vld [vmem:[#allocation10_spill] sm:$0xff]  ;;  %v5723_v30 = vld [vmem:[#allocation28_spill] sm:$0xff] }
 0x546   :  { %v5064_v4 = vadd.f32 %v2123_v59, %v2122_v22  ;;  %v5725_v59 = vld [vmem:[#allocation29_spill] sm:$0xff]  ;;  %v5726_v22 = vld [vmem:[#allocation12_spill] sm:$0xff] }
 0x547   :  { %2269 = vmatpush1.bf16.msra.mxu0 %v4719_v26  ;;  %2310 = vmatpush1.bf16.msra.mxu1 %v4725_v20 }
 0x548   :  { %2270 = vmatprep.subr.bf16.mxu0 %v4731_v1  ;;  %2311 = vmatprep.subr.bf16.mxu1 %v4737_v28  ;;  %3487 = vtanh.f32 %v5064_v4  ;;  %v3486_v13 = vpop.eup %3485 }
 0x54b   :  { %2271 = vmatpush1.bf16.msra.mxu0 %v4744_v2  ;;  %2312 = vmatpush1.bf16.msra.mxu1 %v4750_v3 }
 0x54c   :  { %2272 = vmatprep.subr.bf16.mxu0 %v4756_v34  ;;  %2313 = vmatprep.subr.bf16.mxu1 %v4762_v36 }
 0x54f   :  { %2273 = vmatpush1.bf16.msra.mxu0 %v4768_v38  ;;  %2314 = vmatpush1.bf16.msra.mxu1 %v4774_v47 }
 0x550   :  { %2274 = vmatprep.subr.bf16.mxu0 %v4780_v53  ;;  %2315 = vmatprep.subr.bf16.mxu1 %v4786_v25 }
 0x553   :  { %2275 = vmatpush1.bf16.msra.mxu0 %v4792_v61  ;;  %2316 = vmatpush1.bf16.msra.mxu1 %v4798_v7 }
 0x554   :  { %2276 = vmatprep.subr.bf16.mxu0 %v5671_v12  ;;  %2317 = vmatprep.subr.bf16.mxu1 %v5672_v51 }
 0x555   :  { %v3488_v17 = vpop.eup %3487 }
 0x556   :  { %v2126_v58 = vmul.f32 %v3488_v17, %v3486_v13  ;;  %v5727_v13 = vld [vmem:[#allocation30_spill] sm:$0xff]  ;;  %v5728_v17 = vld [vmem:[#allocation13_spill] sm:$0xff] }
 0x557   :  { %2277 = vmatpush1.bf16.msra.mxu0 %v5673_v18  ;;  %2318 = vmatpush1.bf16.msra.mxu1 %v4822_v54 }
 0x558   :  { %v2129_v48 = vrot.slane %v2126_v58, 6  ;;  %v2258_v39 = vpack.c.bf16 %v2126_v58, %v2126_v58  ;;  %2399 = vmatprep.subr.bf16.mxu0 %v4504_v41  ;;  %2440 = vmatprep.subr.bf16.mxu1 %v4829_v52  ;;  %v5710_v41 = vld [vmem:[#allocation5_spill] sm:$0xff]  ;;  %v5729_v58 = vld [vmem:[#allocation31_spill] sm:$0xff] }
 0x55a   :  { %v5087_v15 = vadd.f32 %v2129_v48, %v2127_v29  ;;  %v2260_v35 = vrot.slane %v2258_v39, 3  ;;  %v5716_v29 = vld [vmem:[#allocation7_spill] sm:$0xff]  ;;  %v5730_v48 = vld [vmem:[#allocation14_spill] sm:$0xff]  ;;  %v5731_v39 = vld [vmem:[#allocation32_spill] sm:$0xff] }
 0x55c   :  { %2295 = vmatmul.mubr.bf16.vlgmr.msra.gmra.mxu0 %v2260_v35  ;;  %2336 = vmatmul.mubr.bf16.vlgmr.msra.gmra.mxu1 %v2260_v35  ;;  %v5732_v35 = vld [vmem:[#allocation15_spill] sm:$0xff] }
 0x55d   :  { %2400 = vmatpush1.bf16.msra.mxu0 %v4513_v8  ;;  %2441 = vmatpush1.bf16.msra.mxu1 %v4839_v0  ;;  %v5715_v8 = vld [vmem:[#allocation24_spill] sm:$0xff] }
 0x55e   :  { %2401 = vmatprep.subr.bf16.mxu0 %v4520_v23  ;;  %2442 = vmatprep.subr.bf16.mxu1 %v4846_v44  ;;  %v5717_v23 = vld [vmem:[#allocation25_spill] sm:$0xff] }
 0x55f   :  { %2431 = vmatprep.mubr.bf16.mxu0 %v5583_v14  ;;  %2472 = vmatprep.mubr.bf16.mxu1 %v5583_v14 }
 0x561   :  { %2402 = vmatpush1.bf16.msra.mxu0 %v5710_v41  ;;  %2443 = vmatpush1.bf16.msra.mxu1 %v5711_v9  ;;  %v5733_v41 = vld [vmem:[#allocation33_spill] sm:$0xff] }
 0x562   :  { %2403 = vmatprep.subr.bf16.mxu0 %v5712_v33  ;;  %2444 = vmatprep.subr.bf16.mxu1 %v5713_v46  ;;  %v5734_v33 = vld [vmem:[#allocation16_spill] sm:$0xff] }
 0x565   :  { %2404 = vmatpush1.bf16.msra.mxu0 %v5714_v21  ;;  %2445 = vmatpush1.bf16.msra.mxu1 %v5715_v8  ;;  %v5735_v21 = vld [vmem:[#allocation34_spill] sm:$0xff] }
 0x566   :  { %2405 = vmatprep.subr.bf16.mxu0 %v5716_v29  ;;  %2446 = vmatprep.subr.bf16.mxu1 %v5717_v23  ;;  %v5736_v29 = vld [vmem:[#allocation17_spill] sm:$0xff] }
 0x569   :  { %2406 = vmatpush1.bf16.msra.mxu0 %v5718_v55  ;;  %2447 = vmatpush1.bf16.msra.mxu1 %v5719_v56  ;;  %v5737_v55 = vld [vmem:[#allocation44_spill] sm:$0xff] }
 0x56a   :  { %2407 = vmatprep.subr.bf16.mxu0 %v5720_v31  ;;  %2448 = vmatprep.subr.bf16.mxu1 %v5721_v45  ;;  %v5740_v56 = vld [vmem:[#allocation40_spill] sm:$0xff] }
 0x56d   :  { %2408 = vmatpush1.bf16.msra.mxu0 %v5722_v50  ;;  %2449 = vmatpush1.bf16.msra.mxu1 %v5723_v30 }
 0x56e   :  { %2409 = vmatprep.subr.bf16.mxu0 %v5724_v11  ;;  %2450 = vmatprep.subr.bf16.mxu1 %v5725_v59 }
 0x571   :  { %2410 = vmatpush1.bf16.msra.mxu0 %v5726_v22  ;;  %2451 = vmatpush1.bf16.msra.mxu1 %v5727_v13 }
 0x572   :  { %2411 = vmatprep.subr.bf16.mxu0 %v5728_v17  ;;  %2452 = vmatprep.subr.bf16.mxu1 %v5729_v58 }
 0x575   :  { %2412 = vmatpush1.bf16.msra.mxu0 %v5730_v48  ;;  %2453 = vmatpush1.bf16.msra.mxu1 %v5731_v39  ;;  %v5738_v48 = vld [vmem:[#allocation37_spill] sm:$0xff] }
 0x576   :  { %2413 = vmatprep.subr.bf16.mxu0 %v5732_v35  ;;  %2454 = vmatprep.subr.bf16.mxu1 %v5733_v41  ;;  %v5739_v41 = vld [vmem:[#allocation38_spill] sm:$0xff] }
 0x579   :  { %2414 = vmatpush1.bf16.msra.mxu0 %v5734_v33  ;;  %2455 = vmatpush1.bf16.msra.mxu1 %v5735_v21 }
 0x57a   :  { %2528 = vmatprep.subr.bf16.mxu0 %v5736_v29  ;;  %2569 = vmatprep.subr.bf16.mxu1 %v5737_v55 }
 0x5fa   :  { %v2167_v31 = vpop.f32.mrf.mxu0  ;;  %v2208_v50 = vpop.f32.mrf.mxu1 }
 0x5fb   :  { %v2219_v11 = vrot.slane %v2167_v31, 6  ;;  %v2221_v55 = vrot.slane %v2208_v50, 6  ;;  %v5741_v31 = vld [vmem:[#allocation39_spill] sm:$0xff] }
 0x5fc   :  { %v2169_v22 = vpop.f32.mrf.mxu0  ;;  %v2210_v17 = vpop.f32.mrf.mxu1 }
 0x5fd   :  { %v2227_v58 = vadd.f32 %v2219_v11, %v5738_v48  ;;  %v2220_v39 = vrot.slane %v2169_v22, 6  ;;  %v2222_v29 = vrot.slane %v2210_v17, 6  ;;  %v2229_v8 = vadd.f32 %v2221_v55, %v5741_v31 }
 0x5fe   :  { %v2171_v13 = vpop.f32.mrf.mxu0  ;;  %v2212_v35 = vpop.f32.mrf.mxu1 }
 0x5ff   :  { %v3157_v59 = vmul.f32 -1.442695, %v2227_v58  ;;  %v2228_v30 = vadd.f32 %v2220_v39, %v5739_v41  ;;  %v2230_v23 = vadd.f32 %v2222_v29, %v5740_v56  ;;  %v2251_v35 = vrot.slane %v5043_v37, 6 }
 0x600   :  { %v2172_v33 = vpop.f32.mrf.mxu0  ;;  %v2213_v45 = vpop.f32.mrf.mxu1 }
 0x601   :  { %3489 = vpow2.f32 %v3157_v59  ;;  %v3158_v21 = vmul.f32 -1.442695, %v2228_v30  ;;  %v3159_v9 = vmul.f32 -1.442695, %v2230_v23 }
 0x603   :  { %3491 = vpow2.f32 %v3158_v21 }
 0x604   :  { %3493 = vtanh.f32 %v2229_v8 }
 0x60e   :  { %v3490_v46 = vpop.eup %3489 }
 0x60f   :  { %v2234_v11 = vadd.f32 1.0, %v3490_v46 }
 0x610   :  { %v3492_v22 = vpop.eup %3491 }
 0x611   :  { %3495 = vrcp.f32 %v2234_v11  ;;  %v2240_v13 = vadd.f32 1.0, %v3492_v22  ;;  %v3494_v59 = vpop.eup %3493 }
 0x612   :  { %3497 = vpow2.f32 %v3159_v9 }
 0x613   :  { %3499 = vrcp.f32 %v2240_v13 }
 0x61c   :  { %v2296_v58 = vpop.f32.mrf.mxu0  ;;  %v2337_v45 = vpop.f32.mrf.mxu1 }
 0x61d   :  { %v2348_v30 = vrot.slane %v2296_v58, 4 }
 0x61e   :  { %v3496_v39 = vpop.eup %3495  ;;  %v2298_v21 = vpop.f32.mrf.mxu0 }
 0x61f   :  { %v2339_v50 = vpop.f32.mrf.mxu1  ;;  %v3498_v17 = vpop.eup %3497  ;;  %v2356_v55 = vadd.f32 %v2348_v30, %v5706_v43  ;;  %v2349_v23 = vrot.slane %v2298_v21, 4  ;;  %v2254_v29 = vmul.f32 %v3496_v39, %v3494_v59  ;;  %v2350_v21 = vrot.slane %v2337_v45, 4 }
 0x620   :  { %v3500_v46 = vpop.eup %3499  ;;  %v2300_v33 = vpop.f32.mrf.mxu0  ;;  %v2247_v13 = vadd.f32 1.0, %v3498_v17  ;;  %v2351_v37 = vrot.slane %v2339_v50, 4 }
 0x621   :  { %v2341_v8 = vpop.f32.mrf.mxu1  ;;  %v2253_v11 = vmul.f32 %v3500_v46, %v2251_v35  ;;  %v3160_v9 = vmul.f32 -1.442695, %v2356_v55  ;;  %v2357_v22 = vadd.f32 %v2349_v23, %v5707_v10  ;;  %v2358_v35 = vadd.f32 %v2350_v21, %v5709_v6  ;;  %v3666_v21 = vld [vmem:[%s5425_s2] ss:$16 sps:$4 sm:$0xff]  }
 0x622   :  { %v2301_v31 = vpop.f32.mrf.mxu0  ;;  %v2359_v30 = vadd.f32 %v2351_v37, %v5708_v5  ;;  %v3665_v37 = vld [vmem:[%s5425_s2 + $0x4] ss:$16 sps:$4 sm:$0xff]  }
 0x623   :  { %v2342_v58 = vpop.f32.mrf.mxu1  ;;  %v5130_v56 = vadd.f32 %v2254_v29, %v2253_v11  ;;  %3501 = vpow2.f32 %v3160_v9  ;;  %v3161_v41 = vmul.f32 -1.442695, %v2357_v22  ;;  %v2380_v9 = vrot.slane %v5064_v4, 2  ;;  %v5751_v4 = vld [vmem:[#allocation31_spill] sm:$0xff] }
 0x624   :  { %v3162_v59 = vmul.f32 -1.442695, %v2359_v30  ;;  %v5752_v58 = vld [vmem:[#allocation32_spill] sm:$0xff]  ;;  %v5753_v30 = vld [vmem:[#allocation33_spill] sm:$0xff] }
 0x625   :  { %3503 = vpow2.f32 %v3161_v41 }
 0x626   :  { %3505 = vrcp.f32 %v2247_v13  ;;  %v3664_v13 = vld [vmem:[%s5425_s2 + $0x20] ss:$16 sps:$4 sm:$0xff]  }
 0x627   :  { %3507 = vtanh.f32 %v5130_v56 }
 0x628   :  { %3509 = vpow2.f32 %v3162_v59  ;;  %v5754_v59 = vld [vmem:[#allocation34_spill] sm:$0xff] }
 0x630   :  { %v3502_v39 = vpop.eup %3501 }
 0x631   :  { %v2363_v55 = vadd.f32 1.0, %v3502_v39  ;;  %v3667_v39 = vld [vmem:[%s5426_s3 + $0xe4] ss:$16 sps:$4 sm:$0xff]  }
 0x632   :  { %v3504_v17 = vpop.eup %3503 }
 0x633   :  { %v3506_v31 = vpop.eup %3505  ;;  %3511 = vrcp.f32 %v2363_v55  ;;  %v2369_v23 = vadd.f32 1.0, %v3504_v17 }
 0x634   :  { %v3508_v46 = vpop.eup %3507  ;;  %3513 = vtanh.f32 %v2358_v35  ;;  %v5755_v35 = vld [vmem:[#allocation44_spill] sm:$0xff] }
 0x635   :  { %3515 = vrcp.f32 %v2369_v23  ;;  %v2257_v41 = vmul.f32 %v3508_v46, %v3506_v31  ;;  %v3510_v45 = vpop.eup %3509 }
 0x637   :  { %v2388_v50 = vrot.slane %v2257_v41, 2  ;;  %v2395_v33 = vpack.c.bf16 %v2257_v41, %v2257_v41 }
 0x639   :  { %v2390_v8 = vadd.f32 %v2388_v50, %v5087_v15  ;;  %v2397_v29 = vrot.slane %v2395_v33, 1 }
 0x63b   :  { %2432 = vmatmul.mubr.bf16.vlgmr.msra.gmra.mxu0 %v2397_v29  ;;  %2473 = vmatmul.mubr.bf16.vlgmr.msra.gmra.mxu1 %v2397_v29 }
 0x63c   :  { %2529 = vmatpush1.bf16.msra.mxu0 %v4642_v16  ;;  %2570 = vmatpush1.bf16.msra.mxu1 %v4648_v19  ;;  %v2376_v19 = vadd.f32 1.0, %v3510_v45  ;;  %v5756_v45 = vld [vmem:[#allocation38_spill] sm:$0xff] }
 0x63d   :  { %2530 = vmatprep.subr.bf16.mxu0 %v4654_v49  ;;  %2571 = vmatprep.subr.bf16.mxu1 %v4660_v57 }
 0x63e   :  { %2560 = vmatprep.mubr.bf16.mxu0 %v5583_v14  ;;  %2601 = vmatprep.mubr.bf16.mxu1 %v5583_v14  ;;  %3517 = vrcp.f32 %v2376_v19 }
 0x640   :  { %v3512_v11 = vpop.eup %3511  ;;  %2531 = vmatpush1.bf16.msra.mxu0 %v4668_v62  ;;  %2572 = vmatpush1.bf16.msra.mxu1 %v4674_v27 }
 0x641   :  { %v3514_v15 = vpop.eup %3513  ;;  %2532 = vmatprep.subr.bf16.mxu0 %v4680_v42  ;;  %2573 = vmatprep.subr.bf16.mxu1 %v4686_v40 }
 0x642   :  { %v3516_v16 = vpop.eup %3515  ;;  %v2383_v49 = vmul.f32 %v3514_v15, %v3512_v11 }
 0x643   :  { %v2382_v57 = vmul.f32 %v3516_v16, %v2380_v9 }
 0x644   :  { %2533 = vmatpush1.bf16.msra.mxu0 %v4693_v60  ;;  %2574 = vmatpush1.bf16.msra.mxu1 %v4699_v24 }
 0x645   :  { %v5149_v22 = vadd.f32 %v2383_v49, %v2382_v57  ;;  %2534 = vmatprep.subr.bf16.mxu0 %v4705_v32  ;;  %2575 = vmatprep.subr.bf16.mxu1 %v4711_v63  ;;  %v3651_v63 = vld [vmem:[%s5425_s2 + $0xe4] ss:$16 sps:$4 sm:$0xff]   ;;  %v5757_v49 = vld [vmem:[#allocation40_spill] sm:$0xff] }
 0x647   :  { %3519 = vtanh.f32 %v5149_v22 }
 0x648   :  { %2535 = vmatpush1.bf16.msra.mxu0 %v4719_v26  ;;  %2576 = vmatpush1.bf16.msra.mxu1 %v4725_v20  ;;  %v3652_v26 = vld [vmem:[%s5425_s2 + $0xe0] ss:$16 sps:$4 sm:$0xff]   ;;  %v3653_v20 = vld [vmem:[%s5425_s2 + $0xc4] ss:$16 sps:$4 sm:$0xff]  }
 0x649   :  { %2536 = vmatprep.subr.bf16.mxu0 %v4731_v1  ;;  %2577 = vmatprep.subr.bf16.mxu1 %v4737_v28  ;;  %v3654_v1 = vld [vmem:[%s5425_s2 + $0xc0] ss:$16 sps:$4 sm:$0xff]  }
 0x64a   :  { %v5742_v28 = vld [vmem:[#allocation22_spill] sm:$0xff] }
 0x64b   :  { %v3518_v62 = vpop.eup %3517 }
 0x64c   :  { %2537 = vmatpush1.bf16.msra.mxu0 %v4744_v2  ;;  %2578 = vmatpush1.bf16.msra.mxu1 %v4750_v3  ;;  %v3655_v2 = vld [vmem:[%s5425_s2 + $0xa4] ss:$16 sps:$4 sm:$0xff]  }
 0x64d   :  { %2538 = vmatprep.subr.bf16.mxu0 %v4756_v34  ;;  %2579 = vmatprep.subr.bf16.mxu1 %v4762_v36  ;;  %v5743_v3 = vld [vmem:[#allocation23_spill] sm:$0xff]  ;;  %v5744_v36 = vld [vmem:[#allocation24_spill] sm:$0xff] }
 0x64e   :  { %v3656_v34 = vld [vmem:[%s5425_s2 + $0xa0] ss:$16 sps:$4 sm:$0xff]  }
 0x650   :  { %2539 = vmatpush1.bf16.msra.mxu0 %v4768_v38  ;;  %2580 = vmatpush1.bf16.msra.mxu1 %v4774_v47  ;;  %v3657_v38 = vld [vmem:[%s5425_s2 + $0x84] ss:$16 sps:$4 sm:$0xff]  }
 0x651   :  { %2540 = vmatprep.subr.bf16.mxu0 %v4780_v53  ;;  %2581 = vmatprep.subr.bf16.mxu1 %v4786_v25  ;;  %v5745_v47 = vld [vmem:[#allocation25_spill] sm:$0xff]  ;;  %v5746_v25 = vld [vmem:[#allocation26_spill] sm:$0xff] }
 0x652   :  { %v3658_v53 = vld [vmem:[%s5425_s2 + $0x80] ss:$16 sps:$4 sm:$0xff]  }
 0x654   :  { %v3520_v27 = vpop.eup %3519  ;;  %2541 = vmatpush1.bf16.msra.mxu0 %v4792_v61  ;;  %2582 = vmatpush1.bf16.msra.mxu1 %v4798_v7  ;;  %v3659_v61 = vld [vmem:[%s5425_s2 + $0x64] ss:$16 sps:$4 sm:$0xff]  }
 0x655   :  { %2542 = vmatprep.subr.bf16.mxu0 %v5671_v12  ;;  %2583 = vmatprep.subr.bf16.mxu1 %v5672_v51  ;;  %v2386_v42 = vmul.f32 %v3520_v27, %v3518_v62  ;;  %v5747_v7 = vld [vmem:[#allocation27_spill] sm:$0xff]  ;;  %v5750_v51 = vld [vmem:[#allocation30_spill] sm:$0xff] }
 0x656   :  { %v3662_v12 = vld [vmem:[%s5425_s2 + $0x40] ss:$16 sps:$4 sm:$0xff]  }
 0x657   :  { %v2392_v40 = vrot.slane %v2386_v42, 4  ;;  %v2524_v60 = vpack.c.bf16 %v2386_v42, %v2386_v42 }
 0x658   :  { %2543 = vmatpush1.bf16.msra.mxu0 %v5673_v18  ;;  %2584 = vmatpush1.bf16.msra.mxu1 %v4822_v54  ;;  %v3660_v54 = vld [vmem:[%s5425_s2 + $0x60] ss:$16 sps:$4 sm:$0xff]   ;;  %v3663_v18 = vld [vmem:[%s5425_s2 + $0x24] ss:$16 sps:$4 sm:$0xff]  }
 0x659   :  { %v5172_v24 = vadd.f32 %v2392_v40, %v2390_v8  ;;  %v2526_v32 = vrot.slane %v2524_v60, 2  ;;  %2665 = vmatprep.subr.bf16.mxu0 %v3651_v63  ;;  %2706 = vmatprep.subr.bf16.mxu1 %v4829_v52  ;;  %v5748_v52 = vld [vmem:[#allocation28_spill] sm:$0xff]  ;;  %v5758_v40 = vld [vmem:[#allocation39_spill] sm:$0xff] }
 0x65b   :  { %2561 = vmatmul.mubr.bf16.vlgmr.msra.gmra.mxu0 %v2526_v32  ;;  %2602 = vmatmul.mubr.bf16.vlgmr.msra.gmra.mxu1 %v2526_v32 }
 0x65c   :  { %2666 = vmatpush1.bf16.msra.mxu0 %v3652_v26  ;;  %2707 = vmatpush1.bf16.msra.mxu1 %v4839_v0  ;;  %v3661_v0 = vld [vmem:[%s5425_s2 + $0x44] ss:$16 sps:$4 sm:$0xff]  }
 0x65d   :  { %2667 = vmatprep.subr.bf16.mxu0 %v3653_v20  ;;  %2708 = vmatprep.subr.bf16.mxu1 %v4846_v44  ;;  %v5749_v44 = vld [vmem:[#allocation29_spill] sm:$0xff] }
 0x65e   :  { %2697 = vmatprep.mubr.bf16.mxu0 %v5583_v14  ;;  %2738 = vmatprep.mubr.bf16.mxu1 %v5583_v14 }
 0x660   :  { %2668 = vmatpush1.bf16.msra.mxu0 %v3654_v1  ;;  %2709 = vmatpush1.bf16.msra.mxu1 %v5742_v28 }
 0x661   :  { %2669 = vmatprep.subr.bf16.mxu0 %v3655_v2  ;;  %2710 = vmatprep.subr.bf16.mxu1 %v5743_v3 }
 0x664   :  { %2670 = vmatpush1.bf16.msra.mxu0 %v3656_v34  ;;  %2711 = vmatpush1.bf16.msra.mxu1 %v5744_v36 }
 0x665   :  { %2671 = vmatprep.subr.bf16.mxu0 %v3657_v38  ;;  %2712 = vmatprep.subr.bf16.mxu1 %v5745_v47 }
 0x668   :  { %2672 = vmatpush1.bf16.msra.mxu0 %v3658_v53  ;;  %2713 = vmatpush1.bf16.msra.mxu1 %v5746_v25 }
 0x669   :  { %2673 = vmatprep.subr.bf16.mxu0 %v3659_v61  ;;  %2714 = vmatprep.subr.bf16.mxu1 %v5747_v7  ;;  %v2517_v7 = vrot.slane %v5130_v56, 6 }
 0x66c   :  { %2674 = vmatpush1.bf16.msra.mxu0 %v3660_v54  ;;  %2715 = vmatpush1.bf16.msra.mxu1 %v5748_v52 }
 0x66d   :  { %2675 = vmatprep.subr.bf16.mxu0 %v3661_v0  ;;  %2716 = vmatprep.subr.bf16.mxu1 %v5749_v44 }
 0x670   :  { %2676 = vmatpush1.bf16.msra.mxu0 %v3662_v12  ;;  %2717 = vmatpush1.bf16.msra.mxu1 %v5750_v51 }
 0x671   :  { %2677 = vmatprep.subr.bf16.mxu0 %v3663_v18  ;;  %2718 = vmatprep.subr.bf16.mxu1 %v5751_v4 }
 0x674   :  { %2678 = vmatpush1.bf16.msra.mxu0 %v3664_v13  ;;  %2719 = vmatpush1.bf16.msra.mxu1 %v5752_v58 }
 0x675   :  { %2679 = vmatprep.subr.bf16.mxu0 %v3665_v37  ;;  %2720 = vmatprep.subr.bf16.mxu1 %v5753_v30 }
 0x678   :  { %2680 = vmatpush1.bf16.msra.mxu0 %v3666_v21  ;;  %2721 = vmatpush1.bf16.msra.mxu1 %v5754_v59 }
 0x679   :  { %2794 = vmatprep.subr.bf16.mxu0 %v3667_v39  ;;  %2835 = vmatprep.subr.bf16.mxu1 %v5755_v35 }
 0x6fb   :  { %v2433_v55 = vpop.f32.mrf.mxu0  ;;  %v2474_v17 = vpop.f32.mrf.mxu1 }
 0x6fc   :  { %v2485_v31 = vrot.slane %v2433_v55, 4  ;;  %v2487_v62 = vrot.slane %v2474_v17, 4 }
 0x6fd   :  { %v2435_v23 = vpop.f32.mrf.mxu0  ;;  %v2476_v46 = vpop.f32.mrf.mxu1 }
 0x6fe   :  { %v2493_v41 = vadd.f32 %v2485_v31, %v5738_v48  ;;  %v2486_v50 = vrot.slane %v2435_v23, 4  ;;  %v2488_v19 = vrot.slane %v2476_v46, 4  ;;  %v2495_v60 = vadd.f32 %v2487_v62, %v5758_v40 }
 0x6ff   :  { %v2437_v33 = vpop.f32.mrf.mxu0  ;;  %v2478_v8 = vpop.f32.mrf.mxu1 }
 0x700   :  { %v3163_v29 = vmul.f32 -1.442695, %v2493_v41  ;;  %v2494_v11 = vadd.f32 %v2486_v50, %v5756_v45  ;;  %v2496_v57 = vadd.f32 %v2488_v19, %v5757_v49  ;;  %v3672_v19 = vld [vmem:[%s5426_s3 + $0xc0] ss:$16 sps:$4 sm:$0xff]  }
 0x701   :  { %v2438_v15 = vpop.f32.mrf.mxu0  ;;  %v2479_v9 = vpop.f32.mrf.mxu1 }
 0x702   :  { %3521 = vpow2.f32 %v3163_v29  ;;  %v3164_v16 = vmul.f32 -1.442695, %v2494_v11  ;;  %v3165_v27 = vmul.f32 -1.442695, %v2496_v57  ;;  %v3668_v29 = vld [vmem:[%s5426_s3 + $0xe0] ss:$16 sps:$4 sm:$0xff]  }
 0x703   :  { %v3669_v11 = vld [vmem:[%s5426_s3 + $0xe8] ss:$16 sps:$4 sm:$0xff]   ;;  %v3670_v15 = vld [vmem:[%s5426_s3 + $0xc4] ss:$16 sps:$4 sm:$0xff]  }
 0x704   :  { %3523 = vpow2.f32 %v3164_v16  ;;  %v3673_v57 = vld [vmem:[%s5426_s3 + $0xc8] ss:$16 sps:$4 sm:$0xff]  }
 0x705   :  { %3525 = vpow2.f32 %v3165_v27  ;;  %v2646_v27 = vrot.slane %v5149_v22, 2  ;;  %v3677_v22 = vld [vmem:[%s5426_s3 + $0xa8] ss:$16 sps:$4 sm:$0xff]  }
 0x70f   :  { %v3522_v42 = vpop.eup %3521 }
 0x710   :  { %v2500_v32 = vadd.f32 1.0, %v3522_v42  ;;  %v3674_v42 = vld [vmem:[%s5426_s3 + $0xa4] ss:$16 sps:$4 sm:$0xff]  }
 0x711   :  { %v3524_v63 = vpop.eup %3523 }
 0x712   :  { %3527 = vrcp.f32 %v2500_v32  ;;  %v2506_v26 = vadd.f32 1.0, %v3524_v63  ;;  %v3526_v34 = vpop.eup %3525 }
 0x713   :  { %3529 = vtanh.f32 %v2495_v60  ;;  %v2513_v44 = vadd.f32 1.0, %v3526_v34  ;;  %v3681_v34 = vld [vmem:[%s5426_s3 + $0x88] ss:$16 sps:$4 sm:$0xff]  }
 0x714   :  { %3531 = vrcp.f32 %v2506_v26 }
 0x71b   :  { %v2562_v20 = vpop.f32.mrf.mxu0  ;;  %v2603_v1 = vpop.f32.mrf.mxu1 }
 0x71c   :  { %v2614_v28 = vrot.slane %v2562_v20, 6  ;;  %v2616_v30 = vrot.slane %v2603_v1, 6  ;;  %v3676_v20 = vld [vmem:[%s5426_s3 + $0xa0] ss:$16 sps:$4 sm:$0xff]  }
 0x71d   :  { %v2564_v2 = vpop.f32.mrf.mxu0  ;;  %v2605_v3 = vpop.f32.mrf.mxu1 }
 0x71e   :  { %v2622_v36 = vadd.f32 %v2614_v28, %v5706_v43  ;;  %v2615_v38 = vrot.slane %v2564_v2, 6  ;;  %v2617_v37 = vrot.slane %v2605_v3, 6  ;;  %v2624_v39 = vadd.f32 %v2616_v30, %v5709_v6  ;;  %v3678_v28 = vld [vmem:[%s5426_s3 + $0x84] ss:$16 sps:$4 sm:$0xff]   ;;  %v3679_v2 = vld [vmem:[%s5426_s3 + $0x8c] ss:$16 sps:$4 sm:$0xff]  }
 0x71f   :  { %v3528_v47 = vpop.eup %3527  ;;  %v2566_v53 = vpop.f32.mrf.mxu0  ;;  %v3680_v3 = vld [vmem:[%s5426_s3 + $0x80] ss:$16 sps:$4 sm:$0xff]  }
 0x720   :  { %v2607_v25 = vpop.f32.mrf.mxu1  ;;  %v3530_v61 = vpop.eup %3529  ;;  %v3166_v54 = vmul.f32 -1.442695, %v2622_v36  ;;  %v2623_v52 = vadd.f32 %v2615_v38, %v5707_v10  ;;  %v2625_v56 = vadd.f32 %v2617_v37, %v5708_v5  ;;  %v3682_v36 = vld [vmem:[%s5426_s3 + $0x64] ss:$16 sps:$4 sm:$0xff]   ;;  %v3683_v38 = vld [vmem:[%s5426_s3 + $0x6c] ss:$16 sps:$4 sm:$0xff]  }
 0x721   :  { %v3532_v0 = vpop.eup %3531  ;;  %v2567_v12 = vpop.f32.mrf.mxu0  ;;  %v2520_v18 = vmul.f32 %v3530_v61, %v3528_v47  ;;  %v3684_v47 = vld [vmem:[%s5426_s3 + $0x60] ss:$16 sps:$4 sm:$0xff]   ;;  %v3685_v53 = vld [vmem:[%s5426_s3 + $0x68] ss:$16 sps:$4 sm:$0xff]   ;;  %v3686_v25 = vld [vmem:[%s5426_s3 + $0x44] ss:$16 sps:$4 sm:$0xff]  }
 0x722   :  { %v2608_v51 = vpop.f32.mrf.mxu1  ;;  %v2519_v4 = vmul.f32 %v3532_v0, %v2517_v7  ;;  %3533 = vpow2.f32 %v3166_v54  ;;  %v3167_v13 = vmul.f32 -1.442695, %v2623_v52  ;;  %v3168_v21 = vmul.f32 -1.442695, %v2625_v56  ;;  %v3687_v61 = vld [vmem:[%s5426_s3 + $0x4c] ss:$16 sps:$4 sm:$0xff]  }
 0x723   :  { %v3688_v7 = vld [vmem:[%s5426_s3 + $0x40] ss:$16 sps:$4 sm:$0xff]   ;;  %v3689_v54 = vld [vmem:[%s5426_s3 + $0x48] ss:$16 sps:$4 sm:$0xff]   ;;  %v3690_v52 = vld [vmem:[%s5426_s3 + $0x24] ss:$16 sps:$4 sm:$0xff]  }
 0x724   :  { %v5251_v58 = vadd.f32 %v2520_v18, %v2519_v4  ;;  %3535 = vpow2.f32 %v3167_v13  ;;  %v3691_v0 = vld [vmem:[%s5426_s3 + $0x2c] ss:$16 sps:$4 sm:$0xff]   ;;  %v3692_v51 = vld [vmem:[%s5426_s3 + $0x20] ss:$16 sps:$4 sm:$0xff]   ;;  %v3693_v18 = vld [vmem:[%s5426_s3 + $0x28] ss:$16 sps:$4 sm:$0xff]  }
 0x725   :  { %3537 = vrcp.f32 %v2513_v44  ;;  %v3694_v4 = vld [vmem:[%s5426_s3 + $0x4] ss:$16 sps:$4 sm:$0xff]   ;;  %v3695_v13 = vld [vmem:[%s5426_s3 + $0xc] ss:$16 sps:$4 sm:$0xff]  }
 0x726   :  { %3539 = vtanh.f32 %v5251_v58 }
 0x727   :  { %3541 = vpow2.f32 %v3168_v21  ;;  %v3696_v21 = vld [vmem:[%s5426_s3] ss:$16 sps:$4 sm:$0xff]  }
 0x72f   :  { %v3534_v59 = vpop.eup %3533 }
 0x730   :  { %v2629_v35 = vadd.f32 1.0, %v3534_v59  ;;  %v3697_v59 = vld [vmem:[%s5426_s3 + $0x8] ss:$16 sps:$4 sm:$0xff]  }
 0x731   :  { %v3536_v55 = vpop.eup %3535 }
 0x732   :  { %v3538_v17 = vpop.eup %3537  ;;  %3543 = vrcp.f32 %v2629_v35  ;;  %v2635_v31 = vadd.f32 1.0, %v3536_v55  ;;  %v3721_v55 = vmov 0.0  }
 0x733   :  { %v3540_v23 = vpop.eup %3539  ;;  %3545 = vtanh.f32 %v2624_v39 }
 0x734   :  { %3547 = vrcp.f32 %v2635_v31  ;;  %v2523_v46 = vmul.f32 %v3540_v23, %v3538_v17  ;;  %v3542_v9 = vpop.eup %3541  ;;  %v2928_v17 = vld [vmem:[%s5429_s6 + $0x78] sm:$0xff]  ;;  %v2927_v31 = vld [vmem:[%s5429_s6 + $0x70] sm:$0xff]  ;;  %v2926_v23 = vld [vmem:[%s5429_s6 + $0x68] sm:$0xff] }
 0x735   :  { %v2642_v32 = vadd.f32 1.0, %v3542_v9  ;;  %v2916_v9 = vld [vmem:[%s5429_s6 + $0x18] sm:$0xff] }
 0x736   :  { %v2654_v41 = vrot.slane %v2523_v46, 4  ;;  %v2661_v50 = vpack.c.bf16 %v2523_v46, %v2523_v46  ;;  %v2925_v46 = vld [vmem:[%s5429_s6 + $0x60] sm:$0xff] }
 0x737   :  { %3549 = vrcp.f32 %v2642_v32 }
 0x738   :  { %v5257_v33 = vadd.f32 %v2654_v41, %v5172_v24  ;;  %v2663_v8 = vrot.slane %v2661_v50, 2  ;;  %v3671_v24 = vld [vmem:[%s5426_s3 + $0xcc] ss:$16 sps:$4 sm:$0xff]   ;;  %v2923_v50 = vld [vmem:[%s5429_s6 + $0x50] sm:$0xff] }
 0x739   :  { %v2924_v41 = vld [vmem:[%s5429_s6 + $0x58] sm:$0xff] }
 0x73a   :  { %2698 = vmatmul.mubr.bf16.vlgmr.msra.gmra.mxu0 %v2663_v8  ;;  %2739 = vmatmul.mubr.bf16.vlgmr.msra.gmra.mxu1 %v2663_v8  ;;  %v2921_v8 = vld [vmem:[%s5429_s6 + $0x40] sm:$0xff] }
 0x73b   :  { %2795 = vmatpush1.bf16.msra.mxu0 %v3668_v29  ;;  %2836 = vmatpush1.bf16.msra.mxu1 %v3669_v11  ;;  %v2920_v29 = vld [vmem:[%s5429_s6 + $0x38] sm:$0xff]  ;;  %v2919_v11 = vld [vmem:[%s5429_s6 + $0x30] sm:$0xff] }
 0x73c   :  { %2796 = vmatprep.subr.bf16.mxu0 %v3670_v15  ;;  %2837 = vmatprep.subr.bf16.mxu1 %v3671_v24  ;;  %v2918_v15 = vld [vmem:[%s5429_s6 + $0x28] sm:$0xff]  ;;  %v2917_v24 = vld [vmem:[%s5429_s6 + $0x20] sm:$0xff] }
 0x73d   :  { %2826 = vmatprep.mubr.bf16.mxu0 %v5583_v14  ;;  %2867 = vmatprep.mubr.bf16.mxu1 %v5583_v14  ;;  %v3675_v14 = vld [vmem:[%s5426_s3 + $0xac] ss:$16 sps:$4 sm:$0xff]  }
 0x73f   :  { %v3544_v16 = vpop.eup %3543  ;;  %2797 = vmatpush1.bf16.msra.mxu0 %v3672_v19  ;;  %2838 = vmatpush1.bf16.msra.mxu1 %v3673_v57  ;;  %v2914_v19 = vld [vmem:[%s5429_s6 + $0x8] sm:$0xff]  ;;  %v2913_v57 = vld [vmem:[%s5429_s6] sm:$0xff] }
 0x740   :  { %v3546_v62 = vpop.eup %3545  ;;  %2798 = vmatprep.subr.bf16.mxu0 %v3674_v42  ;;  %2839 = vmatprep.subr.bf16.mxu1 %v3675_v14 }
 0x741   :  { %v3548_v60 = vpop.eup %3547  ;;  %v2649_v63 = vmul.f32 %v3546_v62, %v3544_v16  ;;  %v2915_v16 = vld [vmem:[%s5429_s6 + $0x10] sm:$0xff] }
 0x742   :  { %v2648_v26 = vmul.f32 %v3548_v60, %v2646_v27 }
 0x743   :  { %2799 = vmatpush1.bf16.msra.mxu0 %v3676_v20  ;;  %2840 = vmatpush1.bf16.msra.mxu1 %v3677_v22 }
 0x744   :  { %v5292_v1 = vadd.f32 %v2649_v63, %v2648_v26  ;;  %2800 = vmatprep.subr.bf16.mxu0 %v3678_v28  ;;  %2841 = vmatprep.subr.bf16.mxu1 %v3679_v2  ;;  %v3550_v44 = vpop.eup %3549 }
 0x746   :  { %3551 = vtanh.f32 %v5292_v1 }
 0x747   :  { %2801 = vmatpush1.bf16.msra.mxu0 %v3680_v3  ;;  %2842 = vmatpush1.bf16.msra.mxu1 %v3681_v34 }
 0x748   :  { %2802 = vmatprep.subr.bf16.mxu0 %v3682_v36  ;;  %2843 = vmatprep.subr.bf16.mxu1 %v3683_v38 }
 0x74b   :  { %2803 = vmatpush1.bf16.msra.mxu0 %v3684_v47  ;;  %2844 = vmatpush1.bf16.msra.mxu1 %v3685_v53 }
 0x74c   :  { %2804 = vmatprep.subr.bf16.mxu0 %v3686_v25  ;;  %2845 = vmatprep.subr.bf16.mxu1 %v3687_v61 }
 0x74f   :  { %2805 = vmatpush1.bf16.msra.mxu0 %v3688_v7  ;;  %2846 = vmatpush1.bf16.msra.mxu1 %v3689_v54 }
 0x750   :  { %2806 = vmatprep.subr.bf16.mxu0 %v3690_v52  ;;  %2847 = vmatprep.subr.bf16.mxu1 %v3691_v0 }
 0x753   :  { %v3552_v12 = vpop.eup %3551  ;;  %2807 = vmatpush1.bf16.msra.mxu0 %v3692_v51  ;;  %2848 = vmatpush1.bf16.msra.mxu1 %v3693_v18 }
 0x754   :  { %2808 = vmatprep.subr.bf16.mxu0 %v3694_v4  ;;  %2849 = vmatprep.subr.bf16.mxu1 %v3695_v13  ;;  %v2652_v37 = vmul.f32 %v3552_v12, %v3550_v44 }
 0x756   :  { %v2658_v56 = vrot.slane %v2652_v37, 2  ;;  %v2790_v30 = vpack.c.bf16 %v2652_v37, %v2652_v37 }
 0x757   :  { %2809 = vmatpush1.bf16.msra.mxu0 %v3696_v21  ;;  %2850 = vmatpush1.bf16.msra.mxu1 %v3697_v59 }
 0x758   :  { %v5356_v39 = vadd.f32 %v2658_v56, %v5257_v33  ;;  %v2792_v35 = vrot.slane %v2790_v30, 1  ;;  %3193 = vmatprep.subr.mxu0 %v3721_v55  ;;  %v2922_v33 = vld [vmem:[%s5429_s6 + $0x48] sm:$0xff]  ;;  %v2783_v56 = vrot.slane %v5251_v58, 6 }
 0x75a   :  { %2827 = vmatmul.mubr.bf16.vlgmr.msra.gmra.mxu0 %v2792_v35  ;;  %2868 = vmatmul.mubr.bf16.vlgmr.msra.gmra.mxu1 %v2792_v35 }
 0x75b   :  { %3194 = vmatpush3.msra.mxu0 %v2928_v17  ;;  %3225 = vmatprep.mubr.msk.f32.mxu0 %vm3722_vm2, %v3721_v55 }
 0x75c   :  { %3195 = vmatprep.subr.mxu0 %v3721_v55 }
 0x75d   :  { %3196 = vmatpush3.msra.mxu0 %v2927_v31 }
 0x75e   :  { %3197 = vmatprep.subr.mxu0 %v3721_v55 }
 0x75f   :  { %3198 = vmatpush3.msra.mxu0 %v2926_v23 }
 0x760   :  { %3199 = vmatprep.subr.mxu0 %v3721_v55 }
 0x761   :  { %3200 = vmatpush3.msra.mxu0 %v2925_v46 }
 0x762   :  { %3201 = vmatprep.subr.mxu0 %v3721_v55 }
 0x763   :  { %3202 = vmatpush3.msra.mxu0 %v2924_v41 }
 0x764   :  { %3203 = vmatprep.subr.mxu0 %v3721_v55 }
 0x765   :  { %3204 = vmatpush3.msra.mxu0 %v2923_v50 }
 0x766   :  { %3205 = vmatprep.subr.mxu0 %v3721_v55 }
 0x767   :  { %3206 = vmatpush3.msra.mxu0 %v2922_v33 }
 0x768   :  { %3207 = vmatprep.subr.mxu0 %v3721_v55 }
 0x769   :  { %3208 = vmatpush3.msra.mxu0 %v2921_v8 }
 0x76a   :  { %3209 = vmatprep.subr.mxu0 %v3721_v55 }
 0x76b   :  { %3210 = vmatpush3.msra.mxu0 %v2920_v29 }
 0x76c   :  { %3211 = vmatprep.subr.mxu0 %v3721_v55 }
 0x76d   :  { %3212 = vmatpush3.msra.mxu0 %v2919_v11 }
 0x76e   :  { %3213 = vmatprep.subr.mxu0 %v3721_v55 }
 0x76f   :  { %3214 = vmatpush3.msra.mxu0 %v2918_v15 }
 0x770   :  { %3215 = vmatprep.subr.mxu0 %v3721_v55 }
 0x771   :  { %3216 = vmatpush3.msra.mxu0 %v2917_v24 }
 0x772   :  { %3217 = vmatprep.subr.mxu0 %v3721_v55 }
 0x773   :  { %3218 = vmatpush3.msra.mxu0 %v2916_v9 }
 0x774   :  { %3219 = vmatprep.subr.mxu0 %v3721_v55 }
 0x775   :  { %3220 = vmatpush3.msra.mxu0 %v2915_v16 }
 0x776   :  { %3221 = vmatprep.subr.mxu0 %v3721_v55 }
 0x777   :  { %3222 = vmatpush3.msra.mxu0 %v2914_v19  ;;  %v2900_v19 = vrot.slane %v5292_v1, 2 }
 0x778   :  { %3223 = vmatprep.subr.mxu0 %v3721_v55 }
 0x779   :  { %3224 = vmatpush3.msra.mxu0 %v2913_v57 }
 0x7fa   :  { %v2699_v62 = vpop.f32.mrf.mxu0  ;;  %v2740_v27 = vpop.f32.mrf.mxu1 }
 0x7fb   :  { %v2751_v42 = vrot.slane %v2699_v62, 2  ;;  %v2753_v47 = vrot.slane %v2740_v27, 2 }
 0x7fc   :  { %v2701_v14 = vpop.f32.mrf.mxu0  ;;  %v2742_v60 = vpop.f32.mrf.mxu1 }
 0x7fd   :  { %v2759_v32 = vadd.f32 %v2751_v42, %v5738_v48  ;;  %v2752_v63 = vrot.slane %v2701_v14, 2  ;;  %v2754_v36 = vrot.slane %v2742_v60, 2  ;;  %v2761_v61 = vadd.f32 %v2753_v47, %v5758_v40 }
 0x7fe   :  { %v2703_v26 = vpop.f32.mrf.mxu0  ;;  %v2744_v20 = vpop.f32.mrf.mxu1 }
 0x7ff   :  { %v3169_v22 = vmul.f32 -1.442695, %v2759_v32  ;;  %v2760_v28 = vadd.f32 %v2752_v63, %v5756_v45  ;;  %v2762_v38 = vadd.f32 %v2754_v36, %v5757_v49 }
 0x800   :  { %v2704_v2 = vpop.f32.mrf.mxu0  ;;  %v2745_v3 = vpop.f32.mrf.mxu1 }
 0x801   :  { %3553 = vpow2.f32 %v3169_v22  ;;  %v3170_v34 = vmul.f32 -1.442695, %v2760_v28  ;;  %v3171_v53 = vmul.f32 -1.442695, %v2762_v38 }
 0x803   :  { %3555 = vpow2.f32 %v3170_v34 }
 0x804   :  { %3557 = vpow2.f32 %v3171_v53 }
 0x80e   :  { %v3554_v25 = vpop.eup %3553 }
 0x80f   :  { %v2766_v48 = vadd.f32 1.0, %v3554_v25 }
 0x810   :  { %v3556_v7 = vpop.eup %3555 }
 0x811   :  { %3559 = vrcp.f32 %v2766_v48  ;;  %v2772_v54 = vadd.f32 1.0, %v3556_v7  ;;  %v3558_v51 = vpop.eup %3557 }
 0x812   :  { %3561 = vtanh.f32 %v2761_v61  ;;  %v2779_v59 = vadd.f32 1.0, %v3558_v51 }
 0x813   :  { %3563 = vrcp.f32 %v2772_v54 }
 0x81a   :  { %v2828_v45 = vpop.f32.mrf.mxu0  ;;  %v2869_v52 = vpop.f32.mrf.mxu1 }
 0x81b   :  { %v2876_v0 = vadd.f32 %v2828_v45, %v5706_v43  ;;  %v2878_v41 = vadd.f32 %v2869_v52, %v5709_v6 }
 0x81c   :  { %v2830_v44 = vpop.f32.mrf.mxu0  ;;  %v2871_v12 = vpop.f32.mrf.mxu1 }
 0x81d   :  { %v3172_v49 = vmul.f32 -1.442695, %v2876_v0  ;;  %v2877_v18 = vadd.f32 %v2830_v44, %v5707_v10  ;;  %v2879_v10 = vadd.f32 %v2871_v12, %v5708_v5 }
 0x81e   :  { %v3560_v4 = vpop.eup %3559  ;;  %v2832_v13 = vpop.f32.mrf.mxu0 }
 0x81f   :  { %v2873_v40 = vpop.f32.mrf.mxu1  ;;  %v3562_v37 = vpop.eup %3561  ;;  %3565 = vpow2.f32 %v3172_v49  ;;  %v3173_v30 = vmul.f32 -1.442695, %v2877_v18  ;;  %v3174_v23 = vmul.f32 -1.442695, %v2879_v10 }
 0x820   :  { %v3564_v21 = vpop.eup %3563  ;;  %v2833_v35 = vpop.f32.mrf.mxu0  ;;  %v2786_v17 = vmul.f32 %v3562_v37, %v3560_v4 }
 0x821   :  { %v2874_v55 = vpop.f32.mrf.mxu1  ;;  %v2785_v43 = vmul.f32 %v3564_v21, %v2783_v56  ;;  %3567 = vpow2.f32 %v3173_v30 }
 0x822   :  { %3569 = vrcp.f32 %v2779_v59 }
 0x823   :  { %v2787_v31 = vadd.f32 %v2786_v17, %v2785_v43 }
 0x825   :  { %3571 = vtanh.f32 %v2787_v31 }
 0x826   :  { %3573 = vpow2.f32 %v3174_v23 }
 0x82c   :  { %v3566_v46 = vpop.eup %3565 }
 0x82d   :  { %v2883_v50 = vadd.f32 1.0, %v3566_v46 }
 0x82e   :  { %v3568_v58 = vpop.eup %3567 }
 0x82f   :  { %3575 = vrcp.f32 %v2883_v50  ;;  %v2889_v33 = vadd.f32 1.0, %v3568_v58  ;;  %v3570_v8 = vpop.eup %3569 }
 0x830   :  { %3577 = vtanh.f32 %v2878_v41 }
 0x831   :  { %3579 = vrcp.f32 %v2889_v33 }
 0x832   :  { %v3572_v29 = vpop.eup %3571 }
 0x833   :  { %v2789_v11 = vmul.f32 %v3572_v29, %v3570_v8  ;;  %v3574_v9 = vpop.eup %3573 }
 0x834   :  { %v2896_v6 = vadd.f32 1.0, %v3574_v9 }
 0x835   :  { %v2908_v15 = vrot.slane %v2789_v11, 6 }
 0x836   :  { %3581 = vrcp.f32 %v2896_v6 }
 0x837   :  { %v2910_v24 = vadd.f32 %v2908_v15, %v5356_v39  ;;  %v3175_v39 = vld [vmem:[%s5430_s7] ss:$0 sm:$0xff] }
 0x83c   :  { %v3576_v16 = vpop.eup %3575 }
 0x83d   :  { %v3578_v5 = vpop.eup %3577 }
 0x83e   :  { %v3580_v57 = vpop.eup %3579  ;;  %v2903_v62 = vmul.f32 %v3578_v5, %v3576_v16 }
 0x83f   :  { %v2902_v27 = vmul.f32 %v3580_v57, %v2900_v19 }
 0x841   :  { %v2904_v42 = vadd.f32 %v2903_v62, %v2902_v27 }
 0x843   :  { %3583 = vtanh.f32 %v2904_v42  ;;  %v3582_v14 = vpop.eup %3581 }
 0x850   :  { %v3584_v60 = vpop.eup %3583 }
 0x851   :  { %v2906_v32 = vmul.f32 %v3584_v60, %v3582_v14 }
 0x853   :  { %v2911_v63 = vadd.f32 %v2910_v24, %v2906_v32 }
 0x855   :  { %3585 = vtanh.f32 %v2911_v63 }
 0x862   :  { %v3586_v26 = vpop.eup %3585 }
 0x863   :  { %3226 = vmatmul.mubr.f32.vlgmr.msra.gmra.mxu0 %v3586_v26 }
 0x923   :  { %v3002_v1 = vpop.f32.mrf.mxu0 }
 0x924   :  { %v3003_v20 = vadd.f32 %v3175_v39, %v3002_v1 }
 0x925   :  { %v3227_v22 = vpop.f32.mrf.mxu0 }
 0x926   :  { %3007 = vst.msk [vmem:[#allocation2] sm:$0x3] %vm3006_vm3, %v3003_v20 }
 0x927   :  { %3709 = shalt.err (!%p3706_p4)
}
 0x928   :  { %3017 = dma.vmem_to_hbm [thread:$0]  %s3015_s29, 32, %s5431_s8, [#allocation3]  }
 0x929   :  { %3718 = dma.done.wait [#allocation3], 32  }
 0x92a   :  { %3719 = vsyncadd [#allocation3], 4294967264 }
 0x92b   :  { %3021 = vsyncpa [#allocation3], 1 }

</bundles_post_ra>
